<compile_context>
chip_gen: v5e
topology: v5e:2x2
jax: 0.10.0
libtpu: 0.0.40
codegen_flags: <defaults>
</compile_context>

<pallas_src>
import functools

import jax
import jax.numpy as jnp
from jax.experimental import pallas as pl
from jax.experimental.pallas import tpu as pltpu


_VMEM_LIMIT = 32 * 1024 * 1024      # explicit scoped-VMEM budget (fits v5e/v6e/v7x)
_ROW_TILE_TARGET = 256              # ~flattened rows (th * W) per grid step


def _pick_row_tile(H, W):
    """Largest divisor `th` of H with th * W <= _ROW_TILE_TARGET (at least 1)."""
    th = max(1, min(H, _ROW_TILE_TARGET // max(W, 1)))
    while H % th:
        th -= 1
    return th


# ----------------------------- Pallas kernels ------------------------------


def _deconv2x2_kernel(x_ref, w_ref, b_ref, o_ref, *, pre_sigmoid, post_relu):
    # x_ref: (1, th, W, Cin)         bf16 input row tile
    # w_ref: (Cin, 4*Cout)           bf16, columns ordered (di, dj, cout)
    # b_ref: (1, 4*Cout)             f32 bias tiled over (di, dj)
    # o_ref: (1, th, 2, W, 2*Cout)   o_ref[0, t, di, j, dj*Cout + c]
    _, th, W, _ = x_ref.shape
    cout2 = o_ref.shape[-1]                       # 2 * Cout
    x = x_ref[0]                                  # (th, W, Cin)
    if pre_sigmoid:
        x = jax.nn.sigmoid(x.astype(jnp.float32)).astype(jnp.bfloat16)
    xf = x.reshape(th * W, x.shape[-1])
    # One MXU pass computes all four sub-pixels (lane width 4*Cout).
    y = jnp.dot(xf, w_ref[...], preferred_element_type=jnp.float32)
    y = y + b_ref[...]
    if post_relu:
        y = jnp.maximum(y, 0.0)
    # Interleave the sub-pixels inside VMEM so the wrapper up-sample is a pure
    # reshape: output row di gets columns [di*2*Cout, (di+1)*2*Cout).
    for di in range(2):
        ydi = y[:, di * cout2:(di + 1) * cout2]               # (th*W, 2*Cout)
        o_ref[0, :, di, :, :] = ydi.reshape(th, W, cout2).astype(o_ref.dtype)


def _deconv3x3_kernel(x_ref, w_ref, b_ref, o_ref, *, post_relu):
    # x_ref: (1, H, W, Cin)    full-height bf16 input (resident across h tiles)
    # w_ref: (9*Cin, Cout)     bf16 im2col-packed, spatially flipped weights
    # b_ref: (1, Cout)         f32
    # o_ref: (1, th, W, Cout)  output row tile
    h = pl.program_id(1)
    nh = pl.num_programs(1)
    _, H, W, cin = x_ref.shape
    th = o_ref.shape[1]
    cout = o_ref.shape[-1]

    row0 = pl.multiple_of(h * th, th)
    # Build the zero-padded (th+2, W+2, Cin) window entirely in VMEM
    # (halo rows from the resident full-height block, zero side columns).
    # Window construction is done in f32 (relayout-friendly), MXU runs in bf16.
    mid = x_ref[0, pl.ds(row0, th)].astype(jnp.float32)               # (th, W, Cin)
    top = x_ref[0, pl.ds(jnp.maximum(row0 - 1, 0), 1)].astype(jnp.float32)
    bot = x_ref[0, pl.ds(jnp.minimum(row0 + th, H - 1), 1)].astype(jnp.float32)
    top = jnp.where(h > 0, top, jnp.zeros_like(top))
    bot = jnp.where(h < nh - 1, bot, jnp.zeros_like(bot))
    rows = jnp.concatenate([top, mid, bot], axis=0)                   # (th+2, W, Cin)
    zcol = jnp.zeros((th + 2, 1, cin), rows.dtype)
    xpad = jnp.concatenate([zcol, rows, zcol], axis=1)                # (th+2, W+2, Cin)

    # im2col once: 9 shifted taps concatenated on the lane axis, then a single
    # MXU matmul with contraction depth 9*Cin.
    taps = [xpad[sy:sy + th, sx:sx + W, :] for sy in range(3) for sx in range(3)]
    patch = jnp.concatenate(taps, axis=-1)                            # (th, W, 9*Cin)
    patch = patch.reshape(th * W, 9 * cin).astype(jnp.bfloat16)
    y = jnp.dot(patch, w_ref[...], preferred_element_type=jnp.float32)
    y = y + b_ref[...]
    if post_relu:
        y = jnp.maximum(y, 0.0)
    o_ref[0] = y.reshape(th, W, cout).astype(o_ref.dtype)


# ------------------------------ JAX wrappers --------------------------------


def conv_transpose2x2_s2(x_nhwc, w_packed, b_packed, *, pre_sigmoid=False,
                         post_relu=False, out_dtype=jnp.bfloat16):
    """ConvTranspose2d(kernel_size=2, stride=2) on a bf16 NHWC input.

    w_packed: (Cin, 4*Cout) bf16, columns (di, dj, cout); b_packed: (1, 4*Cout) f32.
    Returns (N, 2H, 2W, Cout) in out_dtype.
    """
    N, H, W, Cin = x_nhwc.shape
    cout4 = w_packed.shape[1]
    cout = cout4 // 4
    th = _pick_row_tile(H, W)
    kern = functools.partial(_deconv2x2_kernel, pre_sigmoid=pre_sigmoid,
                             post_relu=post_relu)
    out5 = pl.pallas_call(
        kern,
        grid=(N, H // th),
        in_specs=[
            pl.BlockSpec((1, th, W, Cin), lambda n, h: (n, h, 0, 0)),
            pl.BlockSpec((Cin, cout4), lambda n, h: (0, 0)),
            pl.BlockSpec((1, cout4), lambda n, h: (0, 0)),
        ],
        out_specs=pl.BlockSpec((1, th, 2, W, 2 * cout),
                               lambda n, h: (n, h, 0, 0, 0)),
        out_shape=jax.ShapeDtypeStruct((N, H, 2, W, 2 * cout), out_dtype),
        compiler_params=pltpu.CompilerParams(
            dimension_semantics=("parallel", "parallel"),
            vmem_limit_bytes=_VMEM_LIMIT),
    )(x_nhwc, w_packed, b_packed)
    # Sub-pixels were interleaved in-kernel: the up-sample is a pure reshape.
    return out5.reshape(N, 2 * H, 2 * W, cout)


def conv_transpose3x3_p1(x_nhwc, w_packed, b_packed, *, post_relu=False,
                         out_dtype=jnp.bfloat16):
    """ConvTranspose2d(kernel_size=3, stride=1, padding=1) on bf16 NHWC input.

    w_packed: (9*Cin, Cout) bf16 (flipped, im2col order); b_packed: (1, Cout) f32.
    """
    N, H, W, Cin = x_nhwc.shape
    cout = w_packed.shape[1]
    th = _pick_row_tile(H, W)
    kern = functools.partial(_deconv3x3_kernel, post_relu=post_relu)
    return pl.pallas_call(
        kern,
        grid=(N, H // th),
        in_specs=[
            # Full-height block stays resident in VMEM across the h tiles of
            # one image; the kernel slices its halo rows (padding in-kernel).
            pl.BlockSpec((1, H, W, Cin), lambda n, h: (n, 0, 0, 0)),
            pl.BlockSpec((9 * Cin, cout), lambda n, h: (0, 0)),
            pl.BlockSpec((1, cout), lambda n, h: (0, 0)),
        ],
        out_specs=pl.BlockSpec((1, th, W, cout), lambda n, h: (n, h, 0, 0)),
        out_shape=jax.ShapeDtypeStruct((N, H, W, cout), out_dtype),
        compiler_params=pltpu.CompilerParams(
            dimension_semantics=("parallel", "parallel"),
            vmem_limit_bytes=_VMEM_LIMIT),
    )(x_nhwc, w_packed, b_packed)


# --------------------------- weight packing helpers --------------------------


def _pack_k2(w, b):
    # w: (Cin, Cout, 2, 2) f32 -> (Cin, 4*Cout) bf16 with columns (di, dj, c).
    cin, cout = w.shape[0], w.shape[1]
    w_p = jnp.transpose(w, (0, 2, 3, 1)).reshape(cin, 4 * cout).astype(jnp.bfloat16)
    b_p = jnp.tile(b, 4).reshape(1, 4 * cout).astype(jnp.float32)
    return w_p, b_p


def _pack_k3(w, b):
    # transpose-conv(k=3, s=1, p=1) == "same" cross-correlation of the padded
    # input with the spatially flipped kernel; pack im2col order (sy, sx, cin).
    cin, cout = w.shape[0], w.shape[1]
    w_f = jnp.transpose(w[:, :, ::-1, ::-1], (2, 3, 0, 1))   # (3, 3, Cin, Cout)
    w_p = w_f.reshape(9 * cin, cout).astype(jnp.bfloat16)
    b_p = b.reshape(1, cout).astype(jnp.float32)
    return w_p, b_p


# ------------------------- DeConvolution module ------------------------------


class DeConvolutionPallas:
    """Mirror of the PyTorch DeConvolution module (NCHW in / NCHW out)."""

    def __init__(self, dims, key):
        d = list(dims)
        d.reverse()
        self.layers = []   # (kind, w_f32, b_f32, w_packed_bf16, b_packed_f32)
        for i in range(len(d) - 2):
            in_dim, out_dim = d[i], d[i + 1]
            k = 2 if i % 2 == 0 else 3
            key, wk, bk = jax.random.split(key, 3)
            bound = float(in_dim * k * k) ** -0.5
            w = jax.random.uniform(wk, (in_dim, out_dim, k, k), jnp.float32,
                                   -bound, bound)
            b = jax.random.uniform(bk, (out_dim,), jnp.float32, -bound, bound)
            if k == 2:
                self.layers.append(("k2_relu", w, b) + _pack_k2(w, b))
            else:
                self.layers.append(("k3_relu", w, b) + _pack_k3(w, b))
        # final: Sigmoid -> ConvTranspose2d(k=2, stride=2), no activation after
        in_dim, out_dim = d[-2], d[-1]
        key, wk, bk = jax.random.split(key, 3)
        bound = float(in_dim * 4) ** -0.5
        w = jax.random.uniform(wk, (in_dim, out_dim, 2, 2), jnp.float32,
                               -bound, bound)
        b = jax.random.uniform(bk, (out_dim,), jnp.float32, -bound, bound)
        self.layers.append(("sigmoid_k2", w, b) + _pack_k2(w, b))

    def __call__(self, x_nchw):
        # NCHW -> NHWC at the boundary; bf16 activations, f32 accumulation.
        x = jnp.transpose(x_nchw, (0, 2, 3, 1)).astype(jnp.bfloat16)
        last = len(self.layers) - 1
        for idx, (kind, _, _, w_p, b_p) in enumerate(self.layers):
            out_dtype = jnp.float32 if idx == last else jnp.bfloat16
            if kind == "k2_relu":
                x = conv_transpose2x2_s2(x, w_p, b_p, post_relu=True,
                                         out_dtype=out_dtype)
            elif kind == "k3_relu":
                x = conv_transpose3x3_p1(x, w_p, b_p, post_relu=True,
                                         out_dtype=out_dtype)
            else:   # sigmoid, then the final transpose conv (no activation)
                x = conv_transpose2x2_s2(x, w_p, b_p, pre_sigmoid=True,
                                         out_dtype=out_dtype)
        return jnp.transpose(x, (0, 3, 1, 2))                 # -> NCHW (f32)

    # pure-JAX f32 reference (XLA convs) for a correctness cross-check
    def reference(self, x_nchw):
        x = x_nchw.astype(jnp.float32)
        for kind, w, b, _, _ in self.layers:
            if kind == "k2_relu":
                x = jax.nn.relu(_ref_conv_transpose(x, w, b, stride=2, padding=0))
            elif kind == "k3_relu":
                x = jax.nn.relu(_ref_conv_transpose(x, w, b, stride=1, padding=1))
            else:
                x = _ref_conv_transpose(jax.nn.sigmoid(x), w, b, stride=2, padding=0)
        return x


def _ref_conv_transpose(x_nchw, w, b, *, stride, padding):
    # PyTorch ConvTranspose2d == conv of input-dilated x with flipped kernel,
    # IO channels swapped, padding = k - 1 - padding.
    k = w.shape[2]
    rhs = jnp.flip(w, axis=(2, 3)).transpose(1, 0, 2, 3)      # (Cout, Cin, k, k)
    pad = k - 1 - padding
    y = jax.lax.conv_general_dilated(
        x_nchw, rhs, window_strides=(1, 1),
        padding=[(pad, pad), (pad, pad)],
        lhs_dilation=(stride, stride),
        dimension_numbers=("NCHW", "OIHW", "NCHW"))
    return y + b.reshape(1, -1, 1, 1)


# ---------------------------------- main -------------------------------------

if __name__ == "__main__":
    key = jax.random.PRNGKey(0)
    dims = [1, 8, 16, 32]           # encoder dims; module reverses -> [32, 16, 8, 1]
    model = DeConvolutionPallas(dims, key)

    x = jax.random.normal(jax.random.fold_in(key, 123), (2, 32, 16, 16), jnp.float32)

    fwd = jax.jit(model.__call__)
    out = jax.block_until_ready(fwd(x))
    assert out.shape == (2, 1, 64, 64), out.shape

    ref = jax.block_until_ready(model.reference(x))
    # bf16 activations/weights with f32 accumulation -> loose tolerance.
    if not jnp.allclose(out, ref, atol=5e-2, rtol=5e-2):
        err = float(jnp.max(jnp.abs(out - ref)))
        raise AssertionError(f"Pallas output does not match XLA reference (max err={err})")

    print("KERNEL_OK")
</pallas_src>

<mosaic_0001>
module attributes {stable_mosaic.version = 11 : i64} {
  func.func @_deconv3x3_kernel(%arg0: i32, %arg1: i32, %arg2: memref<1x32x32x16xbf16, #tpu.memory_space<vmem>>, %arg3: memref<144x8xbf16, #tpu.memory_space<vmem>>, %arg4: memref<1x8xf32, #tpu.memory_space<vmem>>, %arg5: memref<1x8x32x8xbf16, #tpu.memory_space<vmem>>) attributes {dimension_semantics = [#tpu.dimension_semantics<parallel>, #tpu.dimension_semantics<parallel>], iteration_bounds = array<i64: 2, 4>, scalar_prefetch = 0 : i64, scratch_operands = 0 : i64, tpu.core_type = #tpu.core_type<tc>, window_params = [{transform_indices = @transform_0, window_bounds = array<i64: 1, 32, 32, 16>}, {pipeline_mode = #tpu.pipeline_mode<synchronous>, transform_indices = @transform_1, window_bounds = array<i64: 144, 8>}, {pipeline_mode = #tpu.pipeline_mode<synchronous>, transform_indices = @transform_2, window_bounds = array<i64: 1, 8>}, {transform_indices = @transform_3, window_bounds = array<i64: 1, 8, 32, 8>}]} {
    %c8_i32 = arith.constant 8 : i32
    %0 = arith.muli %arg1, %c8_i32 : i32
    %1 = tpu.assume_multiple %0, 8 : i32
    %c0 = arith.constant 0 : index
    %2 = arith.index_cast %1 : i32 to index
    %c0_0 = arith.constant 0 : index
    %c0_1 = arith.constant 0 : index
    %3 = vector.load %arg2[%c0, %2, %c0_0, %c0_1] : memref<1x32x32x16xbf16, #tpu.memory_space<vmem>>, vector<1x8x32x16xbf16>
    %4 = vector.shape_cast %3 : vector<1x8x32x16xbf16> to vector<8x32x16xbf16>
    %5 = arith.extf %4 : vector<8x32x16xbf16> to vector<8x32x16xf32>
    %c1_i32 = arith.constant 1 : i32
    %6 = arith.subi %1, %c1_i32 : i32
    %c0_i32 = arith.constant 0 : i32
    %7 = arith.maxsi %6, %c0_i32 : i32
    %c0_2 = arith.constant 0 : index
    %8 = arith.index_cast %7 : i32 to index
    %c0_3 = arith.constant 0 : index
    %c0_4 = arith.constant 0 : index
    %9 = vector.load %arg2[%c0_2, %8, %c0_3, %c0_4] : memref<1x32x32x16xbf16, #tpu.memory_space<vmem>>, vector<1x1x32x16xbf16>
    %10 = vector.shape_cast %9 : vector<1x1x32x16xbf16> to vector<1x32x16xbf16>
    %11 = arith.extf %10 : vector<1x32x16xbf16> to vector<1x32x16xf32>
    %c8_i32_5 = arith.constant 8 : i32
    %12 = arith.addi %1, %c8_i32_5 : i32
    %c31_i32 = arith.constant 31 : i32
    %13 = arith.minsi %12, %c31_i32 : i32
    %c0_6 = arith.constant 0 : index
    %14 = arith.index_cast %13 : i32 to index
    %c0_7 = arith.constant 0 : index
    %c0_8 = arith.constant 0 : index
    %15 = vector.load %arg2[%c0_6, %14, %c0_7, %c0_8] : memref<1x32x32x16xbf16, #tpu.memory_space<vmem>>, vector<1x1x32x16xbf16>
    %16 = vector.shape_cast %15 : vector<1x1x32x16xbf16> to vector<1x32x16xbf16>
    %17 = arith.extf %16 : vector<1x32x16xbf16> to vector<1x32x16xf32>
    %c0_i32_9 = arith.constant 0 : i32
    %18 = arith.cmpi sgt, %arg1, %c0_i32_9 : i32
    %cst = arith.constant 0.000000e+00 : f32
    %19 = vector.broadcast %cst : f32 to vector<1x32x16xf32>
    %20 = arith.select %18, %11, %19 : vector<1x32x16xf32>
    %c3_i32 = arith.constant 3 : i32
    %21 = arith.cmpi slt, %arg1, %c3_i32 : i32
    %cst_10 = arith.constant 0.000000e+00 : f32
    %22 = vector.broadcast %cst_10 : f32 to vector<1x32x16xf32>
    %23 = arith.select %21, %17, %22 : vector<1x32x16xf32>
    %24 = tpu.concatenate %20, %5, %23 in 0 : vector<1x32x16xf32>, vector<8x32x16xf32>, vector<1x32x16xf32> -> vector<10x32x16xf32>
    %cst_11 = arith.constant 0.000000e+00 : f32
    %25 = vector.broadcast %cst_11 : f32 to vector<10x1x16xf32>
    %26 = tpu.concatenate %25, %24, %25 in 1 : vector<10x1x16xf32>, vector<10x32x16xf32>, vector<10x1x16xf32> -> vector<10x34x16xf32>
    %27 = vector.extract_strided_slice %26 {offsets = [0, 0, 0], sizes = [8, 32, 16], strides = [1, 1, 1]} : vector<10x34x16xf32> to vector<8x32x16xf32>
    %28 = vector.extract_strided_slice %26 {offsets = [0, 1, 0], sizes = [8, 32, 16], strides = [1, 1, 1]} : vector<10x34x16xf32> to vector<8x32x16xf32>
    %29 = vector.extract_strided_slice %26 {offsets = [0, 2, 0], sizes = [8, 32, 16], strides = [1, 1, 1]} : vector<10x34x16xf32> to vector<8x32x16xf32>
    %30 = vector.extract_strided_slice %26 {offsets = [1, 0, 0], sizes = [8, 32, 16], strides = [1, 1, 1]} : vector<10x34x16xf32> to vector<8x32x16xf32>
    %31 = vector.extract_strided_slice %26 {offsets = [1, 1, 0], sizes = [8, 32, 16], strides = [1, 1, 1]} : vector<10x34x16xf32> to vector<8x32x16xf32>
    %32 = vector.extract_strided_slice %26 {offsets = [1, 2, 0], sizes = [8, 32, 16], strides = [1, 1, 1]} : vector<10x34x16xf32> to vector<8x32x16xf32>
    %33 = vector.extract_strided_slice %26 {offsets = [2, 0, 0], sizes = [8, 32, 16], strides = [1, 1, 1]} : vector<10x34x16xf32> to vector<8x32x16xf32>
    %34 = vector.extract_strided_slice %26 {offsets = [2, 1, 0], sizes = [8, 32, 16], strides = [1, 1, 1]} : vector<10x34x16xf32> to vector<8x32x16xf32>
    %35 = vector.extract_strided_slice %26 {offsets = [2, 2, 0], sizes = [8, 32, 16], strides = [1, 1, 1]} : vector<10x34x16xf32> to vector<8x32x16xf32>
    %36 = tpu.concatenate %27, %28, %29, %30, %31, %32, %33, %34, %35 in 2 : vector<8x32x16xf32>, vector<8x32x16xf32>, vector<8x32x16xf32>, vector<8x32x16xf32>, vector<8x32x16xf32>, vector<8x32x16xf32>, vector<8x32x16xf32>, vector<8x32x16xf32>, vector<8x32x16xf32> -> vector<8x32x144xf32>
    %37 = vector.shape_cast %36 : vector<8x32x144xf32> to vector<256x144xf32>
    %38 = arith.truncf %37 : vector<256x144xf32> to vector<256x144xbf16>
    %c0_12 = arith.constant 0 : index
    %c0_13 = arith.constant 0 : index
    %39 = vector.load %arg3[%c0_12, %c0_13] : memref<144x8xbf16, #tpu.memory_space<vmem>>, vector<144x8xbf16>
    %cst_14 = arith.constant dense<0.000000e+00> : vector<256x8xf32>
    %40 = tpu.matmul %38, %39, %cst_14 {dimension_numbers = #tpu.dot_dimension_numbers<[1], [0], [0], [1], [0, 0, 1, 1], [], []>} : vector<256x144xbf16>, vector<144x8xbf16>, vector<256x8xf32> -> vector<256x8xf32>
    %c0_15 = arith.constant 0 : index
    %c0_16 = arith.constant 0 : index
    %41 = vector.load %arg4[%c0_15, %c0_16] : memref<1x8xf32, #tpu.memory_space<vmem>>, vector<1x8xf32>
    %42 = vector.broadcast %41 : vector<1x8xf32> to vector<256x8xf32>
    %43 = arith.addf %40, %42 : vector<256x8xf32>
    %cst_17 = arith.constant 0.000000e+00 : f32
    %44 = vector.broadcast %cst_17 : f32 to vector<256x8xf32>
    %45 = arith.maximumf %43, %44 : vector<256x8xf32>
    %46 = vector.shape_cast %45 : vector<256x8xf32> to vector<8x32x8xf32>
    %47 = arith.truncf %46 : vector<8x32x8xf32> to vector<8x32x8xbf16>
    %c0_18 = arith.constant 0 : index
    %c0_19 = arith.constant 0 : index
    %c0_20 = arith.constant 0 : index
    %c0_21 = arith.constant 0 : index
    %48 = vector.load %arg5[%c0_18, %c0_19, %c0_20, %c0_21] : memref<1x8x32x8xbf16, #tpu.memory_space<vmem>>, vector<1x8x32x8xbf16>
    %49 = vector.shape_cast %48 : vector<1x8x32x8xbf16> to vector<8x32x8xbf16>
    %50 = vector.shape_cast %47 : vector<8x32x8xbf16> to vector<1x8x32x8xbf16>
    tpu.vector_store %arg5[%c0_18, %c0_19, %c0_20, %c0_21], %50 {strides = array<i32>} : memref<1x8x32x8xbf16, #tpu.memory_space<vmem>>, vector<1x8x32x8xbf16>,
    return
  }
  func.func @transform_0(%arg0: i32, %arg1: i32) -> (i32, i32, i32, i32) {
    %c0_i32 = arith.constant 0 : i32
    %c0_i32_0 = arith.constant 0 : i32
    %c0_i32_1 = arith.constant 0 : i32
    %c0_i32_2 = arith.constant 0 : i32
    return %arg0, %c0_i32, %c0_i32_0, %c0_i32_1 : i32, i32, i32, i32
  }
  func.func @transform_1(%arg0: i32, %arg1: i32) -> (i32, i32) {
    %c0_i32 = arith.constant 0 : i32
    %c0_i32_0 = arith.constant 0 : i32
    %c0_i32_1 = arith.constant 0 : i32
    return %c0_i32, %c0_i32_0 : i32, i32
  }
  func.func @transform_2(%arg0: i32, %arg1: i32) -> (i32, i32) {
    %c0_i32 = arith.constant 0 : i32
    %c0_i32_0 = arith.constant 0 : i32
    %c0_i32_1 = arith.constant 0 : i32
    return %c0_i32, %c0_i32_0 : i32, i32
  }
  func.func @transform_3(%arg0: i32, %arg1: i32) -> (i32, i32, i32, i32) {
    %c0_i32 = arith.constant 0 : i32
    %c0_i32_0 = arith.constant 0 : i32
    %c0_i32_1 = arith.constant 0 : i32
    return %arg0, %arg1, %c0_i32, %c0_i32_0 : i32, i32, i32, i32
  }
}

module attributes {stable_mosaic.version = 11 : i64} {
  func.func @_deconv2x2_kernel(%arg0: i32, %arg1: i32, %arg2: memref<1x16x16x32xbf16, #tpu.memory_space<vmem>>, %arg3: memref<32x64xbf16, #tpu.memory_space<vmem>>, %arg4: memref<1x64xf32, #tpu.memory_space<vmem>>, %arg5: memref<1x16x2x16x32xbf16, #tpu.memory_space<vmem>>) attributes {dimension_semantics = [#tpu.dimension_semantics<parallel>, #tpu.dimension_semantics<parallel>], iteration_bounds = array<i64: 2, 1>, scalar_prefetch = 0 : i64, scratch_operands = 0 : i64, tpu.core_type = #tpu.core_type<tc>, window_params = [{transform_indices = @transform_0, window_bounds = array<i64: 1, 16, 16, 32>}, {pipeline_mode = #tpu.pipeline_mode<synchronous>, transform_indices = @transform_1, window_bounds = array<i64: 32, 64>}, {pipeline_mode = #tpu.pipeline_mode<synchronous>, transform_indices = @transform_2, window_bounds = array<i64: 1, 64>}, {transform_indices = @transform_3, window_bounds = array<i64: 1, 16, 2, 16, 32>}]} {
    %c0 = arith.constant 0 : index
    %c0_0 = arith.constant 0 : index
    %c0_1 = arith.constant 0 : index
    %c0_2 = arith.constant 0 : index
    %0 = vector.load %arg2[%c0, %c0_0, %c0_1, %c0_2] : memref<1x16x16x32xbf16, #tpu.memory_space<vmem>>, vector<1x16x16x32xbf16>
    %1 = vector.shape_cast %0 : vector<1x16x16x32xbf16> to vector<16x16x32xbf16>
    %2 = vector.shape_cast %1 : vector<16x16x32xbf16> to vector<256x32xbf16>
    %c0_3 = arith.constant 0 : index
    %c0_4 = arith.constant 0 : index
    %3 = vector.load %arg3[%c0_3, %c0_4] : memref<32x64xbf16, #tpu.memory_space<vmem>>, vector<32x64xbf16>
    %cst = arith.constant dense<0.000000e+00> : vector<256x64xf32>
    %4 = tpu.matmul %2, %3, %cst {dimension_numbers = #tpu.dot_dimension_numbers<[1], [0], [0], [1], [0, 0, 1, 1], [], []>} : vector<256x32xbf16>, vector<32x64xbf16>, vector<256x64xf32> -> vector<256x64xf32>
    %c0_5 = arith.constant 0 : index
    %c0_6 = arith.constant 0 : index
    %5 = vector.load %arg4[%c0_5, %c0_6] : memref<1x64xf32, #tpu.memory_space<vmem>>, vector<1x64xf32>
    %6 = vector.broadcast %5 : vector<1x64xf32> to vector<256x64xf32>
    %7 = arith.addf %4, %6 : vector<256x64xf32>
    %cst_7 = arith.constant 0.000000e+00 : f32
    %8 = vector.broadcast %cst_7 : f32 to vector<256x64xf32>
    %9 = arith.maximumf %7, %8 : vector<256x64xf32>
    %10 = vector.extract_strided_slice %9 {offsets = [0, 0], sizes = [256, 32], strides = [1, 1]} : vector<256x64xf32> to vector<256x32xf32>
    %11 = vector.shape_cast %10 : vector<256x32xf32> to vector<16x16x32xf32>
    %12 = arith.truncf %11 : vector<16x16x32xf32> to vector<16x16x32xbf16>
    %c0_8 = arith.constant 0 : index
    %c0_9 = arith.constant 0 : index
    %c0_10 = arith.constant 0 : index
    %c0_11 = arith.constant 0 : index
    %c0_12 = arith.constant 0 : index
    %13 = vector.load %arg5[%c0_8, %c0_9, %c0_10, %c0_11, %c0_12] : memref<1x16x2x16x32xbf16, #tpu.memory_space<vmem>>, vector<1x16x1x16x32xbf16>
    %14 = vector.shape_cast %13 : vector<1x16x1x16x32xbf16> to vector<16x16x32xbf16>
    %15 = vector.shape_cast %12 : vector<16x16x32xbf16> to vector<1x16x1x16x32xbf16>
    tpu.vector_store %arg5[%c0_8, %c0_9, %c0_10, %c0_11, %c0_12], %15 {strides = array<i32>} : memref<1x16x2x16x32xbf16, #tpu.memory_space<vmem>>, vector<1x16x1x16x32xbf16>,
    %16 = vector.extract_strided_slice %9 {offsets = [0, 32], sizes = [256, 32], strides = [1, 1]} : vector<256x64xf32> to vector<256x32xf32>
    %17 = vector.shape_cast %16 : vector<256x32xf32> to vector<16x16x32xf32>
    %18 = arith.truncf %17 : vector<16x16x32xf32> to vector<16x16x32xbf16>
    %c0_13 = arith.constant 0 : index
    %c0_14 = arith.constant 0 : index
    %c1 = arith.constant 1 : index
    %c0_15 = arith.constant 0 : index
    %c0_16 = arith.constant 0 : index
    %19 = vector.load %arg5[%c0_13, %c0_14, %c1, %c0_15, %c0_16] : memref<1x16x2x16x32xbf16, #tpu.memory_space<vmem>>, vector<1x16x1x16x32xbf16>
    %20 = vector.shape_cast %19 : vector<1x16x1x16x32xbf16> to vector<16x16x32xbf16>
    %21 = vector.shape_cast %18 : vector<16x16x32xbf16> to vector<1x16x1x16x32xbf16>
    tpu.vector_store %arg5[%c0_13, %c0_14, %c1, %c0_15, %c0_16], %21 {strides = array<i32>} : memref<1x16x2x16x32xbf16, #tpu.memory_space<vmem>>, vector<1x16x1x16x32xbf16>,
    return
  }
  func.func @transform_0(%arg0: i32, %arg1: i32) -> (i32, i32, i32, i32) {
    %c0_i32 = arith.constant 0 : i32
    %c0_i32_0 = arith.constant 0 : i32
    %c0_i32_1 = arith.constant 0 : i32
    return %arg0, %arg1, %c0_i32, %c0_i32_0 : i32, i32, i32, i32
  }
  func.func @transform_1(%arg0: i32, %arg1: i32) -> (i32, i32) {
    %c0_i32 = arith.constant 0 : i32
    %c0_i32_0 = arith.constant 0 : i32
    %c0_i32_1 = arith.constant 0 : i32
    return %c0_i32, %c0_i32_0 : i32, i32
  }
  func.func @transform_2(%arg0: i32, %arg1: i32) -> (i32, i32) {
    %c0_i32 = arith.constant 0 : i32
    %c0_i32_0 = arith.constant 0 : i32
    %c0_i32_1 = arith.constant 0 : i32
    return %c0_i32, %c0_i32_0 : i32, i32
  }
  func.func @transform_3(%arg0: i32, %arg1: i32) -> (i32, i32, i32, i32, i32) {
    %c0_i32 = arith.constant 0 : i32
    %c0_i32_0 = arith.constant 0 : i32
    %c0_i32_1 = arith.constant 0 : i32
    %c0_i32_2 = arith.constant 0 : i32
    return %arg0, %arg1, %c0_i32, %c0_i32_0, %c0_i32_1 : i32, i32, i32, i32, i32
  }
}

module attributes {stable_mosaic.version = 11 : i64} {
  func.func @_deconv2x2_kernel(%arg0: i32, %arg1: i32, %arg2: memref<1x8x32x8xbf16, #tpu.memory_space<vmem>>, %arg3: memref<8x4xbf16, #tpu.memory_space<vmem>>, %arg4: memref<1x4xf32, #tpu.memory_space<vmem>>, %arg5: memref<1x8x2x32x2xf32, #tpu.memory_space<vmem>>) attributes {dimension_semantics = [#tpu.dimension_semantics<parallel>, #tpu.dimension_semantics<parallel>], iteration_bounds = array<i64: 2, 4>, scalar_prefetch = 0 : i64, scratch_operands = 0 : i64, tpu.core_type = #tpu.core_type<tc>, window_params = [{transform_indices = @transform_0, window_bounds = array<i64: 1, 8, 32, 8>}, {pipeline_mode = #tpu.pipeline_mode<synchronous>, transform_indices = @transform_1, window_bounds = array<i64: 8, 4>}, {pipeline_mode = #tpu.pipeline_mode<synchronous>, transform_indices = @transform_2, window_bounds = array<i64: 1, 4>}, {transform_indices = @transform_3, window_bounds = array<i64: 1, 8, 2, 32, 2>}]} {
    %c0 = arith.constant 0 : index
    %c0_0 = arith.constant 0 : index
    %c0_1 = arith.constant 0 : index
    %c0_2 = arith.constant 0 : index
    %0 = vector.load %arg2[%c0, %c0_0, %c0_1, %c0_2] : memref<1x8x32x8xbf16, #tpu.memory_space<vmem>>, vector<1x8x32x8xbf16>
    %1 = vector.shape_cast %0 : vector<1x8x32x8xbf16> to vector<8x32x8xbf16>
    %2 = arith.extf %1 : vector<8x32x8xbf16> to vector<8x32x8xf32>
    %3 = arith.negf %2 : vector<8x32x8xf32>
    %4 = math.exp %3 : vector<8x32x8xf32>
    %cst = arith.constant 1.000000e+00 : f32
    %5 = vector.broadcast %cst : f32 to vector<8x32x8xf32>
    %6 = arith.addf %5, %4 : vector<8x32x8xf32>
    %7 = arith.divf %5, %6 : vector<8x32x8xf32>
    %8 = arith.truncf %7 : vector<8x32x8xf32> to vector<8x32x8xbf16>
    %9 = vector.shape_cast %8 : vector<8x32x8xbf16> to vector<256x8xbf16>
    %c0_3 = arith.constant 0 : index
    %c0_4 = arith.constant 0 : index
    %10 = vector.load %arg3[%c0_3, %c0_4] : memref<8x4xbf16, #tpu.memory_space<vmem>>, vector<8x4xbf16>
    %cst_5 = arith.constant dense<0.000000e+00> : vector<256x4xf32>
    %11 = tpu.matmul %9, %10, %cst_5 {dimension_numbers = #tpu.dot_dimension_numbers<[1], [0], [0], [1], [0, 0, 1, 1], [], []>} : vector<256x8xbf16>, vector<8x4xbf16>, vector<256x4xf32> -> vector<256x4xf32>
    %c0_6 = arith.constant 0 : index
    %c0_7 = arith.constant 0 : index
    %12 = vector.load %arg4[%c0_6, %c0_7] : memref<1x4xf32, #tpu.memory_space<vmem>>, vector<1x4xf32>
    %13 = vector.broadcast %12 : vector<1x4xf32> to vector<256x4xf32>
    %14 = arith.addf %11, %13 : vector<256x4xf32>
    %15 = vector.extract_strided_slice %14 {offsets = [0, 0], sizes = [256, 2], strides = [1, 1]} : vector<256x4xf32> to vector<256x2xf32>
    %16 = vector.shape_cast %15 : vector<256x2xf32> to vector<8x32x2xf32>
    %c0_8 = arith.constant 0 : index
    %c0_9 = arith.constant 0 : index
    %c0_10 = arith.constant 0 : index
    %c0_11 = arith.constant 0 : index
    %c0_12 = arith.constant 0 : index
    %17 = vector.load %arg5[%c0_8, %c0_9, %c0_10, %c0_11, %c0_12] : memref<1x8x2x32x2xf32, #tpu.memory_space<vmem>>, vector<1x8x1x32x2xf32>
    %18 = vector.shape_cast %17 : vector<1x8x1x32x2xf32> to vector<8x32x2xf32>
    %19 = vector.shape_cast %16 : vector<8x32x2xf32> to vector<1x8x1x32x2xf32>
    tpu.vector_store %arg5[%c0_8, %c0_9, %c0_10, %c0_11, %c0_12], %19 {strides = array<i32>} : memref<1x8x2x32x2xf32, #tpu.memory_space<vmem>>, vector<1x8x1x32x2xf32>,
    %20 = vector.extract_strided_slice %14 {offsets = [0, 2], sizes = [256, 2], strides = [1, 1]} : vector<256x4xf32> to vector<256x2xf32>
    %21 = vector.shape_cast %20 : vector<256x2xf32> to vector<8x32x2xf32>
    %c0_13 = arith.constant 0 : index
    %c0_14 = arith.constant 0 : index
    %c1 = arith.constant 1 : index
    %c0_15 = arith.constant 0 : index
    %c0_16 = arith.constant 0 : index
    %22 = vector.load %arg5[%c0_13, %c0_14, %c1, %c0_15, %c0_16] : memref<1x8x2x32x2xf32, #tpu.memory_space<vmem>>, vector<1x8x1x32x2xf32>
    %23 = vector.shape_cast %22 : vector<1x8x1x32x2xf32> to vector<8x32x2xf32>
    %24 = vector.shape_cast %21 : vector<8x32x2xf32> to vector<1x8x1x32x2xf32>
    tpu.vector_store %arg5[%c0_13, %c0_14, %c1, %c0_15, %c0_16], %24 {strides = array<i32>} : memref<1x8x2x32x2xf32, #tpu.memory_space<vmem>>, vector<1x8x1x32x2xf32>,
    return
  }
  func.func @transform_0(%arg0: i32, %arg1: i32) -> (i32, i32, i32, i32) {
    %c0_i32 = arith.constant 0 : i32
    %c0_i32_0 = arith.constant 0 : i32
    %c0_i32_1 = arith.constant 0 : i32
    return %arg0, %arg1, %c0_i32, %c0_i32_0 : i32, i32, i32, i32
  }
  func.func @transform_1(%arg0: i32, %arg1: i32) -> (i32, i32) {
    %c0_i32 = arith.constant 0 : i32
    %c0_i32_0 = arith.constant 0 : i32
    %c0_i32_1 = arith.constant 0 : i32
    return %c0_i32, %c0_i32_0 : i32, i32
  }
  func.func @transform_2(%arg0: i32, %arg1: i32) -> (i32, i32) {
    %c0_i32 = arith.constant 0 : i32
    %c0_i32_0 = arith.constant 0 : i32
    %c0_i32_1 = arith.constant 0 : i32
    return %c0_i32, %c0_i32_0 : i32, i32
  }
  func.func @transform_3(%arg0: i32, %arg1: i32) -> (i32, i32, i32, i32, i32) {
    %c0_i32 = arith.constant 0 : i32
    %c0_i32_0 = arith.constant 0 : i32
    %c0_i32_1 = arith.constant 0 : i32
    %c0_i32_2 = arith.constant 0 : i32
    return %arg0, %arg1, %c0_i32, %c0_i32_0, %c0_i32_1 : i32, i32, i32, i32, i32
  }
}

</mosaic_0001>

<bundles_post_ra>
// kernel: a_call__.3
= control target key start
LH: loop header
LB: loop body
LE: loop exit
PB: predicated region body
PF: predicated region fallthrough
CT: control target
= control target key end

     0   :  { %8 = vsyncpa [#allocation3], 0  ;;  %s1521_s0 = inlined_call_operand.vmem [shape: bf16[2,16,16,32], index: 0, kind: input, shape index: {}]   ;;  %s1522_s1 = inlined_call_operand.hbm [shape: bf16[32,64], index: 1, kind: input, shape index: {}]   ;;  %s1523_s2 = inlined_call_operand.hbm [shape: f32[1,64], index: 2, kind: input, shape index: {}]   ;;  %s1524_s3 = inlined_call_operand.vmem [shape: bf16[2,16,2,16,32], index: 3, kind: output, shape index: {}]  }
   0x1   :  { %9 = vsyncpa [#allocation5], 0  ;;  %s1221_s12 = smov 0   ;;  %s1223_s13 = smov 0  }
   0x2   :  { %s1225_s14 = smov 0  }
   0x3 LB: > { %s894_s15 = sadd.s32 4294967295, %s1194_s14   ;;  %s27_s16 = sadd.s32 1, %s1190_s13  ;;  %s1194_s14 = sphi %s1225_s14, %s15_s14   ;;  %s1190_s13 = sphi %s1223_s13, %s1528_s13   ;;  %s1186_s12 = sphi %s1221_s12, %s1527_s12  }
   0x4   : > { %p29_p0 = scmp.ge.s32.totalorder %s27_s16, 2  ;;  %p896_p1 = scmp.ge.s32.totalorder %s1194_s14, 1 }
   0x5   : > { %p130_p2 = scmp.lt.s32.totalorder %s1194_s14, 3  ;;  %p1246_p4 = scmp.eq.s32.totalorder %s894_s15, 0 }
   0x6   : > { %s1530_s16 = smov (%p29_p0, %s27_s16), 0  ;;  %s141_s21 = sshll.u32 %s1522_s1, 4  ;;  %s142_s21 = int_to_ptr.hbm [resolvable:$true] %s141_s21 }
   0x7   : > { %p1242_p3 = pnand %p896_p1, %p130_p2  ;;  %s1196_s22 = smov [#allocation2]  }
   0x8   : > { %s143_s23 = sshll.u32 %s1196_s22, 4  ;;  %s156_s26 = sshll.u32 %s1523_s2, 4  ;;  %s144_s23 = int_to_ptr.vmem [resolvable:$true] %s143_s23  ;;  %s157_s26 = int_to_ptr.hbm [resolvable:$true] %s156_s26 }
   0x9   : > { %p1063_p5 = pneg %p1242_p3  ;;  %s1197_s27 = smov 64  }
   0xa   : > { %s1198_s28 = smov 4   ;;  %s1199_s29 = smov [#allocation4]  }
   0xb   : > { %p1064_p6 = pnand %p1246_p4, %p1063_p5  ;;  %s158_s30 = sshll.u32 %s1199_s29, 4  ;;  %s159_s30 = int_to_ptr.vmem [resolvable:$true] %s158_s30 }
   0xc   : > { %185 = sbr.rel (%p1242_p3) target bundleno = 363 (0x16b), region = 32 }
   0xd   : > { %1066 = dma.hbm_to_vmem [thread:$0]  (!%p1064_p6), %s142_s21, 256, %s144_s23, [#allocation3], %s1197_s27, %s1197_s27, %s1198_s28  }
   0xe   : > { %1069 = dma.hbm_to_vmem [thread:$0]  (!%p1064_p6), %s157_s26, 16, %s159_s30, [#allocation5]  }
  0x11   : > { %1177 = dma.done.wait (%p1246_p4), [#allocation3], 256  }
  0x12   : > { %1179 = vsyncadd (%p1246_p4), [#allocation3], 4294967040 }
  0x13   : > { %1181 = dma.done.wait (%p1246_p4), [#allocation5], 16  }
  0x14   : > { %1183 = vsyncadd (%p1246_p4), [#allocation5], 4294967280  ;;  %p226_p7 = scmp.lt.s32.totalorder %s1186_s12, 1  ;;  %v1048_v0 = vld [vmem:[#allocation2 + $0x8] sm:$0xff]  ;;  %v1047_v1 = vld [vmem:[#allocation2] sm:$0xff]  ;;  %vm380_vm0 = vcmask 261120  }
  0x15   : > { %435 = vmatpush.bf16.msra.mxu0 %v1048_v0  ;;  %1050 = vmatpush.bf16.msra.mxu2 %v1048_v0  ;;  %v1312_v18 = vld [vmem:[#allocation4] ss:$0 sm:$0xff]  ;;  %vm582_vm1 = vcmask 257024  }
  0x16   : > { %s1532_s12 = smov (!%p226_p7, %s1186_s12), 1  ;;  %1051 = vmatpush.bf16.msra.mxu3 %v1048_v0  ;;  %1049 = vmatpush.bf16.msra.mxu1 %v1048_v0 }
  0x17   : > { %s1029_s4 = sshll.u32 %s1532_s12, 7  ;;  %s1030_s8 = sshll.u32 %s1532_s12, 8 }
  0x18   : > { %s1278_s7 = scalar_lea.vmem %s1521_s0, %s1029_s4  ;;  %s1320_s11 = scalar_lea.vmem %s1524_s3, %s1030_s8 }
  0x19   : > { %v1031_v2 = vld [vmem:[%s1278_s7] sm:$0xff]  ;;  %436 = vmatpush.bf16.msra.mxu0 %v1047_v1  ;;  %1053 = vmatpush.bf16.msra.mxu2 %v1047_v1  ;;  %v1032_v6 = vld [vmem:[%s1278_s7 + $0x8] sm:$0xff]  ;;  %v1033_v10 = vld [vmem:[%s1278_s7 + $0x10] sm:$0xff]  ;;  %s1200_s12 = smov 96  }
  0x1a   : > { %v1039_v3 = vld [vmem:[%s1278_s7 + $0x40] sm:$0xff]  ;;  %1054 = vmatpush.bf16.msra.mxu3 %v1047_v1  ;;  %1052 = vmatpush.bf16.msra.mxu1 %v1047_v1  ;;  %v1040_v7 = vld [vmem:[%s1278_s7 + $0x48] sm:$0xff]  ;;  %v1041_v11 = vld [vmem:[%s1278_s7 + $0x50] sm:$0xff] }
  0x1b   : > { %v1043_v4 = vld [vmem:[%s1278_s7 + $0x60] sm:$0xff]  ;;  %v1044_v8 = vld [vmem:[%s1278_s7 + $0x68] sm:$0xff]  ;;  %v1045_v12 = vld [vmem:[%s1278_s7 + $0x70] sm:$0xff] }
  0x1c   : > { %v1035_v5 = vld [vmem:[%s1278_s7 + $0x20] sm:$0xff]  ;;  %979 = vmatmul.msk.bf16.vlgmr.msra.gmra.mxu0 %vm380_vm0, %v1031_v2  ;;  %987 = vmatmul.msk.bf16.vlgmr.msra.gmra.mxu2 %vm380_vm0, %v1039_v3  ;;  %v1036_v9 = vld [vmem:[%s1278_s7 + $0x28] sm:$0xff]  ;;  %v1037_v13 = vld [vmem:[%s1278_s7 + $0x30] sm:$0xff] }
  0x1d   : > { %991 = vmatmul.msk.bf16.vlgmr.msra.gmra.mxu3 %vm380_vm0, %v1043_v4  ;;  %983 = vmatmul.msk.bf16.vlgmr.msra.gmra.mxu1 %vm380_vm0, %v1035_v5  ;;  %v1042_v14 = vld [vmem:[%s1278_s7 + $0x58] sm:$0xff] }
  0x1e   : > { %v1034_v15 = vld [vmem:[%s1278_s7 + $0x18] sm:$0xff] }
  0x1f   : > { %v1038_v16 = vld [vmem:[%s1278_s7 + $0x38] sm:$0xff] }
  0x20   : > { %v1046_v17 = vld [vmem:[%s1278_s7 + $0x78] sm:$0xff] }
  0x2c   : > { %980 = vmatmul.msk.bf16.gmra.mxu0 %vm380_vm0, %v1032_v6  ;;  %988 = vmatmul.msk.bf16.gmra.mxu2 %vm380_vm0, %v1040_v7 }
  0x2d   : > { %992 = vmatmul.msk.bf16.gmra.mxu3 %vm380_vm0, %v1044_v8  ;;  %984 = vmatmul.msk.bf16.gmra.mxu1 %vm380_vm0, %v1036_v9 }
  0x3c   : > { %981 = vmatmul.msk.bf16.gmra.mxu0 %vm380_vm0, %v1033_v10  ;;  %989 = vmatmul.msk.bf16.gmra.mxu2 %vm380_vm0, %v1041_v11 }
  0x3d   : > { %993 = vmatmul.msk.bf16.gmra.mxu3 %vm380_vm0, %v1045_v12  ;;  %985 = vmatmul.msk.bf16.gmra.mxu1 %vm380_vm0, %v1037_v13 }
  0x4c   : > { %990 = vmatmul.msk.bf16.gmra.mxu2 %vm380_vm0, %v1042_v14  ;;  %982 = vmatmul.msk.bf16.gmra.mxu0 %vm380_vm0, %v1034_v15 }
  0x4d   : > { %986 = vmatmul.msk.bf16.gmra.mxu1 %vm380_vm0, %v1038_v16  ;;  %994 = vmatmul.msk.bf16.gmra.mxu3 %vm380_vm0, %v1046_v17 }
  0x99   : > { %v438_v19 = vpop.f32.mrf.mxu0 }
  0x9a   : > { %v439_v20 = vadd.f32 %v1312_v18, %v438_v19  ;;  %v458_v21 = vpop.f32.mrf.mxu1 }
  0x9b   : > { %v459_v22 = vadd.f32 %v1312_v18, %v458_v21 }
  0x9c   : > { %v518_v23 = vmax.f32 %v439_v20, 0.0 }
  0x9d   : > { %v526_v24 = vmax.f32 %v459_v22, 0.0 }
  0x9e   : > { %v550_v25 = vpack.c.bf16 %v518_v23, %v518_v23 }
  0x9f   : > { %v478_v26 = vpop.f32.mrf.mxu2  ;;  %v558_v27 = vpack.c.bf16 %v526_v24, %v526_v24 }
  0xa0   : > { %v479_v28 = vadd.f32 %v1312_v18, %v478_v26  ;;  %v498_v29 = vpop.f32.mrf.mxu3  ;;  %647 = vrot.lane.b32.xlu0 %v550_v25, %s1200_s12  ;;  %583 = vst.msk [vmem:[%s1320_s11] sm:$0xf] %vm582_vm1, %v550_v25 }
  0xa1   : > { %v499_v30 = vadd.f32 %v1312_v18, %v498_v29  ;;  %v440_v31 = vpop.f32.mrf.mxu0  ;;  %663 = vrot.lane.b32.xlu2 %v558_v27, %s1200_s12  ;;  %591 = vst.msk [vmem:[%s1320_s11 + $0x40] sm:$0xf] %vm582_vm1, %v558_v27 }
  0xa2   : > { %v534_v32 = vmax.f32 %v479_v28, 0.0  ;;  %v441_v33 = vadd.f32 %v1312_v18, %v440_v31  ;;  %v460_v34 = vpop.f32.mrf.mxu1 }
  0xa3   : > { %v542_v35 = vmax.f32 %v499_v30, 0.0  ;;  %v461_v36 = vadd.f32 %v1312_v18, %v460_v34 }
  0xa4   : > { %v519_v37 = vmax.f32 %v441_v33, 0.0  ;;  %v566_v38 = vpack.c.bf16 %v534_v32, %v534_v32 }
  0xa5   : > { %v574_v39 = vpack.c.bf16 %v542_v35, %v542_v35  ;;  %v527_v40 = vmax.f32 %v461_v36, 0.0 }
  0xa6   : > { %v551_v41 = vpack.c.bf16 %v519_v37, %v519_v37  ;;  %679 = vrot.lane.b32.xlu1 %v566_v38, %s1200_s12  ;;  %599 = vst.msk [vmem:[%s1320_s11 + $0x80] sm:$0xf] %vm582_vm1, %v566_v38 }
  0xa7   : > { %607 = vst.msk [vmem:[%s1320_s11 + $0xc0] sm:$0xf] %vm582_vm1, %v574_v39  ;;  %v559_v42 = vpack.c.bf16 %v527_v40, %v527_v40  ;;  %v480_v43 = vpop.f32.mrf.mxu2 }
  0xa8   : > { %584 = vst.msk [vmem:[%s1320_s11 + $0x4] sm:$0xf] %vm582_vm1, %v551_v41  ;;  %v481_v44 = vadd.f32 %v1312_v18, %v480_v43  ;;  %v500_v45 = vpop.f32.mrf.mxu3  ;;  %695 = vrot.lane.b32.xlu0 %v574_v39, %s1200_s12 }
  0xa9   : > { %592 = vst.msk [vmem:[%s1320_s11 + $0x44] sm:$0xf] %vm582_vm1, %v559_v42  ;;  %v501_v46 = vadd.f32 %v1312_v18, %v500_v45  ;;  %v443_v47 = vpop.f32.mrf.mxu0 }
  0xaa   : > { %v535_v48 = vmax.f32 %v481_v44, 0.0  ;;  %v444_v49 = vadd.f32 %v1312_v18, %v443_v47  ;;  %v463_v50 = vpop.f32.mrf.mxu1 }
  0xab   : > { %v543_v51 = vmax.f32 %v501_v46, 0.0  ;;  %v464_v52 = vadd.f32 %v1312_v18, %v463_v50 }
  0xac   : > { %v567_v53 = vpack.c.bf16 %v535_v48, %v535_v48  ;;  %v520_v54 = vmax.f32 %v444_v49, 0.0 }
  0xad   : > { %v575_v55 = vpack.c.bf16 %v543_v51, %v543_v51  ;;  %v528_v56 = vmax.f32 %v464_v52, 0.0 }
  0xae   : > { %600 = vst.msk [vmem:[%s1320_s11 + $0x84] sm:$0xf] %vm582_vm1, %v567_v53  ;;  %v552_v57 = vpack.c.bf16 %v520_v54, %v520_v54  ;;  %681 = vrot.lane.b32.xlu2 %v567_v53, %s1200_s12 }
  0xaf   : > { %608 = vst.msk [vmem:[%s1320_s11 + $0xc4] sm:$0xf] %vm582_vm1, %v575_v55  ;;  %697 = vrot.lane.b32.xlu1 %v575_v55, %s1200_s12  ;;  %v560_v58 = vpack.c.bf16 %v528_v56, %v528_v56  ;;  %v483_v59 = vpop.f32.mrf.mxu2 }
  0xb0   : > { %585 = vst.msk [vmem:[%s1320_s11 + $0x10] sm:$0xf] %vm582_vm1, %v552_v57  ;;  %v503_v60 = vpop.f32.mrf.mxu3  ;;  %649 = vrot.lane.b32.xlu0 %v551_v41, %s1200_s12  ;;  %v484_v61 = vadd.f32 %v1312_v18, %v483_v59 }
  0xb1   : > { %593 = vst.msk [vmem:[%s1320_s11 + $0x50] sm:$0xf] %vm582_vm1, %v560_v58  ;;  %v504_v62 = vadd.f32 %v1312_v18, %v503_v60  ;;  %v445_v63 = vpop.f32.mrf.mxu0 }
  0xb2   : > { %v446_v0 = vadd.f32 %v1312_v18, %v445_v63  ;;  %v465_v1 = vpop.f32.mrf.mxu1  ;;  %v536_v2 = vmax.f32 %v484_v61, 0.0 }
  0xb3   : > { %v544_v3 = vmax.f32 %v504_v62, 0.0  ;;  %v466_v4 = vadd.f32 %v1312_v18, %v465_v1 }
  0xb4   : > { %v521_v5 = vmax.f32 %v446_v0, 0.0  ;;  %v568_v6 = vpack.c.bf16 %v536_v2, %v536_v2 }
  0xb5   : > { %v576_v7 = vpack.c.bf16 %v544_v3, %v544_v3  ;;  %v529_v8 = vmax.f32 %v466_v4, 0.0 }
  0xb6   : > { %v553_v9 = vpack.c.bf16 %v521_v5, %v521_v5  ;;  %601 = vst.msk [vmem:[%s1320_s11 + $0x90] sm:$0xf] %vm582_vm1, %v568_v6 }
  0xb7   : > { %609 = vst.msk [vmem:[%s1320_s11 + $0xd0] sm:$0xf] %vm582_vm1, %v576_v7  ;;  %699 = vrot.lane.b32.xlu2 %v576_v7, %s1200_s12  ;;  %651 = vrot.lane.b32.xlu1 %v552_v57, %s1200_s12  ;;  %v561_v10 = vpack.c.bf16 %v529_v8, %v529_v8  ;;  %v485_v11 = vpop.f32.mrf.mxu2 }
  0xb8   : > { %586 = vst.msk [vmem:[%s1320_s11 + $0x14] sm:$0xf] %vm582_vm1, %v553_v9  ;;  %665 = vrot.lane.b32.xlu0 %v559_v42, %s1200_s12  ;;  %v486_v12 = vadd.f32 %v1312_v18, %v485_v11  ;;  %v505_v13 = vpop.f32.mrf.mxu3 }
  0xb9   : > { %594 = vst.msk [vmem:[%s1320_s11 + $0x54] sm:$0xf] %vm582_vm1, %v561_v10  ;;  %v448_v14 = vpop.f32.mrf.mxu0  ;;  %v506_v15 = vadd.f32 %v1312_v18, %v505_v13 }
  0xba   : > { %v449_v16 = vadd.f32 %v1312_v18, %v448_v14  ;;  %v537_v17 = vmax.f32 %v486_v12, 0.0  ;;  %v468_v19 = vpop.f32.mrf.mxu1 }
  0xbb   : > { %v545_v20 = vmax.f32 %v506_v15, 0.0  ;;  %v469_v21 = vadd.f32 %v1312_v18, %v468_v19 }
  0xbc   : > { %v522_v22 = vmax.f32 %v449_v16, 0.0  ;;  %v569_v23 = vpack.c.bf16 %v537_v17, %v537_v17 }
  0xbd   : > { %v577_v24 = vpack.c.bf16 %v545_v20, %v545_v20  ;;  %v530_v25 = vmax.f32 %v469_v21, 0.0 }
  0xbe   : > { %v554_v26 = vpack.c.bf16 %v522_v22, %v522_v22  ;;  %602 = vst.msk [vmem:[%s1320_s11 + $0x94] sm:$0xf] %vm582_vm1, %v569_v23 }
  0xbf   : > { %669 = vrot.lane.b32.xlu2 %v561_v10, %s1200_s12  ;;  %667 = vrot.lane.b32.xlu1 %v560_v58, %s1200_s12  ;;  %610 = vst.msk [vmem:[%s1320_s11 + $0xd4] sm:$0xf] %vm582_vm1, %v577_v24  ;;  %v562_v27 = vpack.c.bf16 %v530_v25, %v530_v25  ;;  %v488_v28 = vpop.f32.mrf.mxu2 }
  0xc0   : > { %587 = vst.msk [vmem:[%s1320_s11 + $0x20] sm:$0xf] %vm582_vm1, %v554_v26  ;;  %683 = vrot.lane.b32.xlu0 %v568_v6, %s1200_s12  ;;  %v489_v29 = vadd.f32 %v1312_v18, %v488_v28  ;;  %v508_v30 = vpop.f32.mrf.mxu3 }
  0xc1   : > { %595 = vst.msk [vmem:[%s1320_s11 + $0x60] sm:$0xf] %vm582_vm1, %v562_v27  ;;  %v509_v31 = vadd.f32 %v1312_v18, %v508_v30  ;;  %v450_v32 = vpop.f32.mrf.mxu0 }
  0xc2   : > { %v538_v33 = vmax.f32 %v489_v29, 0.0  ;;  %v451_v34 = vadd.f32 %v1312_v18, %v450_v32  ;;  %v470_v35 = vpop.f32.mrf.mxu1 }
  0xc3   : > { %v546_v36 = vmax.f32 %v509_v31, 0.0  ;;  %v471_v37 = vadd.f32 %v1312_v18, %v470_v35 }
  0xc4   : > { %v570_v38 = vpack.c.bf16 %v538_v33, %v538_v33  ;;  %v523_v39 = vmax.f32 %v451_v34, 0.0 }
  0xc5   : > { %v578_v40 = vpack.c.bf16 %v546_v36, %v546_v36  ;;  %v531_v41 = vmax.f32 %v471_v37, 0.0 }
  0xc6   : > { %603 = vst.msk [vmem:[%s1320_s11 + $0xa0] sm:$0xf] %vm582_vm1, %v570_v38  ;;  %v555_v42 = vpack.c.bf16 %v523_v39, %v523_v39 }
  0xc7   : > { %655 = vrot.lane.b32.xlu2 %v554_v26, %s1200_s12  ;;  %653 = vrot.lane.b32.xlu1 %v553_v9, %s1200_s12  ;;  %611 = vst.msk [vmem:[%s1320_s11 + $0xe0] sm:$0xf] %vm582_vm1, %v578_v40  ;;  %v563_v43 = vpack.c.bf16 %v531_v41, %v531_v41  ;;  %v490_v44 = vpop.f32.mrf.mxu2 }
  0xc8   : > { %701 = vrot.lane.b32.xlu0 %v577_v24, %s1200_s12  ;;  %588 = vst.msk [vmem:[%s1320_s11 + $0x24] sm:$0xf] %vm582_vm1, %v555_v42  ;;  %v491_v45 = vadd.f32 %v1312_v18, %v490_v44  ;;  %v510_v46 = vpop.f32.mrf.mxu3 }
  0xc9   : > { %596 = vst.msk [vmem:[%s1320_s11 + $0x64] sm:$0xf] %vm582_vm1, %v563_v43  ;;  %v511_v47 = vadd.f32 %v1312_v18, %v510_v46  ;;  %v453_v48 = vpop.f32.mrf.mxu0 }
  0xca   : > { %v539_v49 = vmax.f32 %v491_v45, 0.0  ;;  %v454_v50 = vadd.f32 %v1312_v18, %v453_v48  ;;  %v473_v51 = vpop.f32.mrf.mxu1 }
  0xcb   : > { %v547_v52 = vmax.f32 %v511_v47, 0.0  ;;  %v474_v53 = vadd.f32 %v1312_v18, %v473_v51 }
  0xcc   : > { %v571_v54 = vpack.c.bf16 %v539_v49, %v539_v49  ;;  %v524_v55 = vmax.f32 %v454_v50, 0.0 }
  0xcd   : > { %v579_v56 = vpack.c.bf16 %v547_v52, %v547_v52  ;;  %v532_v57 = vmax.f32 %v474_v53, 0.0 }
  0xce   : > { %604 = vst.msk [vmem:[%s1320_s11 + $0xa4] sm:$0xf] %vm582_vm1, %v571_v54  ;;  %v556_v58 = vpack.c.bf16 %v524_v55, %v524_v55 }
  0xcf   : > { %687 = vrot.lane.b32.xlu2 %v570_v38, %s1200_s12  ;;  %685 = vrot.lane.b32.xlu1 %v569_v23, %s1200_s12  ;;  %612 = vst.msk [vmem:[%s1320_s11 + $0xe4] sm:$0xf] %vm582_vm1, %v579_v56  ;;  %v564_v59 = vpack.c.bf16 %v532_v57, %v532_v57  ;;  %v493_v60 = vpop.f32.mrf.mxu2 }
  0xd0   : > { %671 = vrot.lane.b32.xlu0 %v562_v27, %s1200_s12  ;;  %589 = vst.msk [vmem:[%s1320_s11 + $0x30] sm:$0xf] %vm582_vm1, %v556_v58  ;;  %v494_v61 = vadd.f32 %v1312_v18, %v493_v60  ;;  %v513_v62 = vpop.f32.mrf.mxu3 }
  0xd1   : > { %597 = vst.msk [vmem:[%s1320_s11 + $0x70] sm:$0xf] %vm582_vm1, %v564_v59  ;;  %v455_v63 = vpop.f32.mrf.mxu0  ;;  %v514_v0 = vadd.f32 %v1312_v18, %v513_v62 }
  0xd2   : > { %v540_v1 = vmax.f32 %v494_v61, 0.0  ;;  %v456_v2 = vadd.f32 %v1312_v18, %v455_v63  ;;  %v475_v3 = vpop.f32.mrf.mxu1 }
  0xd3   : > { %v476_v4 = vadd.f32 %v1312_v18, %v475_v3  ;;  %v548_v5 = vmax.f32 %v514_v0, 0.0 }
  0xd4   : > { %v572_v6 = vpack.c.bf16 %v540_v1, %v540_v1  ;;  %v525_v7 = vmax.f32 %v456_v2, 0.0 }
  0xd5   : > { %v533_v8 = vmax.f32 %v476_v4, 0.0  ;;  %v580_v9 = vpack.c.bf16 %v548_v5, %v548_v5 }
  0xd6   : > { %605 = vst.msk [vmem:[%s1320_s11 + $0xb0] sm:$0xf] %vm582_vm1, %v572_v6  ;;  %v557_v10 = vpack.c.bf16 %v525_v7, %v525_v7 }
  0xd7   : > { %657 = vrot.lane.b32.xlu2 %v555_v42, %s1200_s12  ;;  %703 = vrot.lane.b32.xlu1 %v578_v40, %s1200_s12  ;;  %v565_v11 = vpack.c.bf16 %v533_v8, %v533_v8  ;;  %v495_v12 = vpop.f32.mrf.mxu2  ;;  %613 = vst.msk [vmem:[%s1320_s11 + $0xf0] sm:$0xf] %vm582_vm1, %v580_v9 }
  0xd8   : > { %689 = vrot.lane.b32.xlu0 %v571_v54, %s1200_s12  ;;  %590 = vst.msk [vmem:[%s1320_s11 + $0x34] sm:$0xf] %vm582_vm1, %v557_v10  ;;  %v496_v13 = vadd.f32 %v1312_v18, %v495_v12  ;;  %v515_v14 = vpop.f32.mrf.mxu3 }
  0xd9   : > { %598 = vst.msk [vmem:[%s1320_s11 + $0x74] sm:$0xf] %vm582_vm1, %v565_v11  ;;  %v516_v15 = vadd.f32 %v1312_v18, %v515_v14 }
  0xda   : > { %v541_v16 = vmax.f32 %v496_v13, 0.0 }
  0xdb   : > { %v549_v17 = vmax.f32 %v516_v15, 0.0 }
  0xdc   : > { %v573_v19 = vpack.c.bf16 %v541_v16, %v541_v16 }
  0xdd   : > { %v581_v20 = vpack.c.bf16 %v549_v17, %v549_v17 }
  0xde   : > { %606 = vst.msk [vmem:[%s1320_s11 + $0xb4] sm:$0xf] %vm582_vm1, %v573_v19 }
  0xdf   : > { %675 = vrot.lane.b32.xlu2 %v564_v59, %s1200_s12  ;;  %673 = vrot.lane.b32.xlu1 %v563_v43, %s1200_s12  ;;  %614 = vst.msk [vmem:[%s1320_s11 + $0xf4] sm:$0xf] %vm582_vm1, %v581_v20 }
  0xe0   : > { %659 = vrot.lane.b32.xlu0 %v556_v58, %s1200_s12 }
  0xe7   : > { %693 = vrot.lane.b32.xlu2 %v573_v19, %s1200_s12  ;;  %691 = vrot.lane.b32.xlu1 %v572_v6, %s1200_s12 }
  0xe8   : > { %677 = vrot.lane.b32.xlu0 %v565_v11, %s1200_s12 }
  0xef   : > { %705 = vrot.lane.b32.xlu2 %v579_v56, %s1200_s12  ;;  %661 = vrot.lane.b32.xlu1 %v557_v10, %s1200_s12 }
  0xf0   : > { %707 = vrot.lane.b32.xlu0 %v580_v9, %s1200_s12 }
  0xf7   : > { %709 = vrot.lane.b32.xlu1 %v581_v20, %s1200_s12 }
  0xfb   : > { %v664_v18 = vpop.permute.xlu2 %663 }
  0xfc   : > { %1003 = vst.msk [vmem:[%s1320_s11 + $0x48] sm:$0xf] %vm582_vm1, %v664_v18 }
 0x108   : > { %v682_v21 = vpop.permute.xlu2 %681 }
 0x109   : > { %1012 = vst.msk [vmem:[%s1320_s11 + $0x8c] sm:$0xf] %vm582_vm1, %v682_v21 }
 0x111   : > { %v700_v22 = vpop.permute.xlu2 %699 }
 0x112   : > { %1021 = vst.msk [vmem:[%s1320_s11 + $0xd8] sm:$0xf] %vm582_vm1, %v700_v22  ;;  %v648_v23 = vpop.permute.xlu0 %647 }
 0x113   : > { %995 = vst.msk [vmem:[%s1320_s11 + $0x8] sm:$0xf] %vm582_vm1, %v648_v23 }
 0x118   : > { %v680_v24 = vpop.permute.xlu1 %679 }
 0x119   : > { %1011 = vst.msk [vmem:[%s1320_s11 + $0x88] sm:$0xf] %vm582_vm1, %v680_v24  ;;  %v670_v25 = vpop.permute.xlu2 %669 }
 0x11a   : > { %1006 = vst.msk [vmem:[%s1320_s11 + $0x5c] sm:$0xf] %vm582_vm1, %v670_v25  ;;  %v696_v26 = vpop.permute.xlu0 %695 }
 0x11b   : > { %1019 = vst.msk [vmem:[%s1320_s11 + $0xc8] sm:$0xf] %vm582_vm1, %v696_v26 }
 0x121   : > { %v698_v27 = vpop.permute.xlu1 %697  ;;  %v656_v28 = vpop.permute.xlu2 %655 }
 0x122   : > { %1020 = vst.msk [vmem:[%s1320_s11 + $0xcc] sm:$0xf] %vm582_vm1, %v698_v27  ;;  %v650_v29 = vpop.permute.xlu0 %649 }
 0x123   : > { %999 = vst.msk [vmem:[%s1320_s11 + $0x28] sm:$0xf] %vm582_vm1, %v656_v28 }
 0x124   : > { %996 = vst.msk [vmem:[%s1320_s11 + $0xc] sm:$0xf] %vm582_vm1, %v650_v29 }
 0x129   : > { %v688_v30 = vpop.permute.xlu2 %687  ;;  %v652_v31 = vpop.permute.xlu1 %651 }
 0x12a   : > { %1015 = vst.msk [vmem:[%s1320_s11 + $0xa8] sm:$0xf] %vm582_vm1, %v688_v30  ;;  %v666_v32 = vpop.permute.xlu0 %665 }
 0x12b   : > { %997 = vst.msk [vmem:[%s1320_s11 + $0x18] sm:$0xf] %vm582_vm1, %v652_v31 }
 0x12c   : > { %1004 = vst.msk [vmem:[%s1320_s11 + $0x4c] sm:$0xf] %vm582_vm1, %v666_v32 }
 0x131   : > { %v658_v33 = vpop.permute.xlu2 %657  ;;  %v668_v34 = vpop.permute.xlu1 %667 }
 0x132   : > { %1000 = vst.msk [vmem:[%s1320_s11 + $0x2c] sm:$0xf] %vm582_vm1, %v658_v33  ;;  %v684_v35 = vpop.permute.xlu0 %683 }
 0x133   : > { %1005 = vst.msk [vmem:[%s1320_s11 + $0x58] sm:$0xf] %vm582_vm1, %v668_v34 }
 0x134   : > { %1013 = vst.msk [vmem:[%s1320_s11 + $0x98] sm:$0xf] %vm582_vm1, %v684_v35 }
 0x139   : > { %v676_v36 = vpop.permute.xlu2 %675  ;;  %v654_v37 = vpop.permute.xlu1 %653 }
 0x13a   : > { %1009 = vst.msk [vmem:[%s1320_s11 + $0x78] sm:$0xf] %vm582_vm1, %v676_v36  ;;  %v702_v38 = vpop.permute.xlu0 %701 }
 0x13b   : > { %998 = vst.msk [vmem:[%s1320_s11 + $0x1c] sm:$0xf] %vm582_vm1, %v654_v37 }
 0x13c   : > { %1022 = vst.msk [vmem:[%s1320_s11 + $0xdc] sm:$0xf] %vm582_vm1, %v702_v38 }
 0x141   : > { %v694_v39 = vpop.permute.xlu2 %693  ;;  %v686_v40 = vpop.permute.xlu1 %685 }
 0x142   : > { %1018 = vst.msk [vmem:[%s1320_s11 + $0xbc] sm:$0xf] %vm582_vm1, %v694_v39  ;;  %v672_v41 = vpop.permute.xlu0 %671 }
 0x143   : > { %1014 = vst.msk [vmem:[%s1320_s11 + $0x9c] sm:$0xf] %vm582_vm1, %v686_v40 }
 0x144   : > { %1007 = vst.msk [vmem:[%s1320_s11 + $0x68] sm:$0xf] %vm582_vm1, %v672_v41 }
 0x149   : > { %v706_v42 = vpop.permute.xlu2 %705  ;;  %v704_v43 = vpop.permute.xlu1 %703 }
 0x14a   : > { %1024 = vst.msk [vmem:[%s1320_s11 + $0xec] sm:$0xf] %vm582_vm1, %v706_v42  ;;  %v690_v44 = vpop.permute.xlu0 %689 }
 0x14b   : > { %1023 = vst.msk [vmem:[%s1320_s11 + $0xe8] sm:$0xf] %vm582_vm1, %v704_v43 }
 0x14c   : > { %1016 = vst.msk [vmem:[%s1320_s11 + $0xac] sm:$0xf] %vm582_vm1, %v690_v44 }
 0x151   : > { %v674_v45 = vpop.permute.xlu1 %673 }
 0x152   : > { %1008 = vst.msk [vmem:[%s1320_s11 + $0x6c] sm:$0xf] %vm582_vm1, %v674_v45  ;;  %v660_v46 = vpop.permute.xlu0 %659 }
 0x153   : > { %1001 = vst.msk [vmem:[%s1320_s11 + $0x38] sm:$0xf] %vm582_vm1, %v660_v46 }
 0x159   : > { %v692_v47 = vpop.permute.xlu1 %691 }
 0x15a   : > { %1017 = vst.msk [vmem:[%s1320_s11 + $0xb8] sm:$0xf] %vm582_vm1, %v692_v47  ;;  %v678_v48 = vpop.permute.xlu0 %677 }
 0x15b   : > { %1010 = vst.msk [vmem:[%s1320_s11 + $0x7c] sm:$0xf] %vm582_vm1, %v678_v48 }
 0x161   : > { %v662_v49 = vpop.permute.xlu1 %661 }
 0x162   : > { %1002 = vst.msk [vmem:[%s1320_s11 + $0x3c] sm:$0xf] %vm582_vm1, %v662_v49  ;;  %v708_v50 = vpop.permute.xlu0 %707 }
 0x163   : > { %1025 = vst.msk [vmem:[%s1320_s11 + $0xf8] sm:$0xf] %vm582_vm1, %v708_v50 }
 0x169   : > { %v710_v51 = vpop.permute.xlu1 %709 }
 0x16a   : > { %1026 = vst.msk [vmem:[%s1320_s11 + $0xfc] sm:$0xf] %vm582_vm1, %v710_v51 }
 0x16b PF: > { %s15_s14 = sadd.s32 1, %s1194_s14   ;;  %s1527_s12 = smov %s1190_s13 }
 0x16c   : > { %p12_p8 = scmp.ge.s32.totalorder %s15_s14, 4   ;;  %s1528_s13 = smov %s1530_s16 }
 0x16e   :  { %14 = sbr.rel (!%p12_p8) target bundleno = 3 (0x3), region = 72 }
 0x173   :  { %808 = vsyncpa [#allocation3], 1 }
 0x174   :  { %810 = vsyncpa [#allocation3 + $0x1], 1 }
 0x175   :  { %811 = vsyncpa [#allocation5], 1 }

// kernel: a_call__.5
= control target key start
LH: loop header
LB: loop body
LE: loop exit
PB: predicated region body
PF: predicated region fallthrough
CT: control target
= control target key end

     0   :  { %8 = vsyncpa [#allocation3], 0  ;;  %s1923_s12 = smov 0   ;;  %s1925_s13 = smov 0   ;;  %s2853_s0 = inlined_call_operand.vmem [shape: bf16[2,32,32,8], index: 0, kind: input, shape index: {}]   ;;  %s2854_s1 = inlined_call_operand.hbm [shape: bf16[8,4], index: 1, kind: input, shape index: {}]   ;;  %s2855_s2 = inlined_call_operand.vmem [shape: f32[1,4], index: 2, kind: input, shape index: {}]   ;;  %s2856_s3 = inlined_call_operand.vmem [shape: f32[2,32,2,32,2], index: 3, kind: output, shape index: {}]  }
   0x1   :  { %s1927_s14 = smov 0   ;;  %s1929_s15 = smov 0  }
   0x2   :  { %s1931_s16 = smov 0  }
   0x3 LB: > { %s1467_s17 = sadd.s32 4294967295, %s1899_s16   ;;  %s23_s18 = sadd.s32 1, %s1891_s14  ;;  %s1899_s16 = sphi %s1931_s16, %s14_s16   ;;  %s1895_s15 = sphi %s1929_s15, %s2968_s15   ;;  %s1891_s14 = sphi %s1927_s14, %s2967_s14   ;;  %s1887_s13 = sphi %s1925_s13, %s2966_s13   ;;  %s1883_s12 = sphi %s1923_s12, %s2965_s12  }
   0x4   : > { %p24_p0 = scmp.ge.s32.totalorder %s23_s18, 4  ;;  %s26_s19 = sadd.s32 1, %s1895_s15 }
   0x5   : > { %p1469_p1 = scmp.ge.s32.totalorder %s1899_s16, 1  ;;  %p129_p2 = scmp.lt.s32.totalorder %s1899_s16, 9 }
   0x6   : > { %s2970_s18 = smov (%p24_p0, %s23_s18), 0  ;;  %s2972_s19 = smov (!%p24_p0, %s26_s19), %s1895_s15 }
   0x7   : > { %p130_p3 = pnand %p1469_p1, %p129_p2  ;;  %p28_p4 = scmp.ge.s32.totalorder %s2972_s19, 2 }
   0x8   : > { %p1654_p5 = scmp.eq.s32.totalorder %s1467_s17, 0  ;;  %s141_s22 = sshll.u32 %s2854_s1, 4  ;;  %s142_s22 = int_to_ptr.hbm [resolvable:$true] %s141_s22 }
   0x9   : > { %p1650_p6 = pneg %p130_p3  ;;  %s2974_s19 = smov (%p28_p4, %s2972_s19), 0 }
   0xa   : > { %s1901_s23 = smov [#allocation2]   ;;  %173 = sbr.rel (%p130_p3) target bundleno = 461 (0x1cd), region = 32 }
   0xb   : > { %s143_s24 = sshll.u32 %s1901_s23, 4  ;;  %p1651_p7 = pnand %p1654_p5, %p1650_p6  ;;  %s144_s24 = int_to_ptr.vmem [resolvable:$true] %s143_s24 }
   0xd   : > { %1653 = dma.hbm_to_vmem [thread:$0]  (!%p1651_p7), %s142_s22, 64, %s144_s24, [#allocation3]  }
   0xf   : > { %1878 = dma.done.wait (%p1654_p5), [#allocation3], 64  }
  0x10   : > { %1880 = vsyncadd (%p1654_p5), [#allocation3], 4294967232  ;;  %s1474_s25 = sshll.u32 %s1883_s12, 3  ;;  %p209_p8 = scmp.lt.s32.totalorder %s1887_s13, 1  ;;  %vm1069_vm0 = vcmask 1043456   ;;  %vm1020_vm7 = vcmask 64512  }
  0x11   : > { %p211_p9 = scmp.lt.s32.totalorder %s1474_s25, 31  ;;  %v935_v0 = vld [vmem:[#allocation2] sm:$0xf]  ;;  %s1902_s20 = smov 126  }
  0x12   : > { %s2976_s13 = smov (!%p209_p8, %s1887_s13), 1  ;;  %v1071_v1 = vsel %vm1069_vm0, %v935_v0, 0 }
  0x13   : > { %s2978_s25 = smov (!%p211_p9, %s1474_s25), 31  ;;  %s1476_s26 = sshll.u32 %s2976_s13, 7  ;;  %1080 = vmatpush.bf16.msra.mxu0 %v1071_v1  ;;  %1644 = vmatpush.bf16.msra.mxu2 %v1071_v1 }
  0x14   : > { %s1480_s27 = sshll.u32 %s2976_s13, 8  ;;  %s1475_s28 = sshll.u32 %s2978_s25, 2  ;;  %1645 = vmatpush.bf16.msra.mxu3 %v1071_v1  ;;  %1643 = vmatpush.bf16.msra.mxu1 %v1071_v1 }
  0x15   : > { %s1479_s29 = sshll.u32 %s2978_s25, 3  ;;  %s215_s30 = sadd.s32 %s1476_s26, %s1475_s28 }
  0x16   : > { %s1964_s4 = sadd.s32 %s1480_s27, %s1479_s29  ;;  %s1477_s5 = sshll.u32 %s215_s30, 2 }
  0x17   : > { %s1969_s8 = scalar_lea.vmem %s2853_s0, %s1477_s5  ;;  %s1481_s9 = sshll.u32 %s1964_s4, 3 }
  0x18   : > { %v1565_v2 = vld [vmem:[%s1969_s8] sm:$0xff]   ;;  %v1628_v20 = vld [vmem:[%s1969_s8 + $0x8] sm:$0xff]   ;;  %s2641_s17 = scalar_lea.vmem %s2856_s3, %s1481_s9 }
  0x19   : > { %v1635_v3 = vld [vmem:[%s1969_s8 + $0x40] sm:$0xff]   ;;  %v1566_v5 = vunpack.c.l.bf16 %v1565_v2  ;;  %v1567_v6 = vunpack.c.h.bf16 %v1565_v2  ;;  %v1570_v23 = vunpack.c.l.bf16 %v1628_v20  ;;  %v1571_v25 = vunpack.c.h.bf16 %v1628_v20  ;;  %v1979_v28 = vld [vmem:[%s1969_s8 + $0x68] sm:$0xff]  }
  0x1a   : > { %v1639_v4 = vld [vmem:[%s1969_s8 + $0x60] sm:$0xff]   ;;  %v1598_v7 = vunpack.c.l.bf16 %v1635_v3  ;;  %v1599_v8 = vunpack.c.h.bf16 %v1635_v3  ;;  %v1618_v37 = vunpack.c.l.bf16 %v1979_v28  ;;  %v1619_v44 = vunpack.c.h.bf16 %v1979_v28 }
  0x1b   : > { %v1631_v9 = vld [vmem:[%s1969_s8 + $0x20] sm:$0xff]   ;;  %v1614_v10 = vunpack.c.l.bf16 %v1639_v4  ;;  %v1615_v11 = vunpack.c.h.bf16 %v1639_v4  ;;  %v1482_v12 = vmul.f32 -1.442695, %v1566_v5  ;;  %v1483_v13 = vmul.f32 -1.442695, %v1567_v6 }
  0x1c   : > { %v1498_v14 = vmul.f32 -1.442695, %v1598_v7  ;;  %v1499_v15 = vmul.f32 -1.442695, %v1599_v8  ;;  %v1582_v16 = vunpack.c.l.bf16 %v1631_v9  ;;  %v1583_v18 = vunpack.c.h.bf16 %v1631_v9 }
  0x1d   : > { %1699 = vpow2.f32 %v1482_v12  ;;  %v1506_v17 = vmul.f32 -1.442695, %v1614_v10  ;;  %v1507_v19 = vmul.f32 -1.442695, %v1615_v11  ;;  %v1484_v31 = vmul.f32 -1.442695, %v1570_v23 }
  0x1e   : > { %1701 = vpow2.f32 %v1483_v13  ;;  %v1490_v21 = vmul.f32 -1.442695, %v1582_v16  ;;  %v1491_v22 = vmul.f32 -1.442695, %v1583_v18  ;;  %v1987_v36 = vmul.f32 -1.442695, %v1571_v25 }
  0x1f   : > { %1703 = vpow2.f32 %v1498_v14  ;;  %v1632_v14 = vld [vmem:[%s1969_s8 + $0x28] sm:$0xff]  }
  0x20   : > { %1705 = vpow2.f32 %v1499_v15 }
  0x21   : > { %1707 = vpow2.f32 %v1506_v17 }
  0x22   : > { %1709 = vpow2.f32 %v1507_v19 }
  0x23   : > { %v1700_v24 = vpop.eup %1699  ;;  %1711 = vpow2.f32 %v1490_v21 }
  0x24   : > { %v1702_v26 = vpop.eup %1701  ;;  %v1976_v27 = vadd.f32 1.0, %v1700_v24  ;;  %1713 = vpow2.f32 %v1491_v22 }
  0x25   : > { %v1704_v29 = vpop.eup %1703  ;;  %v1981_v30 = vadd.f32 1.0, %v1702_v26 }
  0x26   : > { %v1706_v32 = vpop.eup %1705  ;;  %1715 = vrcp.f32 %v1976_v27  ;;  %v434_v33 = vand.u32 2147483648, %v1976_v27  ;;  %v432_v35 = vand.u32 2147483647, %v1976_v27  ;;  %v1992_v41 = vadd.f32 1.0, %v1704_v29 }
  0x27   : > { %v1708_v34 = vpop.eup %1707  ;;  %1717 = vrcp.f32 %v1981_v30  ;;  %v447_v39 = vand.u32 2147483647, %v1981_v30  ;;  %v449_v40 = vand.u32 2147483648, %v1981_v30  ;;  %v1994_v42 = vadd.f32 1.0, %v1706_v32 }
  0x28   : > { %v1710_v38 = vpop.eup %1709  ;;  %vm428_vm1 = vweird.f32 %v1976_v27  ;;  %v1997_v43 = vadd.f32 1.0, %v1708_v34  ;;  %1719 = vpow2.f32 %v1484_v31  ;;  %v2000_v46 = vor.u32 1.1754944e-38, %v434_v33 }
  0x29   : > { %v1712_v45 = vpop.eup %1711  ;;  %vm443_vm2 = vweird.f32 %v1981_v30  ;;  %1721 = vrcp.f32 %v1992_v41  ;;  %v674_v47 = vand.u32 2147483648, %v1992_v41  ;;  %vm2005_vm3 = vcmp.eq.f32.partialorder %v432_v35, 8.507059e+37 }
  0x2a   : > { %v1714_v48 = vpop.eup %1713  ;;  %v672_v50 = vand.u32 2147483647, %v1992_v41  ;;  %1723 = vrcp.f32 %v1994_v42  ;;  %v689_v51 = vand.u32 2147483648, %v1994_v42  ;;  %v2012_v52 = vadd.f32 1.0, %v1710_v38 }
  0x2b   : > { %vm2014_vm4 = vcmp.eq.f32.partialorder %v447_v39, 8.507059e+37  ;;  %v450_v55 = vor.u32 1.1754944e-38, %v449_v40  ;;  %v687_v56 = vand.u32 2147483647, %v1994_v42  ;;  %1725 = vrcp.f32 %v1997_v43 }
  0x2c   : > { %v1716_v53 = vpop.eup %1715  ;;  %vm668_vm5 = vweird.f32 %v1992_v41  ;;  %v2022_v59 = vor.u32 1.1754944e-38, %v674_v47  ;;  %vm683_vm6 = vweird.f32 %v1994_v42  ;;  %v792_v61 = vand.u32 2147483647, %v1997_v43 }
  0x2d   : > { %v1718_v57 = vpop.eup %1717  ;;  %v424_v58 = vmul.f32 %v1716_v53, %v1976_v27  ;;  %v794_v62 = vand.u32 2147483648, %v1997_v43  ;;  %vm429_vm8 = vweird.f32 %v1716_v53  ;;  %vm2031_vm9 = vcmp.eq.f32.partialorder %v672_v50, 8.507059e+37 }
  0x2e   : > { %v439_v60 = vmul.f32 %v1718_v57, %v1981_v30  ;;  %v2029_v63 = vpop.eup %1719  ;;  %v690_v2 = vor.u32 1.1754944e-38, %v689_v51  ;;  %1727 = vrcp.f32 %v2012_v52  ;;  %vm444_vm10 = vweird.f32 %v1718_v57  ;;  %vm2051_vm14 = vmor %vm428_vm1, %vm429_vm8 }
  0x2f   : > { %v425_v0 = vsub.f32 1.0, %v424_v58  ;;  %v1722_v3 = vpop.eup %1721  ;;  %vm2036_vm11 = vcmp.eq.f32.partialorder %v687_v56, 8.507059e+37  ;;  %v807_v6 = vand.u32 2147483647, %v2012_v52  ;;  %vm2043_vm13 = vcmp.eq.f32.partialorder %v792_v61, 8.507059e+37  ;;  %vm2059_vm12 = vmor %vm443_vm2, %vm444_vm10 }
  0x30   : > { %v440_v4 = vsub.f32 1.0, %v439_v60  ;;  %v1724_v7 = vpop.eup %1723  ;;  %v664_v9 = vmul.f32 %v1722_v3, %v1992_v41  ;;  %v795_v11 = vor.u32 1.1754944e-38, %v794_v62  ;;  %v809_v12 = vand.u32 2147483648, %v2012_v52 }
  0x31   : > { %v426_v8 = vmul.f32 %v1716_v53, %v425_v0  ;;  %v1726_v13 = vpop.eup %1725  ;;  %vm669_vm15 = vweird.f32 %v1722_v3  ;;  %v679_v16 = vmul.f32 %v1724_v7, %v1994_v42  ;;  %vm684_vm0 = vweird.f32 %v1724_v7 }
  0x32   : > { %v441_v15 = vmul.f32 %v1718_v57, %v440_v4  ;;  %v665_v19 = vsub.f32 1.0, %v664_v9  ;;  %v784_v20 = vmul.f32 %v1726_v13, %v1997_v43  ;;  %vm789_vm1 = vweird.f32 %v1726_v13  ;;  %vm2083_vm2 = vmor %vm668_vm5, %vm669_vm15 }
  0x33   : > { %v427_v17 = vadd.f32 %v1716_v53, %v426_v8  ;;  %v680_v22 = vsub.f32 1.0, %v679_v16  ;;  %vm2064_vm8 = vcmp.eq.f32.partialorder %v807_v6, 8.507059e+37  ;;  %v2068_v24 = vadd.f32 1.0, %v1712_v45 }
  0x34   : > { %v442_v21 = vadd.f32 %v1718_v57, %v441_v15  ;;  %v2070_v25 = vadd.f32 1.0, %v1714_v48  ;;  %v1728_v26 = vpop.eup %1727  ;;  %v666_v29 = vmul.f32 %v1722_v3, %v665_v19  ;;  %v785_v30 = vsub.f32 1.0, %v784_v20 }
  0x35   : > { %v431_v27 = vsel %vm2051_vm14, %v1716_v53, %v427_v17  ;;  %1729 = vpow2.f32 %v1987_v36  ;;  %v681_v34 = vmul.f32 %v1724_v7, %v680_v22  ;;  %v799_v35 = vmul.f32 %v1728_v26, %v2012_v52 }
  0x36   : > { %v436_v31 = vsel %vm2005_vm3, %v2000_v46, %v431_v27  ;;  %v446_v32 = vsel %vm2059_vm12, %v1718_v57, %v442_v21  ;;  %v667_v39 = vadd.f32 %v1722_v3, %v666_v29  ;;  %vm2093_vm3 = vmor %vm683_vm6, %vm684_vm0  ;;  %v786_v41 = vmul.f32 %v1726_v13, %v785_v30 }
  0x37   : > { %v451_v36 = vsel %vm2014_vm4, %v450_v55, %v446_v32  ;;  %v903_v38 = vpack.c.bf16 %v436_v31, %v436_v31  ;;  %v682_v46 = vadd.f32 %v1724_v7, %v681_v34  ;;  %vm2877_vm5 = vweird.f32 %v1997_v43 }
  0x38   : > { %v904_v45 = vpack.c.bf16 %v451_v36, %v451_v36  ;;  %vm2100_vm10 = vmor %vm2877_vm5, %vm789_vm1  ;;  %v800_v48 = vsub.f32 1.0, %v799_v35  ;;  %vm804_vm4 = vweird.f32 %v1728_v26  ;;  %v671_v42 = vsel %vm2083_vm2, %v1722_v3, %v667_v39 }
  0x39   : > { %v972_v49 = vunpack.c.l.b16 %v903_v38  ;;  %v787_v50 = vadd.f32 %v1726_v13, %v786_v41  ;;  %1731 = vrcp.f32 %v2068_v24  ;;  %v676_v53 = vsel %vm2031_vm9, %v2022_v59, %v671_v42  ;;  %v2179_v41 = vld [vmem:[%s1969_s8 + $0x48] sm:$0xff]  }
  0x3a   : > { %v973_v51 = vunpack.c.l.b16 %v904_v45  ;;  %v686_v43 = vsel %vm2093_vm3, %v1724_v7, %v682_v46  ;;  %v801_v54 = vmul.f32 %v1728_v26, %v800_v48  ;;  %v919_v57 = vpack.c.bf16 %v676_v53, %v676_v53 }
  0x3b   : > { %v1730_v55 = vpop.eup %1729  ;;  %v691_v56 = vsel %vm2036_vm11, %v690_v2, %v686_v43  ;;  %v791_v58 = vsel %vm2100_vm10, %v1726_v13, %v787_v50  ;;  %vm2880_vm6 = vweird.f32 %v2012_v52  ;;  %v810_v61 = vor.u32 1.1754944e-38, %v809_v12 }
  0x3c   : > { %vm2118_vm12 = vmor %vm2880_vm6, %vm804_vm4  ;;  %v1004_v59 = vpack.c.b16 %v973_v51, %v972_v49  ;;  %v920_v62 = vpack.c.bf16 %v691_v56, %v691_v56  ;;  %v796_v0 = vsel %vm2043_vm13, %v795_v11, %v791_v58  ;;  %v802_v1 = vadd.f32 %v1728_v26, %v801_v54 }
  0x3d   : > { %v988_v3 = vunpack.c.l.b16 %v919_v57  ;;  %v927_v4 = vpack.c.bf16 %v796_v0, %v796_v0  ;;  %v1508_v2 = vmul.f32 -1.442695, %v1618_v37  ;;  %1733 = vrcp.f32 %v2070_v25 }
  0x3e   : > { %1514 = vmatmul.msk.bf16.vlgmr.msra.gmra.mxu0 %vm1020_vm7, %v1004_v59  ;;  %v989_v52 = vunpack.c.l.b16 %v920_v62  ;;  %v806_v5 = vsel %vm2118_vm12, %v1728_v26, %v802_v1  ;;  %v1509_v6 = vmul.f32 -1.442695, %v1619_v44  ;;  %vm548_vm9 = vweird.f32 %v2068_v24 }
  0x3f   : > { %v1732_v7 = vpop.eup %1731  ;;  %v811_v8 = vsel %vm2064_vm8, %v810_v61, %v806_v5  ;;  %v552_v9 = vand.u32 2147483647, %v2068_v24  ;;  %v554_v37 = vand.u32 2147483648, %v2068_v24  ;;  %v996_v12 = vunpack.c.l.b16 %v927_v4 }
  0x40   : > { %v1012_v10 = vpack.c.b16 %v989_v52, %v988_v3  ;;  %v928_v11 = vpack.c.bf16 %v811_v8, %v811_v8  ;;  %v544_v13 = vmul.f32 %v1732_v7, %v2068_v24  ;;  %vm549_vm11 = vweird.f32 %v1732_v7 }
  0x41   : > { %v567_v28 = vand.u32 2147483647, %v2070_v25  ;;  %v2141_v44 = vadd.f32 1.0, %v2029_v63  ;;  %v2143_v15 = vadd.f32 1.0, %v1730_v55  ;;  %v569_v18 = vand.u32 2147483648, %v2070_v25  ;;  %vm2158_vm15 = vmor %vm548_vm9, %vm549_vm11 }
  0x42   : > { %1522 = vmatmul.msk.bf16.vlgmr.msra.gmra.mxu2 %vm1020_vm7, %v1012_v10  ;;  %v997_v16 = vunpack.c.l.b16 %v928_v11  ;;  %v545_v17 = vsub.f32 1.0, %v544_v13  ;;  %1735 = vpow2.f32 %v1508_v2  ;;  %vm2147_vm13 = vcmp.eq.f32.partialorder %v552_v9, 8.507059e+37 }
  0x43   : > { %vm563_vm14 = vweird.f32 %v2070_v25  ;;  %1737 = vrcp.f32 %v2141_v44  ;;  %v1586_v20 = vunpack.c.l.bf16 %v1632_v14  ;;  %v1734_v63 = vpop.eup %1733  ;;  %v462_v23 = vand.u32 2147483647, %v2141_v44 }
  0x44   : > { %v1016_v21 = vpack.c.b16 %v997_v16, %v996_v12  ;;  %v546_v22 = vmul.f32 %v1732_v7, %v545_v17  ;;  %v464_v26 = vand.u32 2147483648, %v2141_v44  ;;  %v555_v29 = vor.u32 1.1754944e-38, %v554_v37  ;;  %v1641_v12 = vld [vmem:[%s1969_s8 + $0x70] sm:$0xff]  }
  0x45   : > { %v559_v30 = vmul.f32 %v1734_v63, %v2070_v25  ;;  %vm2163_vm0 = vcmp.eq.f32.partialorder %v567_v28, 8.507059e+37  ;;  %1739 = vrcp.f32 %v2143_v15  ;;  %v570_v33 = vor.u32 1.1754944e-38, %v569_v18 }
  0x46   : > { %1526 = vmatmul.msk.bf16.vlgmr.msra.gmra.mxu3 %vm1020_vm7, %v1016_v21  ;;  %v547_v32 = vadd.f32 %v1732_v7, %v546_v22  ;;  %vm458_vm1 = vweird.f32 %v2141_v44  ;;  %v477_v24 = vand.u32 2147483647, %v2143_v15  ;;  %vm564_vm8 = vweird.f32 %v1734_v63 }
  0x47   : > { %v560_v34 = vsub.f32 1.0, %v559_v30  ;;  %vm473_vm2 = vweird.f32 %v2143_v15  ;;  %1741 = vpow2.f32 %v1509_v6  ;;  %vm2174_vm3 = vcmp.eq.f32.partialorder %v462_v23, 8.507059e+37  ;;  %vm2187_vm5 = vmor %vm563_vm14, %vm564_vm8 }
  0x48   : > { %v1736_v35 = vpop.eup %1735  ;;  %v551_v36 = vsel %vm2158_vm15, %v1732_v7, %v547_v32  ;;  %v465_v39 = vor.u32 1.1754944e-38, %v464_v26  ;;  %v1492_v40 = vmul.f32 -1.442695, %v1586_v20  ;;  %v1587_v49 = vunpack.c.h.bf16 %v1632_v14 }
  0x49   : > { %v1738_v45 = vpop.eup %1737  ;;  %v556_v46 = vsel %vm2147_vm13, %v555_v29, %v551_v36  ;;  %v561_v47 = vmul.f32 %v1734_v63, %v560_v34  ;;  %v2183_v48 = vadd.f32 1.0, %v1736_v35  ;;  %vm2192_vm10 = vcmp.eq.f32.partialorder %v477_v24, 8.507059e+37 }
  0x4a   : > { %v454_v50 = vmul.f32 %v1738_v45, %v2141_v44  ;;  %v479_v53 = vand.u32 2147483648, %v2143_v15  ;;  %1743 = vpow2.f32 %v1492_v40  ;;  %v911_v55 = vpack.c.bf16 %v556_v46, %v556_v46 }
  0x4b   : > { %v1740_v43 = vpop.eup %1739  ;;  %v562_v54 = vadd.f32 %v1734_v63, %v561_v47  ;;  %1745 = vrcp.f32 %v2183_v48  ;;  %v1602_v25 = vunpack.c.l.bf16 %v2179_v41  ;;  %vm459_vm4 = vweird.f32 %v1738_v45 }
  0x4c   : > { %v455_v56 = vsub.f32 1.0, %v454_v50  ;;  %v469_v57 = vmul.f32 %v1740_v43, %v2143_v15  ;;  %v822_v58 = vand.u32 2147483647, %v2183_v48  ;;  %vm474_vm6 = vweird.f32 %v1740_v43  ;;  %vm2210_vm12 = vmor %vm458_vm1, %vm459_vm4 }
  0x4d   : > { %v1742_v60 = vpop.eup %1741  ;;  %v566_v61 = vsel %vm2187_vm5, %v1734_v63, %v562_v54  ;;  %v824_v59 = vand.u32 2147483648, %v2183_v48  ;;  %v1493_v62 = vmul.f32 -1.442695, %v1587_v49  ;;  %v980_v52 = vunpack.c.l.b16 %v911_v55  ;;  %vm2219_vm11 = vmor %vm473_vm2, %vm474_vm6 }
  0x4e   : > { %v571_v0 = vsel %vm2163_vm0, %v570_v33, %v566_v61  ;;  %v456_v1 = vmul.f32 %v1738_v45, %v455_v56  ;;  %v470_v3 = vsub.f32 1.0, %v469_v57  ;;  %v2206_v4 = vadd.f32 1.0, %v1742_v60  ;;  %v1637_v57 = vld [vmem:[%s1969_s8 + $0x50] sm:$0xff]  }
  0x4f   : > { %v912_v2 = vpack.c.bf16 %v571_v0, %v571_v0  ;;  %v480_v6 = vor.u32 1.1754944e-38, %v479_v53  ;;  %1747 = vpow2.f32 %v1493_v62  ;;  %vm818_vm9 = vweird.f32 %v2183_v48 }
  0x50   : > { %v1744_v7 = vpop.eup %1743  ;;  %v457_v8 = vadd.f32 %v1738_v45, %v456_v1  ;;  %v471_v9 = vmul.f32 %v1740_v43, %v470_v3  ;;  %1749 = vrcp.f32 %v2206_v4  ;;  %vm2223_vm13 = vcmp.eq.f32.partialorder %v822_v58, 8.507059e+37 }
  0x51   : > { %v1746_v37 = vpop.eup %1745  ;;  %v981_v10 = vunpack.c.l.b16 %v912_v2  ;;  %v825_v13 = vor.u32 1.1754944e-38, %v824_v59  ;;  %v2227_v14 = vadd.f32 1.0, %v1744_v7  ;;  %v837_v17 = vand.u32 2147483647, %v2206_v4 }
  0x52   : > { %v461_v28 = vsel %vm2210_vm12, %v1738_v45, %v457_v8  ;;  %v472_v44 = vadd.f32 %v1740_v43, %v471_v9  ;;  %v814_v16 = vmul.f32 %v1746_v37, %v2183_v48  ;;  %vm819_vm14 = vweird.f32 %v1746_v37 }
  0x53   : > { %v1008_v15 = vpack.c.b16 %v981_v10, %v980_v52  ;;  %v466_v18 = vsel %vm2174_vm3, %v465_v39, %v461_v28  ;;  %v839_v19 = vand.u32 2147483648, %v2206_v4  ;;  %1751 = vrcp.f32 %v2227_v14  ;;  %vm2250_vm0 = vmor %vm818_vm9, %vm819_vm14  ;;  %v1629_v39 = vld [vmem:[%s1969_s8 + $0x10] sm:$0xff]  }
  0x54   : > { %v476_v20 = vsel %vm2219_vm11, %v1740_v43, %v472_v44  ;;  %v905_v63 = vpack.c.bf16 %v466_v18, %v466_v18  ;;  %v815_v21 = vsub.f32 1.0, %v814_v16  ;;  %vm833_vm15 = vweird.f32 %v2206_v4 }
  0x55   : > { %v1748_v22 = vpop.eup %1747  ;;  %1518 = vmatmul.msk.bf16.vlgmr.msra.gmra.mxu1 %vm1020_vm7, %v1008_v15  ;;  %v481_v23 = vsel %vm2192_vm10, %v480_v6, %v476_v20  ;;  %v582_v26 = vand.u32 2147483647, %v2227_v14  ;;  %v1603_v27 = vunpack.c.h.bf16 %v2179_v41  ;;  %vm2255_vm1 = vcmp.eq.f32.partialorder %v837_v17, 8.507059e+37 }
  0x56   : > { %v1750_v29 = vpop.eup %1749  ;;  %v906_v30 = vpack.c.bf16 %v481_v23, %v481_v23  ;;  %v974_v31 = vunpack.c.l.b16 %v905_v63  ;;  %v816_v32 = vmul.f32 %v1746_v37, %v815_v21  ;;  %v2245_v33 = vadd.f32 1.0, %v1748_v22 }
  0x57   : > { %v829_v34 = vmul.f32 %v1750_v29, %v2206_v4  ;;  %v840_v36 = vor.u32 1.1754944e-38, %v839_v19  ;;  %v584_v38 = vand.u32 2147483648, %v2227_v14  ;;  %vm578_vm8 = vweird.f32 %v2227_v14 }
  0x58   : > { %v975_v40 = vunpack.c.l.b16 %v906_v30  ;;  %v817_v45 = vadd.f32 %v1746_v37, %v816_v32  ;;  %1753 = vrcp.f32 %v2245_v33  ;;  %vm834_vm2 = vweird.f32 %v1750_v29 }
  0x59   : > { %v830_v46 = vsub.f32 1.0, %v829_v34  ;;  %vm2263_vm3 = vcmp.eq.f32.partialorder %v582_v26, 8.507059e+37  ;;  %v1500_v48 = vmul.f32 -1.442695, %v1602_v25  ;;  %v1752_v49 = vpop.eup %1751  ;;  %v1501_v51 = vmul.f32 -1.442695, %v1603_v27  ;;  %vm2278_vm5 = vmor %vm833_vm15, %vm834_vm2 }
  0x5a   : > { %v1005_v42 = vpack.c.b16 %v975_v40, %v974_v31  ;;  %v821_v50 = vsel %vm2250_vm0, %v1746_v37, %v817_v45  ;;  %v1574_v53 = vunpack.c.l.bf16 %v1629_v39  ;;  %v574_v55 = vmul.f32 %v1752_v49, %v2227_v14 }
  0x5b   : > { %v826_v43 = vsel %vm2223_vm13, %v825_v13, %v821_v50  ;;  %v831_v54 = vmul.f32 %v1750_v29, %v830_v46  ;;  %v585_v56 = vor.u32 1.1754944e-38, %v584_v38  ;;  %vm579_vm10 = vweird.f32 %v1752_v49 }
  0x5c   : > { %1515 = vmatmul.msk.bf16.gmra.mxu0 %vm1020_vm7, %v1005_v42  ;;  %v929_v25 = vpack.c.bf16 %v826_v43, %v826_v43  ;;  %vm593_vm4 = vweird.f32 %v2245_v33  ;;  %1755 = vpow2.f32 %v1500_v48  ;;  %v575_v60 = vsub.f32 1.0, %v574_v55  ;;  %vm2293_vm6 = vmor %vm578_vm8, %vm579_vm10 }
  0x5d   : > { %v832_v58 = vadd.f32 %v1750_v29, %v831_v54  ;;  %1757 = vpow2.f32 %v1501_v51  ;;  %v1575_v61 = vunpack.c.h.bf16 %v1629_v39  ;;  %v597_v62 = vand.u32 2147483647, %v2245_v33 }
  0x5e   : > { %v1754_v59 = vpop.eup %1753  ;;  %v599_v0 = vand.u32 2147483648, %v2245_v33  ;;  %v1486_v1 = vmul.f32 -1.442695, %v1574_v53  ;;  %v1606_v3 = vunpack.c.l.bf16 %v1637_v57  ;;  %v998_v2 = vunpack.c.l.b16 %v929_v25 }
  0x5f   : > { %v836_v4 = vsel %vm2278_vm5, %v1750_v29, %v832_v58  ;;  %v576_v52 = vmul.f32 %v1752_v49, %v575_v60  ;;  %v589_v5 = vmul.f32 %v1754_v59, %v2245_v33  ;;  %v1487_v8 = vmul.f32 -1.442695, %v1575_v61  ;;  %v2318_v29 = vld [vmem:[%s1969_s8 + $0x30] sm:$0xff]  }
  0x60   : > { %v841_v6 = vsel %vm2255_vm1, %v840_v36, %v836_v4  ;;  %1759 = vpow2.f32 %v1486_v1  ;;  %v1502_v9 = vmul.f32 -1.442695, %v1606_v3  ;;  %vm594_vm12 = vweird.f32 %v1754_v59 }
  0x61   : > { %v930_v37 = vpack.c.bf16 %v841_v6, %v841_v6  ;;  %v577_v10 = vadd.f32 %v1752_v49, %v576_v52  ;;  %v590_v11 = vsub.f32 1.0, %v589_v5  ;;  %vm2298_vm9 = vcmp.eq.f32.partialorder %v597_v62, 8.507059e+37  ;;  %vm2310_vm11 = vmor %vm593_vm4, %vm594_vm12 }
  0x62   : > { %v1756_v13 = vpop.eup %1755  ;;  %v600_v44 = vor.u32 1.1754944e-38, %v599_v0  ;;  %1761 = vpow2.f32 %v1487_v8  ;;  %v1607_v14 = vunpack.c.h.bf16 %v1637_v57  ;;  %v1622_v22 = vunpack.c.l.bf16 %v1641_v12 }
  0x63   : > { %v1758_v16 = vpop.eup %1757  ;;  %v999_v17 = vunpack.c.l.b16 %v930_v37  ;;  %v581_v15 = vsel %vm2293_vm6, %v1752_v49, %v577_v10  ;;  %v591_v18 = vmul.f32 %v1754_v59, %v590_v11  ;;  %v2304_v19 = vadd.f32 1.0, %v1756_v13 }
  0x64   : > { %v586_v20 = vsel %vm2263_vm3, %v585_v56, %v581_v15  ;;  %v2314_v21 = vadd.f32 1.0, %v1758_v16  ;;  %1763 = vpow2.f32 %v1502_v9  ;;  %v1503_v32 = vmul.f32 -1.442695, %v1607_v14 }
  0x65   : > { %v1017_v23 = vpack.c.b16 %v999_v17, %v998_v2  ;;  %v592_v26 = vadd.f32 %v1754_v59, %v591_v18  ;;  %v913_v27 = vpack.c.bf16 %v586_v20, %v586_v20  ;;  %1765 = vrcp.f32 %v2304_v19 }
  0x66   : > { %v1760_v30 = vpop.eup %1759  ;;  %v702_v31 = vand.u32 2147483647, %v2304_v19  ;;  %1767 = vrcp.f32 %v2314_v21  ;;  %v704_v24 = vand.u32 2147483648, %v2304_v19  ;;  %v717_v34 = vand.u32 2147483647, %v2314_v21 }
  0x67   : > { %1527 = vmatmul.msk.bf16.gmra.mxu3 %vm1020_vm7, %v1017_v23  ;;  %v596_v33 = vsel %vm2310_vm11, %v1754_v59, %v592_v26  ;;  %v1623_v35 = vunpack.c.h.bf16 %v1641_v12  ;;  %v982_v39 = vunpack.c.l.b16 %v913_v27  ;;  %v1510_v40 = vmul.f32 -1.442695, %v1622_v22 }
  0x68   : > { %v1762_v36 = vpop.eup %1761  ;;  %v601_v38 = vsel %vm2298_vm9, %v600_v44, %v596_v33  ;;  %v1590_v45 = vunpack.c.l.bf16 %v2318_v29  ;;  %v719_v47 = vand.u32 2147483648, %v2314_v21  ;;  %v2331_v48 = vadd.f32 1.0, %v1760_v30 }
  0x69   : > { %v914_v46 = vpack.c.bf16 %v601_v38, %v601_v38  ;;  %v2333_v49 = vadd.f32 1.0, %v1762_v36  ;;  %vm698_vm13 = vweird.f32 %v2304_v19  ;;  %vm2336_vm14 = vcmp.eq.f32.partialorder %v702_v31, 8.507059e+37  ;;  %v2467_v31 = vld [vmem:[%s1969_s8 + $0x38] sm:$0xff]  }
  0x6a   : > { %v1764_v42 = vpop.eup %1763  ;;  %vm713_vm15 = vweird.f32 %v2314_v21  ;;  %1769 = vpow2.f32 %v1503_v32  ;;  %v705_v43 = vor.u32 1.1754944e-38, %v704_v24  ;;  %vm2341_vm0 = vcmp.eq.f32.partialorder %v717_v34, 8.507059e+37 }
  0x6b   : > { %v1766_v51 = vpop.eup %1765  ;;  %v983_v53 = vunpack.c.l.b16 %v914_v46  ;;  %1771 = vrcp.f32 %v2331_v48  ;;  %v492_v57 = vand.u32 2147483647, %v2331_v48  ;;  %v1511_v41 = vmul.f32 -1.442695, %v1623_v35 }
  0x6c   : > { %v1768_v55 = vpop.eup %1767  ;;  %v694_v56 = vmul.f32 %v1766_v51, %v2304_v19  ;;  %1773 = vrcp.f32 %v2333_v49  ;;  %v720_v60 = vor.u32 1.1754944e-38, %v719_v47  ;;  %v494_v61 = vand.u32 2147483648, %v2331_v48 }
  0x6d   : > { %v1009_v25 = vpack.c.b16 %v983_v53, %v982_v39  ;;  %v709_v58 = vmul.f32 %v1768_v55, %v2314_v21  ;;  %vm699_vm1 = vweird.f32 %v1766_v51  ;;  %vm714_vm8 = vweird.f32 %v1768_v55 }
  0x6e   : > { %v695_v59 = vsub.f32 1.0, %v694_v56  ;;  %v507_v62 = vand.u32 2147483647, %v2333_v49  ;;  %v509_v1 = vand.u32 2147483648, %v2333_v49  ;;  %v2354_v3 = vadd.f32 1.0, %v1764_v42  ;;  %vm2363_vm5 = vmor %vm698_vm13, %vm699_vm1 }
  0x6f   : > { %1519 = vmatmul.msk.bf16.gmra.mxu1 %vm1020_vm7, %v1009_v25  ;;  %v710_v0 = vsub.f32 1.0, %v709_v58  ;;  %1775 = vpow2.f32 %v1510_v40  ;;  %vm488_vm2 = vweird.f32 %v2331_v48  ;;  %vm2357_vm3 = vcmp.eq.f32.partialorder %v492_v57, 8.507059e+37  ;;  %vm2373_vm10 = vmor %vm713_vm15, %vm714_vm8 }
  0x70   : > { %v1770_v4 = vpop.eup %1769  ;;  %v696_v2 = vmul.f32 %v1766_v51, %v695_v59  ;;  %1777 = vpow2.f32 %v1511_v41  ;;  %v495_v8 = vor.u32 1.1754944e-38, %v494_v61  ;;  %vm503_vm4 = vweird.f32 %v2333_v49 }
  0x71   : > { %v1772_v5 = vpop.eup %1771  ;;  %v711_v7 = vmul.f32 %v1768_v55, %v710_v0  ;;  %v2367_v9 = vadd.f32 1.0, %v1770_v4  ;;  %1779 = vrcp.f32 %v2354_v3  ;;  %vm2379_vm6 = vcmp.eq.f32.partialorder %v507_v62, 8.507059e+37 }
  0x72   : > { %v1774_v37 = vpop.eup %1773  ;;  %v697_v10 = vadd.f32 %v1766_v51, %v696_v2  ;;  %v484_v12 = vmul.f32 %v1772_v5, %v2331_v48  ;;  %vm489_vm12 = vweird.f32 %v1772_v5  ;;  %v510_v14 = vor.u32 1.1754944e-38, %v509_v1 }
  0x73   : > { %v712_v28 = vadd.f32 %v1768_v55, %v711_v7  ;;  %v499_v44 = vmul.f32 %v1774_v37, %v2333_v49  ;;  %v734_v15 = vand.u32 2147483648, %v2354_v3  ;;  %1781 = vrcp.f32 %v2367_v9  ;;  %vm2398_vm13 = vmor %vm488_vm2, %vm489_vm12 }
  0x74   : > { %v701_v16 = vsel %vm2363_vm5, %v1766_v51, %v697_v10  ;;  %v485_v17 = vsub.f32 1.0, %v484_v12  ;;  %vm504_vm9 = vweird.f32 %v1774_v37  ;;  %vm728_vm11 = vweird.f32 %v2354_v3 }
  0x75   : > { %v1776_v18 = vpop.eup %1775  ;;  %v706_v19 = vsel %vm2336_vm14, %v705_v43, %v701_v16  ;;  %v716_v20 = vsel %vm2373_vm10, %v1768_v55, %v712_v28  ;;  %v500_v63 = vsub.f32 1.0, %v499_v44  ;;  %v732_v33 = vand.u32 2147483647, %v2354_v3  ;;  %vm2405_vm14 = vmor %vm503_vm4, %vm504_vm9 }
  0x76   : > { %v1778_v21 = vpop.eup %1777  ;;  %v721_v22 = vsel %vm2341_vm0, %v720_v60, %v716_v20  ;;  %v921_v23 = vpack.c.bf16 %v706_v19, %v706_v19  ;;  %v486_v26 = vmul.f32 %v1772_v5, %v485_v17  ;;  %v735_v24 = vor.u32 1.1754944e-38, %v734_v15  ;;  %v1630_v15 = vld [vmem:[%s1969_s8 + $0x18] sm:$0xff]  }
  0x77   : > { %v1780_v27 = vpop.eup %1779  ;;  %v922_v30 = vpack.c.bf16 %v721_v22, %v721_v22  ;;  %v501_v32 = vmul.f32 %v1774_v37, %v500_v63  ;;  %vm743_vm15 = vweird.f32 %v2367_v9  ;;  %v747_v46 = vand.u32 2147483647, %v2367_v9 }
  0x78   : > { %v990_v34 = vunpack.c.l.b16 %v921_v23  ;;  %v487_v35 = vadd.f32 %v1772_v5, %v486_v26  ;;  %v724_v38 = vmul.f32 %v1780_v27, %v2354_v3  ;;  %vm729_vm0 = vweird.f32 %v1780_v27 }
  0x79   : > { %v991_v39 = vunpack.c.l.b16 %v922_v30  ;;  %v502_v40 = vadd.f32 %v1774_v37, %v501_v32  ;;  %v1782_v47 = vpop.eup %1781  ;;  %v2414_v50 = vadd.f32 1.0, %v1776_v18  ;;  %v2416_v49 = vadd.f32 1.0, %v1778_v21  ;;  %vm2430_vm1 = vmor %vm728_vm11, %vm729_vm0 }
  0x7a   : > { %v491_v48 = vsel %vm2398_vm13, %v1772_v5, %v487_v35  ;;  %v725_v42 = vsub.f32 1.0, %v724_v38  ;;  %v739_v54 = vmul.f32 %v1782_v47, %v2367_v9  ;;  %v749_v41 = vand.u32 2147483648, %v2367_v9  ;;  %v1638_v5 = vld [vmem:[%s1969_s8 + $0x58] sm:$0xff]  }
  0x7b   : > { %v1013_v51 = vpack.c.b16 %v991_v39, %v990_v34  ;;  %v496_v53 = vsel %vm2357_vm3, %v495_v8, %v491_v48  ;;  %v506_v43 = vsel %vm2405_vm14, %v1774_v37, %v502_v40  ;;  %vm744_vm8 = vweird.f32 %v1782_v47 }
  0x7c   : > { %v511_v55 = vsel %vm2379_vm6, %v510_v14, %v506_v43  ;;  %v907_v56 = vpack.c.bf16 %v496_v53, %v496_v53  ;;  %v726_v57 = vmul.f32 %v1780_v27, %v725_v42  ;;  %v740_v60 = vsub.f32 1.0, %v739_v54  ;;  %vm2443_vm3 = vmor %vm743_vm15, %vm744_vm8 }
  0x7d   : > { %1523 = vmatmul.msk.bf16.gmra.mxu2 %vm1020_vm7, %v1013_v51  ;;  %v908_v25 = vpack.c.bf16 %v511_v55, %v511_v55  ;;  %1783 = vrcp.f32 %v2414_v50  ;;  %vm733_vm2 = vcmp.eq.f32.partialorder %v732_v33, 8.507059e+37  ;;  %v1494_v62 = vmul.f32 -1.442695, %v1590_v45 }
  0x7e   : > { %v976_v61 = vunpack.c.l.b16 %v907_v56  ;;  %v727_v59 = vadd.f32 %v1780_v27, %v726_v57  ;;  %v741_v1 = vmul.f32 %v1782_v47, %v740_v60  ;;  %1785 = vrcp.f32 %v2416_v49 }
  0x7f   : > { %v977_v0 = vunpack.c.l.b16 %v908_v25  ;;  %v1591_v3 = vunpack.c.h.bf16 %v2318_v29  ;;  %vm2447_vm5 = vcmp.eq.f32.partialorder %v747_v46, 8.507059e+37  ;;  %v750_v45 = vor.u32 1.1754944e-38, %v749_v41 }
  0x80   : > { %v731_v4 = vsel %vm2430_vm1, %v1780_v27, %v727_v59  ;;  %vm848_vm10 = vweird.f32 %v2414_v50  ;;  %v742_v29 = vadd.f32 %v1782_v47, %v741_v1  ;;  %v852_v8 = vand.u32 2147483647, %v2414_v50 }
  0x81   : > { %v1006_v6 = vpack.c.b16 %v977_v0, %v976_v61  ;;  %v736_v7 = vsel %vm733_vm2, %v735_v24, %v731_v4  ;;  %v854_v9 = vand.u32 2147483648, %v2414_v50  ;;  %vm863_vm4 = vweird.f32 %v2416_v49 }
  0x82   : > { %v923_v37 = vpack.c.bf16 %v736_v7, %v736_v7  ;;  %1787 = vpow2.f32 %v1494_v62  ;;  %v746_v11 = vsel %vm2443_vm3, %v1782_v47, %v742_v29  ;;  %v1495_v12 = vmul.f32 -1.442695, %v1591_v3 }
  0x83   : > { %v1784_v10 = vpop.eup %1783  ;;  %1516 = vmatmul.msk.bf16.gmra.mxu0 %vm1020_vm7, %v1006_v6  ;;  %v1610_v13 = vunpack.c.l.bf16 %v1638_v5  ;;  %v1611_v28 = vunpack.c.h.bf16 %v1638_v5  ;;  %v751_v44 = vsel %vm2447_vm5, %v750_v45, %v746_v11  ;;  %v867_v16 = vand.u32 2147483647, %v2416_v49 }
  0x84   : > { %v844_v14 = vmul.f32 %v1784_v10, %v2414_v50  ;;  %v869_v17 = vand.u32 2147483648, %v2416_v49  ;;  %v1786_v18 = vpop.eup %1785  ;;  %v924_v19 = vpack.c.bf16 %v751_v44, %v751_v44  ;;  %v992_v20 = vunpack.c.l.b16 %v923_v37 }
  0x85   : > { %1789 = vpow2.f32 %v1495_v12  ;;  %v1504_v63 = vmul.f32 -1.442695, %v1610_v13  ;;  %vm849_vm6 = vweird.f32 %v1784_v10  ;;  %v859_v22 = vmul.f32 %v1786_v18, %v2416_v49 }
  0x86   : > { %v845_v21 = vsub.f32 1.0, %v844_v14  ;;  %v1505_v23 = vmul.f32 -1.442695, %v1611_v28  ;;  %v993_v26 = vunpack.c.l.b16 %v924_v19  ;;  %v1578_v27 = vunpack.c.l.bf16 %v1630_v15  ;;  %vm2471_vm9 = vmor %vm848_vm10, %vm849_vm6 }
  0x87   : > { %1791 = vpow2.f32 %v1504_v63  ;;  %v1579_v30 = vunpack.c.h.bf16 %v1630_v15  ;;  %v860_v24 = vsub.f32 1.0, %v859_v22  ;;  %vm864_vm12 = vweird.f32 %v1786_v18 }
  0x88   : > { %v1788_v32 = vpop.eup %1787  ;;  %v846_v33 = vmul.f32 %v1784_v10, %v845_v21  ;;  %1793 = vpow2.f32 %v1505_v23  ;;  %v1014_v34 = vpack.c.b16 %v993_v26, %v992_v20  ;;  %v855_v36 = vor.u32 1.1754944e-38, %v854_v9  ;;  %vm2480_vm13 = vmor %vm863_vm4, %vm864_vm12 }
  0x89   : > { %v2475_v38 = vadd.f32 1.0, %v1788_v32  ;;  %v1488_v39 = vmul.f32 -1.442695, %v1578_v27  ;;  %vm853_vm11 = vcmp.eq.f32.partialorder %v852_v8, 8.507059e+37  ;;  %v861_v46 = vmul.f32 %v1786_v18, %v860_v24 }
  0x8a   : > { %v847_v40 = vadd.f32 %v1784_v10, %v846_v33  ;;  %v1594_v47 = vunpack.c.l.bf16 %v2467_v31  ;;  %v870_v50 = vor.u32 1.1754944e-38, %v869_v17  ;;  %v1489_v51 = vmul.f32 -1.442695, %v1579_v30 }
  0x8b   : > { %v1790_v48 = vpop.eup %1789  ;;  %1795 = vrcp.f32 %v2475_v38  ;;  %v862_v43 = vadd.f32 %v1786_v18, %v861_v46  ;;  %vm868_vm14 = vcmp.eq.f32.partialorder %v867_v16, 8.507059e+37  ;;  %v612_v49 = vand.u32 2147483647, %v2475_v38 }
  0x8c   : > { %v851_v53 = vsel %vm2471_vm9, %v1784_v10, %v847_v40  ;;  %v2487_v54 = vadd.f32 1.0, %v1790_v48  ;;  %1797 = vpow2.f32 %v1488_v39  ;;  %v1496_v58 = vmul.f32 -1.442695, %v1594_v47 }
  0x8d   : > { %v1792_v55 = vpop.eup %1791  ;;  %1524 = vmatmul.msk.bf16.gmra.mxu2 %vm1020_vm7, %v1014_v34  ;;  %v856_v56 = vsel %vm853_vm11, %v855_v36, %v851_v53  ;;  %v866_v41 = vsel %vm2480_vm13, %v1786_v18, %v862_v43  ;;  %v614_v61 = vand.u32 2147483648, %v2475_v38  ;;  %vm608_vm15 = vweird.f32 %v2475_v38 }
  0x8e   : > { %v1794_v57 = vpop.eup %1793  ;;  %v931_v25 = vpack.c.bf16 %v856_v56, %v856_v56  ;;  %1799 = vrcp.f32 %v2487_v54  ;;  %v871_v60 = vsel %vm868_vm14, %v870_v50, %v866_v41  ;;  %v2495_v59 = vadd.f32 1.0, %v1792_v55 }
  0x8f   : > { %1801 = vpow2.f32 %v1489_v51  ;;  %v932_v62 = vpack.c.bf16 %v871_v60, %v871_v60  ;;  %v627_v1 = vand.u32 2147483647, %v2487_v54  ;;  %v2498_v3 = vadd.f32 1.0, %v1794_v57 }
  0x90   : > { %v1000_v0 = vunpack.c.l.b16 %v931_v25  ;;  %vm2501_vm0 = vcmp.eq.f32.partialorder %v612_v49, 8.507059e+37  ;;  %1803 = vrcp.f32 %v2495_v59  ;;  %v1595_v52 = vunpack.c.h.bf16 %v2467_v31 }
  0x91   : > { %v1796_v4 = vpop.eup %1795  ;;  %v1001_v45 = vunpack.c.l.b16 %v932_v62  ;;  %v629_v6 = vand.u32 2147483648, %v2487_v54  ;;  %1805 = vpow2.f32 %v1496_v58  ;;  %v615_v29 = vor.u32 1.1754944e-38, %v614_v61 }
  0x92   : > { %v604_v5 = vmul.f32 %v1796_v4, %v2475_v38  ;;  %v1798_v7 = vpop.eup %1797  ;;  %vm623_vm1 = vweird.f32 %v2487_v54  ;;  %v762_v8 = vand.u32 2147483647, %v2495_v59  ;;  %1807 = vrcp.f32 %v2498_v3  ;;  %v2553_v38 = vld [vmem:[%s1969_s8 + $0x78] sm:$0xff]  }
  0x93   : > { %v1018_v9 = vpack.c.b16 %v1001_v45, %v1000_v0  ;;  %vm609_vm8 = vweird.f32 %v1796_v4  ;;  %vm2512_vm2 = vcmp.eq.f32.partialorder %v627_v1, 8.507059e+37  ;;  %v764_v28 = vand.u32 2147483648, %v2495_v59 }
  0x94   : > { %v1800_v37 = vpop.eup %1799  ;;  %v605_v10 = vsub.f32 1.0, %v604_v5  ;;  %v777_v44 = vand.u32 2147483647, %v2498_v3  ;;  %v779_v14 = vand.u32 2147483648, %v2498_v3  ;;  %v630_v17 = vor.u32 1.1754944e-38, %v629_v6  ;;  %vm2526_vm5 = vmor %vm608_vm15, %vm609_vm8 }
  0x95   : > { %v1802_v12 = vpop.eup %1801  ;;  %v619_v13 = vmul.f32 %v1800_v37, %v2487_v54  ;;  %1528 = vmatmul.msk.bf16.gmra.mxu3 %vm1020_vm7, %v1018_v9  ;;  %vm758_vm3 = vweird.f32 %v2495_v59  ;;  %v2522_v15 = vadd.f32 1.0, %v1798_v7  ;;  %vm624_vm10 = vweird.f32 %v1800_v37 }
  0x96   : > { %v606_v16 = vmul.f32 %v1796_v4, %v605_v10  ;;  %v1804_v18 = vpop.eup %1803  ;;  %vm2530_vm4 = vcmp.eq.f32.partialorder %v762_v8, 8.507059e+37  ;;  %vm773_vm6 = vweird.f32 %v2498_v3  ;;  %v2536_v26 = vadd.f32 1.0, %v1802_v12  ;;  %vm2547_vm9 = vmor %vm623_vm1, %vm624_vm10 }
  0x97   : > { %v620_v20 = vsub.f32 1.0, %v619_v13  ;;  %v1806_v21 = vpop.eup %1805  ;;  %v754_v23 = vmul.f32 %v1804_v18, %v2495_v59  ;;  %1809 = vrcp.f32 %v2522_v15  ;;  %v765_v31 = vor.u32 1.1754944e-38, %v764_v28 }
  0x98   : > { %v607_v22 = vadd.f32 %v1796_v4, %v606_v16  ;;  %v1808_v27 = vpop.eup %1807  ;;  %vm2539_vm12 = vcmp.eq.f32.partialorder %v777_v44, 8.507059e+37  ;;  %v780_v33 = vor.u32 1.1754944e-38, %v779_v14  ;;  %vm759_vm11 = vweird.f32 %v1804_v18 }
  0x99   : > { %v621_v30 = vmul.f32 %v1800_v37, %v620_v20  ;;  %v755_v35 = vsub.f32 1.0, %v754_v23  ;;  %v769_v36 = vmul.f32 %v1808_v27, %v2498_v3  ;;  %vm774_vm13 = vweird.f32 %v1808_v27  ;;  %vm2562_vm14 = vmor %vm758_vm3, %vm759_vm11 }
  0x9a   : > { %v611_v24 = vsel %vm2526_vm5, %v1796_v4, %v607_v22  ;;  %v1497_v46 = vmul.f32 -1.442695, %v1595_v52  ;;  %1811 = vrcp.f32 %v2536_v26  ;;  %v522_v53 = vand.u32 2147483647, %v2522_v15  ;;  %vm2576_vm15 = vmor %vm773_vm6, %vm774_vm13 }
  0x9b   : > { %v616_v39 = vsel %vm2501_vm0, %v615_v29, %v611_v24  ;;  %v622_v40 = vadd.f32 %v1800_v37, %v621_v30  ;;  %v756_v48 = vmul.f32 %v1804_v18, %v755_v35  ;;  %v770_v42 = vsub.f32 1.0, %v769_v36 }
  0x9c   : > { %v915_v47 = vpack.c.bf16 %v616_v39, %v616_v39  ;;  %v2567_v43 = vadd.f32 1.0, %v1806_v21  ;;  %v1626_v54 = vunpack.c.l.bf16 %v2553_v38  ;;  %v524_v41 = vand.u32 2147483648, %v2522_v15 }
  0x9d   : > { %v626_v50 = vsel %vm2547_vm9, %v1800_v37, %v622_v40  ;;  %v1810_v55 = vpop.eup %1809  ;;  %v757_v49 = vadd.f32 %v1804_v18, %v756_v48  ;;  %v771_v57 = vmul.f32 %v1808_v27, %v770_v42  ;;  %vm518_vm0 = vweird.f32 %v2522_v15 }
  0x9e   : > { %v631_v56 = vsel %vm2512_vm2, %v630_v17, %v626_v50  ;;  %v984_v58 = vunpack.c.l.b16 %v915_v47  ;;  %v514_v61 = vmul.f32 %v1810_v55, %v2522_v15  ;;  %vm519_vm1 = vweird.f32 %v1810_v55 }
  0x9f   : > { %v916_v25 = vpack.c.bf16 %v631_v56, %v631_v56  ;;  %v761_v59 = vsel %vm2562_vm14, %v1804_v18, %v757_v49  ;;  %v772_v62 = vadd.f32 %v1808_v27, %v771_v57  ;;  %1813 = vpow2.f32 %v1497_v46  ;;  %vm2599_vm2 = vmor %vm518_vm0, %vm519_vm1 }
  0xa0   : > { %v766_v1 = vsel %vm2530_vm4, %v765_v31, %v761_v59  ;;  %v515_v4 = vsub.f32 1.0, %v514_v61  ;;  %1815 = vrcp.f32 %v2567_v43  ;;  %v1812_v3 = vpop.eup %1811  ;;  %vm2589_vm8 = vcmp.eq.f32.partialorder %v522_v53, 8.507059e+37 }
  0xa1   : > { %v985_v0 = vunpack.c.l.b16 %v916_v25  ;;  %v776_v2 = vsel %vm2576_vm15, %v1808_v27, %v772_v62  ;;  %v925_v52 = vpack.c.bf16 %v766_v1, %v766_v1  ;;  %v525_v5 = vor.u32 1.1754944e-38, %v524_v41 }
  0xa2   : > { %v781_v7 = vsel %vm2539_vm12, %v780_v33, %v776_v2  ;;  %v516_v29 = vmul.f32 %v1810_v55, %v515_v4  ;;  %v529_v8 = vmul.f32 %v1812_v3, %v2536_v26  ;;  %vm533_vm3 = vweird.f32 %v2536_v26 }
  0xa3   : > { %v1010_v6 = vpack.c.b16 %v985_v0, %v984_v58  ;;  %v926_v37 = vpack.c.bf16 %v781_v7, %v781_v7  ;;  %v994_v9 = vunpack.c.l.b16 %v925_v52  ;;  %v539_v11 = vand.u32 2147483648, %v2536_v26  ;;  %v2636_v0 = vld [vmem:[%s2855_s2] ss:$0 sm:$0xff] }
  0xa4   : > { %v517_v12 = vadd.f32 %v1810_v55, %v516_v29  ;;  %v530_v13 = vsub.f32 1.0, %v529_v8  ;;  %vm534_vm5 = vweird.f32 %v1812_v3  ;;  %v537_v28 = vand.u32 2147483647, %v2536_v26 }
  0xa5   : > { %1520 = vmatmul.msk.bf16.gmra.mxu1 %vm1020_vm7, %v1010_v6  ;;  %v1814_v44 = vpop.eup %1813  ;;  %v995_v14 = vunpack.c.l.b16 %v926_v37  ;;  %v1512_v16 = vmul.f32 -1.442695, %v1626_v54  ;;  %v1627_v20 = vunpack.c.h.bf16 %v2553_v38  ;;  %vm2614_vm10 = vmor %vm533_vm3, %vm534_vm5  ;;  %v540_v23 = vor.u32 1.1754944e-38, %v539_v11 }
  0xa6   : > { %v1816_v17 = vpop.eup %1815  ;;  %v521_v15 = vsel %vm2599_vm2, %v1810_v55, %v517_v12  ;;  %v531_v18 = vmul.f32 %v1812_v3, %v530_v13  ;;  %v406_v19 = vadd.f32 1.0, %v1814_v44  ;;  %vm538_vm4 = vcmp.eq.f32.partialorder %v537_v28, 8.507059e+37 }
  0xa7   : > { %v1015_v63 = vpack.c.b16 %v995_v14, %v994_v9  ;;  %v526_v21 = vsel %vm2589_vm8, %v525_v5, %v521_v15  ;;  %v634_v27 = vmul.f32 %v1816_v17, %v2567_v43  ;;  %vm638_vm6 = vweird.f32 %v2567_v43 }
  0xa8   : > { %v532_v30 = vadd.f32 %v1812_v3, %v531_v18  ;;  %v909_v31 = vpack.c.bf16 %v526_v21, %v526_v21  ;;  %1817 = vrcp.f32 %v406_v19  ;;  %vm639_vm12 = vweird.f32 %v1816_v17 }
  0xa9   : > { %1525 = vmatmul.msk.bf16.gmra.mxu2 %vm1020_vm7, %v1015_v63  ;;  %v635_v32 = vsub.f32 1.0, %v634_v27  ;;  %1819 = vpow2.f32 %v1512_v16  ;;  %v644_v33 = vand.u32 2147483648, %v2567_v43  ;;  %v1513_v24 = vmul.f32 -1.442695, %v1627_v20  ;;  %vm2625_vm9 = vmor %vm638_vm6, %vm639_vm12 }
  0xaa   : > { %v536_v26 = vsel %vm2614_vm10, %v1812_v3, %v532_v30  ;;  %v642_v36 = vand.u32 2147483647, %v2567_v43  ;;  %v978_v39 = vunpack.c.l.b16 %v909_v31  ;;  %v659_v55 = vand.u32 2147483648, %v406_v19 }
  0xab   : > { %v541_v34 = vsel %vm538_vm4, %v540_v23, %v536_v26  ;;  %v636_v35 = vmul.f32 %v1816_v17, %v635_v32  ;;  %1821 = vpow2.f32 %v1513_v24  ;;  %v645_v42 = vor.u32 1.1754944e-38, %v644_v33 }
  0xac   : > { %v910_v38 = vpack.c.bf16 %v541_v34, %v541_v34  ;;  %vm643_vm11 = vcmp.eq.f32.partialorder %v642_v36, 8.507059e+37  ;;  %vm653_vm13 = vweird.f32 %v406_v19  ;;  %v657_v49 = vand.u32 2147483647, %v406_v19 }
  0xad   : > { %v637_v46 = vadd.f32 %v1816_v17, %v636_v35  ;;  %v660_v60 = vor.u32 1.1754944e-38, %v659_v55  ;;  %vm1162_vm8 = vcmask 15360  }
  0xae   : > { %v1818_v47 = vpop.eup %1817  ;;  %v979_v48 = vunpack.c.l.b16 %v910_v38  ;;  %vm658_vm0 = vcmp.eq.f32.partialorder %v657_v49, 8.507059e+37 }
  0xaf   : > { %v1820_v50 = vpop.eup %1819  ;;  %v641_v51 = vsel %vm2625_vm9, %v1816_v17, %v637_v46  ;;  %v649_v53 = vmul.f32 %v1818_v47, %v406_v19  ;;  %vm654_vm14 = vweird.f32 %v1818_v47 }
  0xb0   : > { %v1007_v54 = vpack.c.b16 %v979_v48, %v978_v39  ;;  %v421_v43 = vadd.f32 1.0, %v1820_v50  ;;  %v646_v41 = vsel %vm643_vm11, %v645_v42, %v641_v51  ;;  %vm655_vm15 = vmor %vm653_vm13, %vm654_vm14 }
  0xb1   : > { %v650_v56 = vsub.f32 1.0, %v649_v53  ;;  %v1822_v57 = vpop.eup %1821  ;;  %v917_v59 = vpack.c.bf16 %v646_v41, %v646_v41 }
  0xb2   : > { %1517 = vmatmul.msk.bf16.gmra.mxu0 %vm1020_vm7, %v1007_v54  ;;  %1823 = vrcp.f32 %v421_v43  ;;  %v422_v58 = vadd.f32 1.0, %v1822_v57  ;;  %v884_v45 = vand.u32 2147483648, %v421_v43  ;;  %vm878_vm1 = vweird.f32 %v421_v43 }
  0xb3   : > { %v651_v25 = vmul.f32 %v1818_v47, %v650_v56  ;;  %v986_v2 = vunpack.c.l.b16 %v917_v59  ;;  %v882_v5 = vand.u32 2147483647, %v421_v43 }
  0xb4   : > { %1825 = vrcp.f32 %v422_v58  ;;  %v885_v12 = vor.u32 1.1754944e-38, %v884_v45  ;;  %v899_v13 = vand.u32 2147483648, %v422_v58  ;;  %vm893_vm5 = vweird.f32 %v422_v58 }
  0xb5   : > { %v652_v61 = vadd.f32 %v1818_v47, %v651_v25  ;;  %v897_v44 = vand.u32 2147483647, %v422_v58  ;;  %vm883_vm4 = vcmp.eq.f32.partialorder %v882_v5, 8.507059e+37 }
  0xb6   : > { %v900_v15 = vor.u32 1.1754944e-38, %v899_v13 }
  0xb7   : > { %v656_v62 = vsel %vm655_vm15, %v1818_v47, %v652_v61  ;;  %vm898_vm12 = vcmp.eq.f32.partialorder %v897_v44, 8.507059e+37 }
  0xb8   : > { %v1824_v1 = vpop.eup %1823  ;;  %v661_v4 = vsel %vm658_vm0, %v660_v60, %v656_v62 }
  0xb9   : > { %v918_v3 = vpack.c.bf16 %v661_v4, %v661_v4  ;;  %v874_v52 = vmul.f32 %v1824_v1, %v421_v43  ;;  %vm879_vm2 = vweird.f32 %v1824_v1 }
  0xba   : > { %v1826_v7 = vpop.eup %1825  ;;  %vm880_vm3 = vmor %vm878_vm1, %vm879_vm2 }
  0xbb   : > { %v1082_v6 = vpop.f32.mrf.mxu0  ;;  %v987_v29 = vunpack.c.l.b16 %v918_v3  ;;  %v875_v8 = vsub.f32 1.0, %v874_v52  ;;  %v889_v9 = vmul.f32 %v1826_v7, %v422_v58  ;;  %vm894_vm10 = vweird.f32 %v1826_v7 }
  0xbc   : > { %v1083_v37 = vadd.f32 %v2636_v0, %v1082_v6  ;;  %vm895_vm6 = vmor %vm893_vm5, %vm894_vm10 }
  0xbd   : > { %v1011_v10 = vpack.c.b16 %v987_v29, %v986_v2  ;;  %v876_v11 = vmul.f32 %v1824_v1, %v875_v8  ;;  %v890_v28 = vsub.f32 1.0, %v889_v9 }
  0xbe   : > { %1163 = vst.msk [vmem:[%s2641_s17] sm:$0xff] %vm1162_vm8, %v1083_v37  ;;  %1227 = vrot.lane.b32.xlu0 %v1083_v37, %s1902_s20 }
  0xbf   : > { %1521 = vmatmul.msk.bf16.gmra.mxu1 %vm1020_vm7, %v1011_v10  ;;  %v877_v14 = vadd.f32 %v1824_v1, %v876_v11  ;;  %v891_v16 = vmul.f32 %v1826_v7, %v890_v28 }
  0xc1   : > { %v881_v17 = vsel %vm880_vm3, %v1824_v1, %v877_v14  ;;  %v892_v19 = vadd.f32 %v1826_v7, %v891_v16 }
  0xc2   : > { %v886_v18 = vsel %vm883_vm4, %v885_v12, %v881_v17 }
  0xc3   : > { %v1084_v20 = vpop.f32.mrf.mxu0  ;;  %v933_v63 = vpack.c.bf16 %v886_v18, %v886_v18  ;;  %v896_v22 = vsel %vm895_vm6, %v1826_v7, %v892_v19 }
  0xc4   : > { %v1085_v21 = vadd.f32 %v2636_v0, %v1084_v20  ;;  %v901_v27 = vsel %vm898_vm12, %v900_v15, %v896_v22 }
  0xc5   : > { %v1122_v23 = vpop.f32.mrf.mxu2  ;;  %v934_v31 = vpack.c.bf16 %v901_v27, %v901_v27  ;;  %v1002_v32 = vunpack.c.l.b16 %v933_v63 }
  0xc6   : > { %v1123_v30 = vadd.f32 %v2636_v0, %v1122_v23  ;;  %1164 = vst.msk [vmem:[%s2641_s17 + $0x8] sm:$0xff] %vm1162_vm8, %v1085_v21 }
  0xc7   : > { %v1003_v26 = vunpack.c.l.b16 %v934_v31 }
  0xc8   : > { %1179 = vst.msk [vmem:[%s2641_s17 + $0x100] sm:$0xff] %vm1162_vm8, %v1123_v30  ;;  %1259 = vrot.lane.b32.xlu1 %v1123_v30, %s1902_s20 }
  0xc9   : > { %v1142_v33 = vpop.f32.mrf.mxu3  ;;  %v1019_v34 = vpack.c.b16 %v1003_v26, %v1002_v32 }
  0xca   : > { %v1143_v24 = vadd.f32 %v2636_v0, %v1142_v33 }
  0xcb   : > { %1529 = vmatmul.msk.bf16.gmra.mxu3 %vm1020_vm7, %v1019_v34 }
  0xcc   : > { %1187 = vst.msk [vmem:[%s2641_s17 + $0x180] sm:$0xff] %vm1162_vm8, %v1143_v24  ;;  %1275 = vrot.lane.b32.xlu0 %v1143_v24, %s1902_s20 }
  0xcd   : > { %v1124_v35 = vpop.f32.mrf.mxu2 }
  0xce   : > { %v1125_v36 = vadd.f32 %v2636_v0, %v1124_v35 }
  0xd0   : > { %1180 = vst.msk [vmem:[%s2641_s17 + $0x108] sm:$0xff] %vm1162_vm8, %v1125_v36 }
  0xd1   : > { %v1144_v38 = vpop.f32.mrf.mxu3 }
  0xd2   : > { %v1102_v39 = vpop.f32.mrf.mxu1  ;;  %v1145_v40 = vadd.f32 %v2636_v0, %v1144_v38 }
  0xd3   : > { %v1103_v46 = vadd.f32 %v2636_v0, %v1102_v39 }
  0xd4   : > { %1188 = vst.msk [vmem:[%s2641_s17 + $0x188] sm:$0xff] %vm1162_vm8, %v1145_v40  ;;  %1277 = vrot.lane.b32.xlu1 %v1145_v40, %s1902_s20  ;;  %1229 = vrot.lane.b32.xlu0 %v1085_v21, %s1902_s20 }
  0xd5   : > { %1171 = vst.msk [vmem:[%s2641_s17 + $0x80] sm:$0xff] %vm1162_vm8, %v1103_v46  ;;  %1243 = vrot.lane.b32.xlu2 %v1103_v46, %s1902_s20 }
  0xd9   : > { %v1087_v47 = vpop.f32.mrf.mxu0 }
  0xda   : > { %v1104_v48 = vpop.f32.mrf.mxu1  ;;  %v1088_v42 = vadd.f32 %v2636_v0, %v1087_v47 }
  0xdb   : > { %v1105_v50 = vadd.f32 %v2636_v0, %v1104_v48 }
  0xdc   : > { %1165 = vst.msk [vmem:[%s2641_s17 + $0x10] sm:$0xff] %vm1162_vm8, %v1088_v42  ;;  %1231 = vrot.lane.b32.xlu1 %v1088_v42, %s1902_s20 }
  0xdd   : > { %1172 = vst.msk [vmem:[%s2641_s17 + $0x88] sm:$0xff] %vm1162_vm8, %v1105_v50  ;;  %1261 = vrot.lane.b32.xlu2 %v1125_v36, %s1902_s20  ;;  %1245 = vrot.lane.b32.xlu0 %v1105_v50, %s1902_s20 }
  0xe1   : > { %v1089_v51 = vpop.f32.mrf.mxu0 }
  0xe2   : > { %v1090_v53 = vadd.f32 %v2636_v0, %v1089_v51 }
  0xe4   : > { %1166 = vst.msk [vmem:[%s2641_s17 + $0x18] sm:$0xff] %vm1162_vm8, %v1090_v53 }
  0xea   : > { %v1147_v54 = vpop.f32.mrf.mxu3 }
  0xeb   : > { %v1148_v55 = vadd.f32 %v2636_v0, %v1147_v54 }
  0xec   : > { %v1107_v43 = vpop.f32.mrf.mxu1 }
  0xed   : > { %v1108_v56 = vadd.f32 %v2636_v0, %v1107_v43  ;;  %1189 = vst.msk [vmem:[%s2641_s17 + $0x190] sm:$0xff] %vm1162_vm8, %v1148_v55  ;;  %1279 = vrot.lane.b32.xlu2 %v1148_v55, %s1902_s20 }
  0xef   : > { %1173 = vst.msk [vmem:[%s2641_s17 + $0x90] sm:$0xff] %vm1162_vm8, %v1108_v56  ;;  %1247 = vrot.lane.b32.xlu1 %v1108_v56, %s1902_s20 }
  0xf2   : > { %v1149_v49 = vpop.f32.mrf.mxu3 }
  0xf3   : > { %v1150_v57 = vadd.f32 %v2636_v0, %v1149_v49 }
  0xf4   : > { %v1109_v41 = vpop.f32.mrf.mxu1 }
  0xf5   : > { %v1110_v25 = vadd.f32 %v2636_v0, %v1109_v41  ;;  %1190 = vst.msk [vmem:[%s2641_s17 + $0x198] sm:$0xff] %vm1162_vm8, %v1150_v57 }
  0xf7   : > { %1174 = vst.msk [vmem:[%s2641_s17 + $0x98] sm:$0xff] %vm1162_vm8, %v1110_v25  ;;  %1249 = vrot.lane.b32.xlu2 %v1110_v25, %s1902_s20  ;;  %1233 = vrot.lane.b32.xlu1 %v1090_v53, %s1902_s20 }
 0x100   : > { %v1127_v58 = vpop.f32.mrf.mxu2  ;;  %v1092_v60 = vpop.f32.mrf.mxu0 }
 0x101   : > { %v1128_v61 = vadd.f32 %v2636_v0, %v1127_v58  ;;  %v1093_v59 = vadd.f32 %v2636_v0, %v1092_v60 }
 0x103   : > { %1181 = vst.msk [vmem:[%s2641_s17 + $0x110] sm:$0xff] %vm1162_vm8, %v1128_v61  ;;  %1263 = vrot.lane.b32.xlu0 %v1128_v61, %s1902_s20  ;;  %1235 = vrot.lane.b32.xlu2 %v1093_v59, %s1902_s20 }
 0x104   : > { %1167 = vst.msk [vmem:[%s2641_s17 + $0x40] sm:$0xff] %vm1162_vm8, %v1093_v59 }
 0x108   : > { %v1129_v62 = vpop.f32.mrf.mxu2  ;;  %v1094_v1 = vpop.f32.mrf.mxu0 }
 0x109   : > { %v1130_v4 = vadd.f32 %v2636_v0, %v1129_v62  ;;  %v1095_v3 = vadd.f32 %v2636_v0, %v1094_v1 }
 0x10b   : > { %1182 = vst.msk [vmem:[%s2641_s17 + $0x118] sm:$0xff] %vm1162_vm8, %v1130_v4  ;;  %1281 = vrot.lane.b32.xlu0 %v1150_v57, %s1902_s20  ;;  %1265 = vrot.lane.b32.xlu1 %v1130_v4, %s1902_s20 }
 0x10c   : > { %1168 = vst.msk [vmem:[%s2641_s17 + $0x48] sm:$0xff] %vm1162_vm8, %v1095_v3 }
 0x110   : > { %v1132_v2 = vpop.f32.mrf.mxu2 }
 0x111   : > { %v1133_v52 = vadd.f32 %v2636_v0, %v1132_v2 }
 0x113   : > { %1183 = vst.msk [vmem:[%s2641_s17 + $0x140] sm:$0xff] %vm1162_vm8, %v1133_v52  ;;  %1267 = vrot.lane.b32.xlu2 %v1133_v52, %s1902_s20 }
 0x118   : > { %v1134_v45 = vpop.f32.mrf.mxu2  ;;  %v1152_v5 = vpop.f32.mrf.mxu3 }
 0x119   : > { %v1135_v6 = vadd.f32 %v2636_v0, %v1134_v45  ;;  %v1153_v7 = vadd.f32 %v2636_v0, %v1152_v5 }
 0x11b   : > { %1184 = vst.msk [vmem:[%s2641_s17 + $0x148] sm:$0xff] %vm1162_vm8, %v1135_v6  ;;  %1237 = vrot.lane.b32.xlu2 %v1095_v3, %s1902_s20  ;;  %1283 = vrot.lane.b32.xlu1 %v1153_v7, %s1902_s20 }
 0x11c   : > { %1191 = vst.msk [vmem:[%s2641_s17 + $0x1c0] sm:$0xff] %vm1162_vm8, %v1153_v7 }
 0x120   : > { %v1154_v29 = vpop.f32.mrf.mxu3 }
 0x121   : > { %v1155_v37 = vadd.f32 %v2636_v0, %v1154_v29 }
 0x122   : > { %v1112_v8 = vpop.f32.mrf.mxu1 }
 0x123   : > { %v1113_v9 = vadd.f32 %v2636_v0, %v1112_v8  ;;  %1192 = vst.msk [vmem:[%s2641_s17 + $0x1c8] sm:$0xff] %vm1162_vm8, %v1155_v37 }
 0x125   : > { %1175 = vst.msk [vmem:[%s2641_s17 + $0xc0] sm:$0xff] %vm1162_vm8, %v1113_v9  ;;  %1251 = vrot.lane.b32.xlu0 %v1113_v9, %s1902_s20 }
 0x12a   : > { %v1114_v10 = vpop.f32.mrf.mxu1 }
 0x12b   : > { %v1115_v11 = vadd.f32 %v2636_v0, %v1114_v10 }
 0x12c   : > { %v1137_v12 = vpop.f32.mrf.mxu2 }
 0x12d   : > { %1176 = vst.msk [vmem:[%s2641_s17 + $0xc8] sm:$0xff] %vm1162_vm8, %v1115_v11  ;;  %1269 = vrot.lane.b32.xlu0 %v1135_v6, %s1902_s20  ;;  %1253 = vrot.lane.b32.xlu1 %v1115_v11, %s1902_s20  ;;  %v1138_v13 = vadd.f32 %v2636_v0, %v1137_v12 }
 0x12f   : > { %v1097_v28 = vpop.f32.mrf.mxu0  ;;  %1185 = vst.msk [vmem:[%s2641_s17 + $0x150] sm:$0xff] %vm1162_vm8, %v1138_v13  ;;  %v1244_v18 = vpop.permute.xlu2 %1243 }
 0x130   : > { %v1098_v44 = vadd.f32 %v2636_v0, %v1097_v28  ;;  %v1228_v19 = vpop.permute.xlu0 %1227  ;;  %1538 = vst.msk [vmem:[%s2641_s17 + $0xa0] sm:$0xff] %vm1162_vm8, %v1244_v18 }
 0x131   : > { %1530 = vst.msk [vmem:[%s2641_s17 + $0x20] sm:$0xff] %vm1162_vm8, %v1228_v19 }
 0x132   : > { %1169 = vst.msk [vmem:[%s2641_s17 + $0x50] sm:$0xff] %vm1162_vm8, %v1098_v44 }
 0x134   : > { %v1139_v14 = vpop.f32.mrf.mxu2 }
 0x135   : > { %1239 = vrot.lane.b32.xlu0 %v1098_v44, %s1902_s20  ;;  %1271 = vrot.lane.b32.xlu1 %v1138_v13, %s1902_s20  ;;  %v1140_v16 = vadd.f32 %v2636_v0, %v1139_v14 }
 0x137   : > { %v1099_v17 = vpop.f32.mrf.mxu0  ;;  %1186 = vst.msk [vmem:[%s2641_s17 + $0x158] sm:$0xff] %vm1162_vm8, %v1140_v16  ;;  %v1262_v22 = vpop.permute.xlu2 %1261 }
 0x138   : > { %v1100_v15 = vadd.f32 %v2636_v0, %v1099_v17  ;;  %1547 = vst.msk [vmem:[%s2641_s17 + $0x128] sm:$0xff] %vm1162_vm8, %v1262_v22 }
 0x13a   : > { %1170 = vst.msk [vmem:[%s2641_s17 + $0x58] sm:$0xff] %vm1162_vm8, %v1100_v15  ;;  %v1260_v20 = vpop.permute.xlu1 %1259 }
 0x13b   : > { %1546 = vst.msk [vmem:[%s2641_s17 + $0x120] sm:$0xff] %vm1162_vm8, %v1260_v20 }
 0x13c   : > { %v1117_v63 = vpop.f32.mrf.mxu1 }
 0x13d   : > { %1241 = vrot.lane.b32.xlu1 %v1100_v15, %s1902_s20  ;;  %v1118_v21 = vadd.f32 %v2636_v0, %v1117_v63 }
 0x13e   : > { %v1276_v23 = vpop.permute.xlu0 %1275 }
 0x13f   : > { %1177 = vst.msk [vmem:[%s2641_s17 + $0xd0] sm:$0xff] %vm1162_vm8, %v1118_v21  ;;  %1255 = vrot.lane.b32.xlu2 %v1118_v21, %s1902_s20 }
 0x140   : > { %1554 = vst.msk [vmem:[%s2641_s17 + $0x1a0] sm:$0xff] %vm1162_vm8, %v1276_v23 }
 0x144   : > { %v1119_v27 = vpop.f32.mrf.mxu1 }
 0x145   : > { %v1120_v30 = vadd.f32 %v2636_v0, %v1119_v27 }
 0x146   : > { %v1278_v31 = vpop.permute.xlu1 %1277  ;;  %v1230_v26 = vpop.permute.xlu0 %1229 }
 0x147   : > { %1555 = vst.msk [vmem:[%s2641_s17 + $0x1a8] sm:$0xff] %vm1162_vm8, %v1278_v31  ;;  %1273 = vrot.lane.b32.xlu2 %v1140_v16, %s1902_s20  ;;  %1257 = vrot.lane.b32.xlu0 %v1120_v30, %s1902_s20  ;;  %v1280_v32 = vpop.permute.xlu2 %1279 }
 0x148   : > { %1178 = vst.msk [vmem:[%s2641_s17 + $0xd8] sm:$0xff] %vm1162_vm8, %v1120_v30 }
 0x149   : > { %1556 = vst.msk [vmem:[%s2641_s17 + $0x1b0] sm:$0xff] %vm1162_vm8, %v1280_v32 }
 0x14a   : > { %1531 = vst.msk [vmem:[%s2641_s17 + $0x28] sm:$0xff] %vm1162_vm8, %v1230_v26 }
 0x14e   : > { %v1232_v33 = vpop.permute.xlu1 %1231  ;;  %v1157_v24 = vpop.f32.mrf.mxu3 }
 0x14f   : > { %1532 = vst.msk [vmem:[%s2641_s17 + $0x30] sm:$0xff] %vm1162_vm8, %v1232_v33  ;;  %1285 = vrot.lane.b32.xlu2 %v1155_v37, %s1902_s20  ;;  %v1158_v34 = vadd.f32 %v2636_v0, %v1157_v24  ;;  %v1246_v36 = vpop.permute.xlu0 %1245 }
 0x150   : > { %1539 = vst.msk [vmem:[%s2641_s17 + $0xa8] sm:$0xff] %vm1162_vm8, %v1246_v36 }
 0x151   : > { %1193 = vst.msk [vmem:[%s2641_s17 + $0x1d0] sm:$0xff] %vm1162_vm8, %v1158_v34  ;;  %1287 = vrot.lane.b32.xlu0 %v1158_v34, %s1902_s20  ;;  %v1250_v35 = vpop.permute.xlu2 %1249 }
 0x152   : > { %1541 = vst.msk [vmem:[%s2641_s17 + $0xb8] sm:$0xff] %vm1162_vm8, %v1250_v35 }
 0x156   : > { %v1159_v38 = vpop.f32.mrf.mxu3 }
 0x157   : > { %v1160_v39 = vadd.f32 %v2636_v0, %v1159_v38 }
 0x159   : > { %1194 = vst.msk [vmem:[%s2641_s17 + $0x1d8] sm:$0xff] %vm1162_vm8, %v1160_v39  ;;  %1289 = vrot.lane.b32.xlu1 %v1160_v39, %s1902_s20 }
 0x15d   : > { %v1236_v40 = vpop.permute.xlu2 %1235 }
 0x15e   : > { %1534 = vst.msk [vmem:[%s2641_s17 + $0x60] sm:$0xff] %vm1162_vm8, %v1236_v40 }
 0x161   : > { %v1248_v46 = vpop.permute.xlu1 %1247 }
 0x162   : > { %1540 = vst.msk [vmem:[%s2641_s17 + $0xb0] sm:$0xff] %vm1162_vm8, %v1248_v46 }
 0x169   : > { %v1234_v42 = vpop.permute.xlu1 %1233 }
 0x16a   : > { %1533 = vst.msk [vmem:[%s2641_s17 + $0x38] sm:$0xff] %vm1162_vm8, %v1234_v42 }
 0x16d   : > { %v1268_v47 = vpop.permute.xlu2 %1267 }
 0x16e   : > { %1550 = vst.msk [vmem:[%s2641_s17 + $0x160] sm:$0xff] %vm1162_vm8, %v1268_v47 }
 0x175   : > { %v1238_v48 = vpop.permute.xlu2 %1237  ;;  %v1264_v0 = vpop.permute.xlu0 %1263 }
 0x176   : > { %1535 = vst.msk [vmem:[%s2641_s17 + $0x68] sm:$0xff] %vm1162_vm8, %v1238_v48 }
 0x177   : > { %1548 = vst.msk [vmem:[%s2641_s17 + $0x130] sm:$0xff] %vm1162_vm8, %v1264_v0 }
 0x17d   : > { %v1282_v50 = vpop.permute.xlu0 %1281  ;;  %v1266_v51 = vpop.permute.xlu1 %1265 }
 0x17e   : > { %1557 = vst.msk [vmem:[%s2641_s17 + $0x1b8] sm:$0xff] %vm1162_vm8, %v1282_v50 }
 0x17f   : > { %1549 = vst.msk [vmem:[%s2641_s17 + $0x138] sm:$0xff] %vm1162_vm8, %v1266_v51 }
 0x18d   : > { %v1284_v53 = vpop.permute.xlu1 %1283 }
 0x18e   : > { %1558 = vst.msk [vmem:[%s2641_s17 + $0x1e0] sm:$0xff] %vm1162_vm8, %v1284_v53 }
 0x197   : > { %v1252_v54 = vpop.permute.xlu0 %1251 }
 0x198   : > { %1542 = vst.msk [vmem:[%s2641_s17 + $0xe0] sm:$0xff] %vm1162_vm8, %v1252_v54 }
 0x199   : > { %v1256_v55 = vpop.permute.xlu2 %1255 }
 0x19a   : > { %1544 = vst.msk [vmem:[%s2641_s17 + $0xf0] sm:$0xff] %vm1162_vm8, %v1256_v55 }
 0x19f   : > { %v1270_v43 = vpop.permute.xlu0 %1269  ;;  %v1254_v56 = vpop.permute.xlu1 %1253 }
 0x1a0   : > { %1551 = vst.msk [vmem:[%s2641_s17 + $0x168] sm:$0xff] %vm1162_vm8, %v1270_v43 }
 0x1a1   : > { %1543 = vst.msk [vmem:[%s2641_s17 + $0xe8] sm:$0xff] %vm1162_vm8, %v1254_v56  ;;  %v1274_v49 = vpop.permute.xlu2 %1273 }
 0x1a2   : > { %1553 = vst.msk [vmem:[%s2641_s17 + $0x178] sm:$0xff] %vm1162_vm8, %v1274_v49 }
 0x1a7   : > { %v1240_v57 = vpop.permute.xlu0 %1239  ;;  %v1272_v41 = vpop.permute.xlu1 %1271 }
 0x1a8   : > { %1536 = vst.msk [vmem:[%s2641_s17 + $0x70] sm:$0xff] %vm1162_vm8, %v1240_v57 }
 0x1a9   : > { %1552 = vst.msk [vmem:[%s2641_s17 + $0x170] sm:$0xff] %vm1162_vm8, %v1272_v41  ;;  %v1286_v25 = vpop.permute.xlu2 %1285 }
 0x1aa   : > { %1559 = vst.msk [vmem:[%s2641_s17 + $0x1e8] sm:$0xff] %vm1162_vm8, %v1286_v25 }
 0x1af   : > { %v1242_v58 = vpop.permute.xlu1 %1241 }
 0x1b0   : > { %1537 = vst.msk [vmem:[%s2641_s17 + $0x78] sm:$0xff] %vm1162_vm8, %v1242_v58 }
 0x1b9   : > { %v1258_v60 = vpop.permute.xlu0 %1257 }
 0x1ba   : > { %1545 = vst.msk [vmem:[%s2641_s17 + $0xf8] sm:$0xff] %vm1162_vm8, %v1258_v60 }
 0x1c3   : > { %v1288_v61 = vpop.permute.xlu0 %1287 }
 0x1c4   : > { %1560 = vst.msk [vmem:[%s2641_s17 + $0x1f0] sm:$0xff] %vm1162_vm8, %v1288_v61 }
 0x1cb   : > { %v1290_v59 = vpop.permute.xlu1 %1289 }
 0x1cc   : > { %1561 = vst.msk [vmem:[%s2641_s17 + $0x1f8] sm:$0xff] %vm1162_vm8, %v1290_v59 }
 0x1cd PF: > { %s14_s16 = sadd.s32 1, %s1899_s16   ;;  %s2965_s12 = smov %s1891_s14 }
 0x1ce   : > { %p11_p10 = scmp.ge.s32.totalorder %s14_s16, 10   ;;  %s2966_s13 = smov %s1895_s15 }
 0x1cf   : > { %s2967_s14 = smov %s2970_s18  ;;  %s2968_s15 = smov %s2974_s19 }
 0x1d0   :  { %13 = sbr.rel (!%p11_p10) target bundleno = 3 (0x3), region = 68 }
 0x1d5   :  { %1388 = vsyncpa [#allocation3], 1 }
 0x1d6   :  { %1390 = vsyncpa [#allocation3 + $0x1], 1 }

// kernel: a_call__.4
= control target key start
LH: loop header
LB: loop body
LE: loop exit
PB: predicated region body
PF: predicated region fallthrough
CT: control target
= control target key end

     0   :  { %8 = vsyncpa [#allocation3], 0  ;;  %s4842_s0 = inlined_call_operand.vmem [shape: bf16[2,32,32,16], index: 0, kind: input, shape index: {}]   ;;  %s4843_s1 = inlined_call_operand.hbm [shape: bf16[144,8], index: 1, kind: input, shape index: {}]   ;;  %s4844_s2 = inlined_call_operand.hbm [shape: f32[1,8], index: 2, kind: input, shape index: {}]   ;;  %s4845_s3 = inlined_call_operand.vmem [shape: bf16[2,32,32,8], index: 3, kind: output, shape index: {}]  }
   0x1   :  { %9 = vsyncpa [#allocation5], 0  ;;  %s3169_s12 = smov 0   ;;  %s3171_s13 = smov 0  }
   0x2   :  { %s3173_s14 = smov 0   ;;  %s3175_s15 = smov 0  }
   0x3   :  { %s3177_s16 = smov 0  }
   0x4 LB: > { %s2202_s17 = sadd.s32 4294967295, %s3136_s16   ;;  %s24_s18 = sadd.s32 1, %s3128_s14  ;;  %s3136_s16 = sphi %s3177_s16, %s15_s16   ;;  %s3132_s15 = sphi %s3175_s15, %s5071_s15   ;;  %s3128_s14 = sphi %s3173_s14, %s5070_s14   ;;  %s3124_s13 = sphi %s3171_s13, %s5069_s13   ;;  %s3120_s12 = sphi %s3169_s12, %s5068_s12  }
   0x5   : > { %p25_p0 = scmp.ge.s32.totalorder %s24_s18, 4  ;;  %s27_s19 = sadd.s32 1, %s3132_s15 }
   0x6   : > { %p2204_p1 = scmp.ge.s32.totalorder %s3136_s16, 1  ;;  %p128_p2 = scmp.lt.s32.totalorder %s3136_s16, 9 }
   0x7   : > { %s5073_s18 = smov (%p25_p0, %s24_s18), 0  ;;  %s5075_s19 = smov (!%p25_p0, %s27_s19), %s3132_s15 }
   0x8   : > { %p3202_p3 = pnand %p2204_p1, %p128_p2  ;;  %p29_p4 = scmp.ge.s32.totalorder %s5075_s19, 2 }
   0x9   : > { %p3206_p5 = scmp.eq.s32.totalorder %s2202_s17, 0  ;;  %s139_s24 = sshll.u32 %s4843_s1, 4  ;;  %s140_s24 = int_to_ptr.hbm [resolvable:$true] %s139_s24 }
   0xa   : > { %p2407_p6 = pneg %p3202_p3  ;;  %s5077_s19 = smov (%p29_p4, %s5075_s19), 0 }
   0xb   : > { %s3138_s25 = smov [#allocation2]   ;;  %s3139_s27 = smov 64  }
   0xc   : > { %s141_s26 = sshll.u32 %s3138_s25, 4  ;;  %p2408_p7 = pnand %p3206_p5, %p2407_p6  ;;  %s142_s26 = int_to_ptr.vmem [resolvable:$true] %s141_s26 }
   0xd   : > { %s3140_s28 = smov 4   ;;  %s154_s4 = sshll.u32 %s4844_s2, 4  ;;  %s155_s4 = int_to_ptr.hbm [resolvable:$true] %s154_s4 }
   0xe   : > { %2410 = dma.hbm_to_vmem [thread:$0]  (!%p2408_p7), %s140_s24, 1152, %s142_s26, [#allocation3], %s3139_s27, %s3139_s27, %s3140_s28  }
   0xf   : > { %s3141_s5 = smov [#allocation4]   ;;  %177 = sbr.rel (%p3202_p3) target bundleno = 604 (0x25c), region = 32 }
  0x10   : > { %s156_s6 = sshll.u32 %s3141_s5, 4  ;;  %s157_s6 = int_to_ptr.vmem [resolvable:$true] %s156_s6 }
  0x11   : > { %2413 = dma.hbm_to_vmem [thread:$0]  (!%p2408_p7), %s155_s4, 16, %s157_s6, [#allocation5]  }
  0x14   : > { %3111 = dma.done.wait (%p3206_p5), [#allocation3], 1152  }
  0x15   : > { %3113 = vsyncadd (%p3206_p5), [#allocation3], 4294966144 }
  0x16   : > { %3115 = dma.done.wait (%p3206_p5), [#allocation5], 16  }
  0x17   : > { %3117 = vsyncadd (%p3206_p5), [#allocation5], 4294967280  ;;  %p212_p8 = scmp.lt.s32.totalorder %s3124_s13, 1  ;;  %s2281_s7 = sshll.u32 %s3120_s12, 7  ;;  %vm381_vm0 = vcmask 1040384   ;;  %vm532_vm1 = vcmask 1046528  }
  0x18   : > { %s3244_s17 = sshll.u32 %s3120_s12, 3  ;;  %p325_p10 = scmp.gt.s32.totalorder %s3120_s12, 0  ;;  %vm701_vm3 = vcmask 1045504   ;;  %vm1422_vm4 = vcmask 130048   ;;  %vm1455_vm5 = vcmask 261120   ;;  %vm1488_vm6 = vcmask 392192  }
  0x19   : > { %s5079_s13 = smov (!%p212_p8, %s3124_s13), 1  ;;  %s2220_s21 = sadd.s32 4294967295, %s3244_s17  ;;  %vm1521_vm7 = vcmask 523264   ;;  %vm1554_vm9 = vcmask 654336   ;;  %vm1587_vm10 = vcmask 785408   ;;  %vm1620_vm11 = vcmask 916480  }
  0x1a   : > { %s2279_s8 = sshll.u32 %s5079_s13, 9  ;;  %p298_p9 = scmp.gt.s32.totalorder %s2220_s21, 0  ;;  %vm2051_vm12 = vcmask 60416  }
  0x1b   : > { %s3241_s11 = scalar_lea.vmem %s4842_s0, %s2279_s8  ;;  %s3142_s25 = smov 16  }
  0x1c   : > { %s3247_s20 = scalar_lea.vmem %s3241_s11, %s2281_s7  ;;  %s5081_s21 = smov (!%p298_p9, %s2220_s21), 0 }
  0x1d   : > { %v2376_v0 = vld [vmem:[%s3247_s20 + $0x20] sm:$0xff]   ;;  %v3251_v1 = vld [vmem:[%s3247_s20 + $0x28] sm:$0xff]   ;;  %v2374_v2 = vld [vmem:[%s3247_s20 + $0x10] sm:$0xff]   ;;  %s2282_s22 = sshll.u32 %s5081_s21, 4  ;;  %s3143_s26 = smov 32  }
  0x1e   : > { %v2311_v3 = vunpack.c.l.bf16 %v2376_v0  ;;  %v2312_v4 = vunpack.c.h.bf16 %v2376_v0  ;;  %v2315_v5 = vunpack.c.l.bf16 %v3251_v1  ;;  %v2303_v6 = vunpack.c.l.bf16 %v2374_v2  ;;  %v3256_v7 = vld [vmem:[%s3247_s20 + $0x18] sm:$0xff]   ;;  %v2294_v8 = vld [vmem:[%s3247_s20] sm:$0xff]   ;;  %v3260_v9 = vld [vmem:[%s3247_s20 + $0x8] sm:$0xff]   ;;  %s302_s23 = scalar_lea.vmem %s3241_s11, %s2282_s22  ;;  %s3144_s27 = smov 48  }
  0x1f   : > { %v2304_v10 = vunpack.c.h.bf16 %v2374_v2  ;;  %v2307_v11 = vunpack.c.l.bf16 %v3256_v7  ;;  %v2295_v12 = vunpack.c.l.bf16 %v2294_v8  ;;  %v2296_v13 = vunpack.c.h.bf16 %v2294_v8  ;;  %v2358_v38 = vld [vmem:[%s302_s23] sm:$0xff]   ;;  %s326_s24 = scalar_select %p325_p10, 1, 0  ;;  %v2388_v43 = vld [vmem:[%s302_s23 + $0x8] sm:$0xff]   ;;  %v2378_v59 = vld [vmem:[%s3247_s20 + $0x30] sm:$0xff]  }
  0x20   : > { %v403_v14 = vrot.slane %v2311_v3, 7  ;;  %v404_v15 = vrot.slane %v2312_v4, 7  ;;  %v3264_v16 = vrot.slane %v2315_v5, 7  ;;  %v396_v17 = vrot.slane %v2303_v6, 7  ;;  %s3145_s28 = smov 64   ;;  %s3146_s29 = smov 80  }
  0x21   : > { %v397_v18 = vrot.slane %v2304_v10, 7  ;;  %v3267_v19 = vrot.slane %v2307_v11, 7  ;;  %v2299_v20 = vunpack.c.l.bf16 %v3260_v9  ;;  %v389_v21 = vrot.slane %v2295_v12, 7  ;;  %s3147_s30 = smov 96   ;;  %s3148_s4 = smov 112  }
  0x22   : > { %v3271_v22 = vsel %vm381_vm0, %v403_v14, %v404_v15  ;;  %v3275_v23 = vsel %vm381_vm0, %v404_v15, %v3264_v16  ;;  %v3278_v24 = vsel %vm381_vm0, 0.0, %v403_v14  ;;  %v3281_v25 = vsel %vm381_vm0, 0.0, %v396_v17  ;;  %s311_s5 = sadd.s32 8, %s3244_s17  ;;  %p333_p12 = scmp.lt.s32.totalorder %s3120_s12, 3 }
  0x23   : > { %v560_v26 = vrot.slane %v3278_v24, 1  ;;  %v561_v27 = vrot.slane %v3271_v22, 1  ;;  %v563_v28 = vrot.slane %v3275_v23, 1  ;;  %v3287_v29 = vsel %vm381_vm0, %v396_v17, %v397_v18  ;;  %p312_p11 = scmp.lt.s32.totalorder %s311_s5, 31  ;;  %p220_p13 = scmp.lt.s32.totalorder %s3244_s17, 31 }
  0x24   : > { %v3291_v30 = vsel %vm381_vm0, %v397_v18, %v3267_v19  ;;  %v551_v31 = vrot.slane %v3281_v25, 1  ;;  %v552_v32 = vrot.slane %v3287_v29, 1  ;;  %v390_v33 = vrot.slane %v2296_v13, 7  ;;  %s334_s12 = scalar_select %p333_p12, 1, 0 }
  0x25   : > { %v562_v34 = vsel %vm532_vm1, %v560_v26, %v561_v27  ;;  %v564_v35 = vsel %vm532_vm1, %v561_v27, %v563_v28  ;;  %v554_v36 = vrot.slane %v3291_v30, 1  ;;  %v392_v37 = vrot.slane %v2299_v20, 7  ;;  %s5083_s5 = smov (!%p312_p11, %s311_s5), 31  ;;  %s5085_s17 = smov (!%p220_p13, %s3244_s17), 31 }
  0x26   : > { %v3303_v39 = vpack.i.bf16 %v564_v35, %v562_v34  ;;  %v553_v40 = vsel %vm532_vm1, %v551_v31, %v552_v32  ;;  %v3307_v41 = vsel %vm381_vm0, %v389_v21, %v390_v33  ;;  %v3310_v42 = vsel %vm381_vm0, 0.0, %v389_v21  ;;  %s2283_s6 = sshll.u32 %s5083_s5, 4  ;;  %s2214_s8 = sshll.u32 %s5085_s17, 2 }
  0x27   : > { %v555_v44 = vsel %vm532_vm1, %v552_v32, %v554_v36  ;;  %v3314_v45 = vsel %vm381_vm0, %v390_v33, %v392_v37  ;;  %v542_v46 = vrot.slane %v3310_v42, 1  ;;  %v543_v47 = vrot.slane %v3307_v41, 1  ;;  %v2379_v32 = vld [vmem:[%s3247_s20 + $0x38] sm:$0xff]   ;;  %s4247_s7 = scalar_lea.vmem %s3241_s11, %s2283_s6  ;;  %s2215_s9 = sshll.u32 %s5079_s13, 7 }
  0x28   : > { %2490 = vrot.lane.b32.xlu0 %v3303_v39, %s3142_s25  ;;  %v3320_v48 = vpack.i.bf16 %v555_v44, %v553_v40  ;;  %v545_v49 = vrot.slane %v3314_v45, 1  ;;  %v2359_v50 = vunpack.c.l.bf16 %v2358_v38  ;;  %v2360_v51 = vunpack.c.h.bf16 %v2358_v38  ;;  %s224_s10 = sadd.s32 %s2215_s9, %s2214_s8 }
  0x29   : > { %v544_v52 = vsel %vm532_vm1, %v542_v46, %v543_v47  ;;  %v2363_v53 = vunpack.c.l.bf16 %v2388_v43  ;;  %v327_v54 = vstv %s326_s24  ;;  %v2308_v55 = vunpack.c.h.bf16 %v3256_v7  ;;  %v2380_v46 = vld [vmem:[%s3247_s20 + $0x40] sm:$0xff]   ;;  %s2216_s11 = sshll.u32 %s224_s10, 2 }
  0x2a   : > { %2480 = vrot.lane.b32.xlu2 %v3320_v48, %s3142_s25  ;;  %v546_v56 = vsel %vm532_vm1, %v543_v47, %v545_v49  ;;  %vm328_vm2 = vcmp.eq.s32.totalorder %v327_v54, 1  ;;  %v2300_v57 = vunpack.c.h.bf16 %v3260_v9  ;;  %v2364_v58 = vunpack.c.h.bf16 %v2388_v43  ;;  %s4716_s13 = scalar_lea.vmem %s4845_s3, %s2216_s11 }
  0x2b   : > { %v3330_v60 = vpack.i.bf16 %v546_v56, %v544_v52  ;;  %v329_v61 = vsel %vm328_vm2, %v2359_v50, 0.0  ;;  %v330_v62 = vsel %vm328_vm2, %v2360_v51, 0.0  ;;  %v331_v63 = vsel %vm328_vm2, %v2363_v53, 0.0 }
  0x2c   : > { %v382_v0 = vrot.slane %v329_v61, 7  ;;  %v383_v2 = vrot.slane %v330_v62, 7  ;;  %v401_v3 = vrot.slane %v2308_v55, 7  ;;  %v385_v4 = vrot.slane %v331_v63, 7 }
  0x2d   : > { %2470 = vrot.lane.b32.xlu1 %v3330_v60, %s3142_s25  ;;  %v394_v5 = vrot.slane %v2300_v57, 7  ;;  %v332_v6 = vsel %vm328_vm2, %v2364_v58, 0.0  ;;  %v2319_v7 = vunpack.c.l.bf16 %v2378_v59  ;;  %v2320_v38 = vunpack.c.h.bf16 %v2378_v59  ;;  %v2381_v59 = vld [vmem:[%s3247_s20 + $0x48] sm:$0xff]  }
  0x2e   : > { %v3335_v8 = vsel %vm381_vm0, %v382_v0, %v383_v2  ;;  %v3338_v9 = vsel %vm381_vm0, 0.0, %v382_v0  ;;  %v3342_v10 = vsel %vm381_vm0, %v3267_v19, %v401_v3  ;;  %v3345_v11 = vsel %vm381_vm0, %v401_v3, 0.0 }
  0x2f   : > { %4919 = vst [vmem:[#allocation8_spill] sm:$0xff] %v3335_v8  ;;  %v3348_v12 = vsel %vm381_vm0, %v383_v2, %v385_v4  ;;  %v533_v13 = vrot.slane %v3338_v9, 1  ;;  %v534_v14 = vrot.slane %v3335_v8, 1  ;;  %v556_v15 = vrot.slane %v3342_v10, 1 }
  0x30   : > { %4920 = vst [vmem:[#allocation9_spill] sm:$0xff] %v3338_v9  ;;  %v536_v17 = vrot.slane %v3348_v12, 1  ;;  %v558_v18 = vrot.slane %v3345_v11, 1  ;;  %v3356_v19 = vsel %vm381_vm0, %v392_v37, %v394_v5  ;;  %v3359_v20 = vsel %vm381_vm0, %v394_v5, 0.0 }
  0x31   : > { %v535_v21 = vsel %vm532_vm1, %v533_v13, %v534_v14  ;;  %v557_v26 = vsel %vm532_vm1, %v554_v36, %v556_v15  ;;  %v547_v27 = vrot.slane %v3356_v19, 1  ;;  %v549_v31 = vrot.slane %v3359_v20, 1 }
  0x32   : > { %v537_v33 = vsel %vm532_vm1, %v534_v14, %v536_v17  ;;  %v559_v34 = vsel %vm532_vm1, %v556_v15, %v558_v18  ;;  %v387_v35 = vrot.slane %v332_v6, 7  ;;  %v2323_v51 = vunpack.c.l.bf16 %v2379_v32 }
  0x33   : > { %v2504_v37 = vpack.i.bf16 %v537_v33, %v535_v21  ;;  %v3368_v40 = vpack.i.bf16 %v559_v34, %v557_v26  ;;  %v548_v43 = vsel %vm532_vm1, %v545_v49, %v547_v27  ;;  %v550_v44 = vsel %vm532_vm1, %v547_v27, %v549_v31 }
  0x34   : > { %v3373_v36 = vpack.i.bf16 %v550_v44, %v548_v43  ;;  %v3376_v47 = vsel %vm381_vm0, %v385_v4, %v387_v35  ;;  %v3379_v50 = vsel %vm381_vm0, %v387_v35, 0.0  ;;  %v410_v53 = vrot.slane %v2319_v7, 7 }
  0x35   : > { %2505 = vrot.lane.b32.xlu0 %v2504_v37, %s3142_s25  ;;  %2485 = vrot.lane.b32.xlu2 %v3368_v40, %s3142_s25  ;;  %v538_v49 = vrot.slane %v3376_v47, 1  ;;  %v540_v52 = vrot.slane %v3379_v50, 1  ;;  %v411_v54 = vrot.slane %v2320_v38, 7  ;;  %v413_v55 = vrot.slane %v2323_v51, 7 }
  0x36   : > { %2475 = vrot.lane.b32.xlu1 %v3373_v36, %s3142_s25  ;;  %v2316_v56 = vunpack.c.h.bf16 %v3251_v1  ;;  %v2324_v57 = vunpack.c.h.bf16 %v2379_v32  ;;  %v2328_v58 = vunpack.c.h.bf16 %v2380_v46  ;;  %v3396_v0 = vsel %vm381_vm0, 0.0, %v410_v53  ;;  %v2382_v32 = vld [vmem:[%s3247_s20 + $0x50] sm:$0xff]  }
  0x37   : > { %v539_v61 = vsel %vm532_vm1, %v536_v17, %v538_v49  ;;  %v541_v62 = vsel %vm532_vm1, %v538_v49, %v540_v52  ;;  %v3393_v63 = vsel %vm381_vm0, %v410_v53, %v411_v54  ;;  %v3399_v3 = vsel %vm381_vm0, %v411_v54, %v413_v55 }
  0x38   : > { %v2509_v2 = vpack.i.bf16 %v541_v62, %v539_v61  ;;  %v569_v1 = vrot.slane %v3396_v0, 1  ;;  %v570_v4 = vrot.slane %v3393_v63, 1  ;;  %v572_v5 = vrot.slane %v3399_v3, 1  ;;  %v2384_v62 = vld [vmem:[%s3247_s20 + $0x60] sm:$0xff]  }
  0x39   : > { %v408_v6 = vrot.slane %v2316_v56, 7  ;;  %v415_v7 = vrot.slane %v2324_v57, 7  ;;  %v2331_v13 = vunpack.c.l.bf16 %v2381_v59  ;;  %v2332_v15 = vunpack.c.h.bf16 %v2381_v59  ;;  %v2383_v57 = vld [vmem:[%s3247_s20 + $0x58] sm:$0xff]  }
  0x3a   : > { %v571_v14 = vsel %vm532_vm1, %v569_v1, %v570_v4  ;;  %v418_v17 = vrot.slane %v2328_v58, 7  ;;  %v2327_v18 = vunpack.c.l.bf16 %v2380_v46  ;;  %v573_v21 = vsel %vm532_vm1, %v570_v4, %v572_v5 }
  0x3b   : > { %v3408_v26 = vsel %vm381_vm0, %v3264_v16, %v408_v6  ;;  %v3411_v27 = vsel %vm381_vm0, %v408_v6, 0.0  ;;  %v3414_v31 = vsel %vm381_vm0, %v413_v55, %v415_v7  ;;  %v3417_v33 = vpack.i.bf16 %v573_v21, %v571_v14 }
  0x3c   : > { %v565_v34 = vrot.slane %v3408_v26, 1  ;;  %v567_v35 = vrot.slane %v3411_v27, 1  ;;  %v3422_v38 = vsel %vm381_vm0, %v415_v7, 0.0  ;;  %v574_v16 = vrot.slane %v3414_v31, 1 }
  0x3d   : > { %4921 = vst [vmem:[#allocation10_spill] sm:$0xff] %v3417_v33  ;;  %2510 = vrot.lane.b32.xlu0 %v2509_v2, %s3142_s25  ;;  %v576_v37 = vrot.slane %v3422_v38, 1  ;;  %v420_v43 = vrot.slane %v2331_v13, 7  ;;  %v422_v44 = vrot.slane %v2332_v15, 7  ;;  %2500 = vrot.lane.b32.xlu2 %v3417_v33, %s3142_s25  ;;  %v417_v49 = vrot.slane %v2327_v18, 7 }
  0x3e   : > { %v566_v46 = vsel %vm532_vm1, %v563_v28, %v565_v34  ;;  %v568_v51 = vsel %vm532_vm1, %v565_v34, %v567_v35  ;;  %v2335_v52 = vunpack.c.l.bf16 %v2382_v32  ;;  %v575_v54 = vsel %vm532_vm1, %v572_v5, %v574_v16  ;;  %v2385_v35 = vld [vmem:[%s3247_s20 + $0x68] sm:$0xff]  }
  0x3f   : > { %v3433_v53 = vpack.i.bf16 %v568_v51, %v566_v46  ;;  %v577_v55 = vsel %vm532_vm1, %v574_v16, %v576_v37  ;;  %v3438_v56 = vsel %vm381_vm0, %v418_v17, %v420_v43  ;;  %v3444_v59 = vsel %vm381_vm0, %v420_v43, %v422_v44 }
  0x40   : > { %v3441_v58 = vpack.i.bf16 %v577_v55, %v575_v54  ;;  %v3447_v28 = vsel %vm381_vm0, %v422_v44, 0.0  ;;  %v581_v61 = vrot.slane %v3438_v56, 1  ;;  %v583_v2 = vrot.slane %v3444_v59, 1 }
  0x41   : > { %4922 = vst [vmem:[#allocation11_spill] sm:$0xff] %v3433_v53  ;;  %2495 = vrot.lane.b32.xlu1 %v3433_v53, %s3142_s25  ;;  %v585_v1 = vrot.slane %v3447_v28, 1  ;;  %v3456_v4 = vsel %vm381_vm0, %v417_v49, %v418_v17  ;;  %v3459_v5 = vsel %vm381_vm0, 0.0, %v417_v49  ;;  %v2336_v13 = vunpack.c.h.bf16 %v2382_v32 }
  0x42   : > { %4923 = vst [vmem:[#allocation12_spill] sm:$0xff] %v3441_v58  ;;  %v578_v6 = vrot.slane %v3459_v5, 1  ;;  %v579_v7 = vrot.slane %v3456_v4, 1  ;;  %v2339_v14 = vunpack.c.l.bf16 %v2383_v57  ;;  %v584_v15 = vsel %vm532_vm1, %v581_v61, %v583_v2 }
  0x43   : > { %v586_v18 = vsel %vm532_vm1, %v583_v2, %v585_v1  ;;  %v424_v21 = vrot.slane %v2335_v52, 7  ;;  %v2343_v34 = vunpack.c.l.bf16 %v2384_v62  ;;  %v425_v43 = vrot.slane %v2336_v13, 7 }
  0x44   : > { %v3466_v16 = vpack.i.bf16 %v586_v18, %v584_v15  ;;  %v580_v17 = vsel %vm532_vm1, %v578_v6, %v579_v7  ;;  %v582_v37 = vsel %vm532_vm1, %v579_v7, %v581_v61  ;;  %v427_v32 = vrot.slane %v2339_v14, 7 }
  0x45   : > { %2515 = vrot.lane.b32.xlu0 %v3441_v58, %s3142_s25  ;;  %v3472_v44 = vpack.i.bf16 %v582_v37, %v580_v17  ;;  %v3475_v46 = vsel %vm381_vm0, 0.0, %v424_v21  ;;  %v2344_v51 = vunpack.c.h.bf16 %v2384_v62  ;;  %v3480_v49 = vsel %vm381_vm0, %v424_v21, %v425_v43 }
  0x46   : > { %4924 = vst [vmem:[#allocation13_spill] sm:$0xff] %v3466_v16  ;;  %2525 = vrot.lane.b32.xlu2 %v3466_v16, %s3142_s25  ;;  %v587_v52 = vrot.slane %v3475_v46, 1  ;;  %v2347_v54 = vunpack.c.l.bf16 %v2385_v35  ;;  %v431_v55 = vrot.slane %v2343_v34, 7  ;;  %v3484_v61 = vsel %vm381_vm0, %v425_v43, %v427_v32 }
  0x47   : > { %4925 = vst [vmem:[#allocation14_spill] sm:$0xff] %v3472_v44  ;;  %v588_v2 = vrot.slane %v3480_v49, 1  ;;  %v432_v1 = vrot.slane %v2344_v51, 7  ;;  %v2340_v6 = vunpack.c.h.bf16 %v2383_v57  ;;  %v590_v7 = vrot.slane %v3484_v61, 1 }
  0x48   : > { %4926 = vst [vmem:[#allocation15_spill] sm:$0xff] %v3475_v46  ;;  %v434_v62 = vrot.slane %v2347_v54, 7  ;;  %v3489_v13 = vsel %vm381_vm0, 0.0, %v431_v55  ;;  %v2348_v14 = vunpack.c.h.bf16 %v2385_v35 }
  0x49   : > { %4927 = vst [vmem:[#allocation16_spill] sm:$0xff] %v3480_v49  ;;  %2520 = vrot.lane.b32.xlu1 %v3472_v44, %s3142_s25  ;;  %v589_v15 = vsel %vm532_vm1, %v587_v52, %v588_v2  ;;  %v3495_v18 = vsel %vm381_vm0, %v431_v55, %v432_v1  ;;  %v596_v21 = vrot.slane %v3489_v13, 1  ;;  %v429_v34 = vrot.slane %v2340_v6, 7 }
  0x4a   : > { %4928 = vst [vmem:[#allocation17_spill] sm:$0xff] %v3489_v13  ;;  %v591_v57 = vsel %vm532_vm1, %v588_v2, %v590_v7  ;;  %v3500_v17 = vsel %vm381_vm0, %v432_v1, %v434_v62  ;;  %v597_v37 = vrot.slane %v3495_v18, 1  ;;  %v436_v43 = vrot.slane %v2348_v14, 7 }
  0x4b   : > { %4929 = vst [vmem:[#allocation18_spill] sm:$0xff] %v3495_v18  ;;  %v3503_v35 = vpack.i.bf16 %v591_v57, %v589_v15  ;;  %v599_v51 = vrot.slane %v3500_v17, 1  ;;  %v3507_v52 = vsel %vm381_vm0, %v427_v32, %v429_v34  ;;  %v3510_v54 = vsel %vm381_vm0, %v429_v34, 0.0 }
  0x4c   : > { %4930 = vst [vmem:[#allocation19_spill] sm:$0xff] %v3500_v17  ;;  %v598_v55 = vsel %vm532_vm1, %v596_v21, %v597_v37  ;;  %v592_v2 = vrot.slane %v3507_v52, 1  ;;  %v594_v1 = vrot.slane %v3510_v54, 1  ;;  %v3516_v6 = vsel %vm381_vm0, %v434_v62, %v436_v43 }
  0x4d   : > { %4931 = vst [vmem:[#allocation20_spill] sm:$0xff] %v3503_v35  ;;  %2530 = vrot.lane.b32.xlu0 %v3503_v35, %s3142_s25  ;;  %v600_v14 = vsel %vm532_vm1, %v597_v37, %v599_v51  ;;  %v3522_v32 = vsel %vm381_vm0, %v436_v43, 0.0  ;;  %v601_v15 = vrot.slane %v3516_v6, 1  ;;  %v705_v37 = vrot.slane %v3348_v12, 2 }
  0x4e   : > { %4932 = vst [vmem:[#allocation21_spill] sm:$0xff] %v3516_v6  ;;  %v3525_v34 = vpack.i.bf16 %v600_v14, %v598_v55  ;;  %v593_v21 = vsel %vm532_vm1, %v590_v7, %v592_v2  ;;  %v595_v57 = vsel %vm532_vm1, %v592_v2, %v594_v1  ;;  %v603_v62 = vrot.slane %v3522_v32, 1 }
  0x4f   : > { %v3530_v16 = vpack.i.bf16 %v595_v57, %v593_v21  ;;  %v602_v35 = vsel %vm532_vm1, %v599_v51, %v601_v15  ;;  %v707_v43 = vrot.slane %v3376_v47, 2  ;;  %v709_v14 = vrot.slane %v3379_v50, 2 }
  0x50   : > { %4933 = vst [vmem:[#allocation22_spill] sm:$0xff] %v3525_v34  ;;  %2540 = vrot.lane.b32.xlu2 %v3525_v34, %s3142_s25  ;;  %v604_v55 = vsel %vm532_vm1, %v601_v15, %v603_v62  ;;  %v702_v7 = vrot.slane %v3338_v9, 2  ;;  %v703_v2 = vrot.slane %v3335_v8, 2  ;;  %v711_v15 = vrot.slane %v3310_v42, 2 }
  0x51   : > { %2535 = vrot.lane.b32.xlu1 %v3530_v16, %s3142_s25  ;;  %v3543_v1 = vpack.i.bf16 %v604_v55, %v602_v35  ;;  %v708_v51 = vsel %vm701_vm3, %v705_v37, %v707_v43  ;;  %v710_v21 = vsel %vm701_vm3, %v707_v43, %v709_v14  ;;  %v712_v62 = vrot.slane %v3307_v41, 2 }
  0x52   : > { %v704_v57 = vsel %vm701_vm3, %v702_v7, %v703_v2  ;;  %v706_v34 = vsel %vm701_vm3, %v703_v2, %v705_v37  ;;  %v2554_v50 = vpack.i.bf16 %v710_v21, %v708_v51  ;;  %v714_v9 = vrot.slane %v3314_v45, 2 }
  0x53   : > { %v2549_v35 = vpack.i.bf16 %v706_v34, %v704_v57  ;;  %v720_v55 = vrot.slane %v3281_v25, 2  ;;  %v721_v8 = vrot.slane %v3287_v29, 2  ;;  %v723_v43 = vrot.slane %v3291_v30, 2 }
  0x54   : > { %v713_v14 = vsel %vm701_vm3, %v711_v15, %v712_v62  ;;  %v715_v37 = vsel %vm701_vm3, %v712_v62, %v714_v9  ;;  %v716_v7 = vrot.slane %v3356_v19, 2  ;;  %v718_v2 = vrot.slane %v3359_v20, 2 }
  0x55   : > { %2545 = vrot.lane.b32.xlu0 %v3543_v1, %s3142_s25  ;;  %v3564_v34 = vsel %vm701_vm3, %v720_v55, %v721_v8  ;;  %v3567_v51 = vsel %vm701_vm3, %v721_v8, %v723_v43  ;;  %v3569_v21 = vpack.i.bf16 %v715_v37, %v713_v14  ;;  %v725_v62 = vrot.slane %v3342_v10, 2 }
  0x56   : > { %v717_v57 = vsel %vm701_vm3, %v714_v9, %v716_v7  ;;  %v719_v15 = vsel %vm701_vm3, %v716_v7, %v718_v2  ;;  %v727_v20 = vrot.slane %v3345_v11, 2  ;;  %v732_v8 = vrot.slane %v3275_v23, 2 }
  0x57   : > { %4934 = vst [vmem:[#allocation23_spill] sm:$0xff] %v3569_v21  ;;  %v734_v55 = vrot.slane %v3408_v26, 2  ;;  %v736_v9 = vrot.slane %v3411_v27, 2  ;;  %v3587_v14 = vsel %vm701_vm3, %v723_v43, %v725_v62  ;;  %v729_v37 = vrot.slane %v3278_v24, 2 }
  0x58   : > { %2555 = vrot.lane.b32.xlu2 %v2554_v50, %s3143_s26  ;;  %v3577_v50 = vpack.i.bf16 %v3567_v51, %v3564_v34  ;;  %v3590_v11 = vsel %vm701_vm3, %v725_v62, %v727_v20  ;;  %v730_v7 = vrot.slane %v3271_v22, 2  ;;  %v739_v20 = vrot.slane %v3393_v63, 2 }
  0x59   : > { %2550 = vrot.lane.b32.xlu1 %v2549_v35, %s3143_s26  ;;  %v3581_v35 = vpack.i.bf16 %v719_v15, %v717_v57  ;;  %v3599_v2 = vsel %vm701_vm3, %v732_v8, %v734_v55  ;;  %v3602_v27 = vsel %vm701_vm3, %v734_v55, %v736_v9  ;;  %v3606_v43 = vpack.i.bf16 %v3590_v11, %v3587_v14 }
  0x5a   : > { %4935 = vst [vmem:[#allocation24_spill] sm:$0xff] %v3577_v50  ;;  %v738_v57 = vrot.slane %v3396_v0, 2  ;;  %v3610_v15 = vsel %vm701_vm3, %v729_v37, %v730_v7  ;;  %v3613_v62 = vsel %vm701_vm3, %v730_v7, %v732_v8  ;;  %v3619_v55 = vpack.i.bf16 %v3602_v27, %v3599_v2 }
  0x5b   : > { %4936 = vst [vmem:[#allocation25_spill] sm:$0xff] %v3581_v35  ;;  %v3625_v9 = vpack.i.bf16 %v3613_v62, %v3610_v15  ;;  %v747_v37 = vrot.slane %v3459_v5, 2  ;;  %v748_v8 = vrot.slane %v3456_v4, 2  ;;  %v750_v7 = vrot.slane %v3438_v56, 2 }
  0x5c   : > { %4937 = vst [vmem:[#allocation26_spill] sm:$0xff] %v3599_v2 }
  0x5d   : > { %2560 = vrot.lane.b32.xlu0 %v3569_v21, %s3143_s26  ;;  %4938 = vst [vmem:[#allocation27_spill] sm:$0xff] %v3602_v27  ;;  %v743_v27 = vrot.slane %v3414_v31, 2  ;;  %v3643_v2 = vsel %vm701_vm3, %v747_v37, %v748_v8 }
  0x5e   : > { %4939 = vst [vmem:[#allocation28_spill] sm:$0xff] %v3606_v43 }
  0x5f   : > { %4940 = vst [vmem:[#allocation29_spill] sm:$0xff] %v3613_v62  ;;  %v3646_v62 = vsel %vm701_vm3, %v748_v8, %v750_v7 }
  0x60   : > { %2570 = vrot.lane.b32.xlu2 %v3577_v50, %s3143_s26  ;;  %v741_v50 = vrot.slane %v3399_v3, 2  ;;  %4941 = vst [vmem:[#allocation30_spill] sm:$0xff] %v3619_v55  ;;  %v3662_v37 = vpack.i.bf16 %v3646_v62, %v3643_v2 }
  0x61   : > { %2565 = vrot.lane.b32.xlu1 %v3581_v35, %s3143_s26  ;;  %4942 = vst [vmem:[#allocation31_spill] sm:$0xff] %v3625_v9  ;;  %v3631_v35 = vsel %vm701_vm3, %v738_v57, %v739_v20 }
  0x62   : > { %4943 = vst [vmem:[#allocation32_spill] sm:$0xff] %v3631_v35  ;;  %v3634_v21 = vsel %vm701_vm3, %v739_v20, %v741_v50  ;;  %v3653_v20 = vsel %vm701_vm3, %v741_v50, %v743_v27  ;;  %v759_v50 = vrot.slane %v3484_v61, 2 }
  0x63   : > { %4944 = vst [vmem:[#allocation33_spill] sm:$0xff] %v3634_v21  ;;  %v3650_v57 = vpack.i.bf16 %v3634_v21, %v3631_v35  ;;  %v3812_v35 = vpack.i.bf16 %v3495_v18, %v3489_v13 }
  0x64   : > { %4945 = vst [vmem:[#allocation34_spill] sm:$0xff] %v3643_v2 }
  0x65   : > { %2575 = vrot.lane.b32.xlu0 %v3606_v43, %s3143_s26  ;;  %v745_v43 = vrot.slane %v3422_v38, 2  ;;  %4946 = vst [vmem:[#allocation35_spill] sm:$0xff] %v3646_v62  ;;  %v756_v62 = vrot.slane %v3475_v46, 2 }
  0x66   : > { %4947 = vst [vmem:[#allocation36_spill] sm:$0xff] %v3650_v57 }
  0x67   : > { %4948 = vst [vmem:[#allocation37_spill] sm:$0xff] %v3653_v20  ;;  %v3656_v38 = vsel %vm701_vm3, %v743_v27, %v745_v43  ;;  %v761_v27 = vrot.slane %v3507_v52, 2  ;;  %v763_v43 = vrot.slane %v3510_v54, 2 }
  0x68   : > { %2585 = vrot.lane.b32.xlu2 %v3619_v55, %s3143_s26  ;;  %4949 = vst [vmem:[#allocation38_spill] sm:$0xff] %v3656_v38  ;;  %v752_v55 = vrot.slane %v3444_v59, 2  ;;  %v3668_v8 = vpack.i.bf16 %v3656_v38, %v3653_v20  ;;  %v768_v20 = vrot.slane %v3500_v17, 2 }
  0x69   : > { %2580 = vrot.lane.b32.xlu1 %v3625_v9, %s3143_s26  ;;  %v754_v9 = vrot.slane %v3447_v28, 2  ;;  %v3686_v2 = vsel %vm701_vm3, %v759_v50, %v761_v27  ;;  %v3689_v54 = vsel %vm701_vm3, %v761_v27, %v763_v43  ;;  %4972 = vst [vmem:[#allocation61_spill] sm:$0xff] %v3812_v35 }
  0x6a   : > { %4950 = vst [vmem:[#allocation39_spill] sm:$0xff] %v3668_v8  ;;  %v3674_v21 = vsel %vm701_vm3, %v750_v7, %v752_v55  ;;  %v3706_v27 = vpack.i.bf16 %v3689_v54, %v3686_v2 }
  0x6b   : > { %4951 = vst [vmem:[#allocation40_spill] sm:$0xff] %v3674_v21  ;;  %v3677_v28 = vsel %vm701_vm3, %v752_v55, %v754_v9  ;;  %v765_v9 = vrot.slane %v3489_v13, 2 }
  0x6c   : > { %4952 = vst [vmem:[#allocation41_spill] sm:$0xff] %v3677_v28  ;;  %v3693_v55 = vpack.i.bf16 %v3677_v28, %v3674_v21  ;;  %v772_v28 = vrot.slane %v3522_v32, 2  ;;  %v2386_v21 = vld [vmem:[%s3247_s20 + $0x70] sm:$0xff]  }
  0x6d   : > { %2590 = vrot.lane.b32.xlu0 %v3650_v57, %s3143_s26  ;;  %v757_v57 = vrot.slane %v3480_v49, 2  ;;  %4953 = vst [vmem:[#allocation42_spill] sm:$0xff] %v3686_v2  ;;  %v2629_v2 = vpack.i.bf16 %v3307_v41, %v3310_v42 }
  0x6e   : > { %4954 = vst [vmem:[#allocation43_spill] sm:$0xff] %v3689_v54 }
  0x6f   : > { %v3697_v7 = vsel %vm701_vm3, %v756_v62, %v757_v57  ;;  %v3700_v38 = vsel %vm701_vm3, %v757_v57, %v759_v50  ;;  %4957 = vst [vmem:[#allocation46_spill] sm:$0xff] %v3706_v27  ;;  %v770_v50 = vrot.slane %v3516_v6, 2 }
  0x70   : > { %2600 = vrot.lane.b32.xlu2 %v3662_v37, %s3143_s26  ;;  %4955 = vst [vmem:[#allocation44_spill] sm:$0xff] %v3697_v7  ;;  %v3712_v43 = vpack.i.bf16 %v3700_v38, %v3697_v7  ;;  %v3796_v7 = vpack.i.bf16 %v3456_v4, %v3459_v5 }
  0x71   : > { %2595 = vrot.lane.b32.xlu1 %v3668_v8, %s3143_s26  ;;  %4956 = vst [vmem:[#allocation45_spill] sm:$0xff] %v3700_v38  ;;  %v766_v8 = vrot.slane %v3495_v18, 2  ;;  %v3790_v38 = vpack.i.bf16 %v3444_v59, %v3438_v56 }
  0x72   : > { %4958 = vst [vmem:[#allocation47_spill] sm:$0xff] %v3712_v43 }
  0x73   : > { %v3715_v62 = vsel %vm701_vm3, %v765_v9, %v766_v8  ;;  %v3718_v57 = vsel %vm701_vm3, %v766_v8, %v768_v20  ;;  %v3731_v9 = vsel %vm701_vm3, %v768_v20, %v770_v50  ;;  %v3734_v8 = vsel %vm701_vm3, %v770_v50, %v772_v28  ;;  %4970 = vst [vmem:[#allocation59_spill] sm:$0xff] %v3790_v38 }
  0x74   : > { %4959 = vst [vmem:[#allocation48_spill] sm:$0xff] %v3715_v62  ;;  %v3728_v54 = vpack.i.bf16 %v3718_v57, %v3715_v62  ;;  %v3742_v32 = vpack.i.bf16 %v3734_v8, %v3731_v9  ;;  %v2634_v20 = vpack.i.bf16 %v3356_v19, %v3314_v45  ;;  %v3751_v28 = vpack.i.bf16 %v3342_v10, %v3291_v30 }
  0x75   : > { %2605 = vrot.lane.b32.xlu0 %v3693_v55, %s3143_s26  ;;  %4960 = vst [vmem:[#allocation49_spill] sm:$0xff] %v3718_v57  ;;  %v3756_v50 = vpack.i.bf16 %v3287_v29, %v3281_v25  ;;  %v3786_v62 = vpack.i.bf16 %v3414_v31, %v3399_v3 }
  0x76   : > { %4961 = vst [vmem:[#allocation50_spill] sm:$0xff] %v3728_v54 }
  0x77   : > { %4962 = vst [vmem:[#allocation51_spill] sm:$0xff] %v3731_v9  ;;  %v3776_v9 = vpack.i.bf16 %v3408_v26, %v3275_v23 }
  0x78   : > { %2615 = vrot.lane.b32.xlu2 %v3706_v27, %s3143_s26  ;;  %4963 = vst [vmem:[#allocation52_spill] sm:$0xff] %v3734_v8 }
  0x79   : > { %2610 = vrot.lane.b32.xlu1 %v3712_v43, %s3143_s26  ;;  %4964 = vst [vmem:[#allocation53_spill] sm:$0xff] %v3742_v32 }
  0x7a   : > { %4965 = vst [vmem:[#allocation54_spill] sm:$0xff] %v3751_v28 }
  0x7b   : > { %4968 = vst [vmem:[#allocation57_spill] sm:$0xff] %v3776_v9 }
  0x7c   : > { %4969 = vst [vmem:[#allocation58_spill] sm:$0xff] %v3786_v62 }
  0x7d   : > { %2620 = vrot.lane.b32.xlu0 %v3728_v54, %s3143_s26  ;;  %4971 = vst [vmem:[#allocation60_spill] sm:$0xff] %v3796_v7  ;;  %v3808_v54 = vpack.i.bf16 %v3480_v49, %v3475_v46 }
  0x80   : > { %2630 = vrot.lane.b32.xlu2 %v2629_v2, %s3144_s27  ;;  %v3766_v2 = vpack.i.bf16 %v3271_v22, %v3278_v24 }
  0x81   : > { %2625 = vrot.lane.b32.xlu1 %v3742_v32, %s3143_s26  ;;  %v2387_v32 = vld [vmem:[%s3247_s20 + $0x78] sm:$0xff]  }
  0x82   : > { %4966 = vst [vmem:[#allocation55_spill] sm:$0xff] %v3766_v2  ;;  %v2356_v27 = vunpack.c.h.bf16 %v2387_v32 }
  0x84   : > { %v3758_v8 = vpop.permute.xlu2 %2480  ;;  %v3822_v46 = vrot.slane %v2356_v27, 7  ;;  %v3841_v27 = vpack.i.bf16 %v3516_v6, %v3500_v17 }
  0x85   : > { %2635 = vrot.lane.b32.xlu0 %v2634_v20, %s3144_s27  ;;  %v3770_v20 = vpack.i.bf16 %v3393_v63, %v3396_v0 }
  0x86   : > { %4973 = vst [vmem:[#allocation62_spill] sm:$0xff] %v3822_v46 }
  0x87   : > { %4967 = vst [vmem:[#allocation56_spill] sm:$0xff] %v3770_v20 }
  0x88   : > { %2645 = vrot.lane.b32.xlu2 %v3751_v28, %s3144_s27  ;;  %4976 = vst [vmem:[#allocation65_spill] sm:$0xff] %v3841_v27 }
  0x89   : > { %2640 = vrot.lane.b32.xlu1 %v3756_v50, %s3144_s27 }
  0x8d   : > { %2650 = vrot.lane.b32.xlu0 %v3766_v2, %s3144_s27  ;;  %v2351_v2 = vunpack.c.l.bf16 %v2386_v21 }
  0x8f   : > { %v3778_v57 = vpop.permute.xlu2 %2485  ;;  %v438_v49 = vrot.slane %v2351_v2, 7 }
  0x90   : > { %2660 = vrot.lane.b32.xlu2 %v3770_v20, %s3144_s27 }
  0x91   : > { %2655 = vrot.lane.b32.xlu1 %v3776_v9, %s3144_s27  ;;  %v2352_v9 = vunpack.c.h.bf16 %v2386_v21  ;;  %v3847_v2 = vsel %vm381_vm0, 0.0, %v438_v49 }
  0x92   : > { %4978 = vst [vmem:[#allocation67_spill] sm:$0xff] %v3847_v2 }
  0x93   : > { %v439_v43 = vrot.slane %v2352_v9, 7 }
  0x95   : > { %2665 = vrot.lane.b32.xlu0 %v3786_v62, %s3144_s27  ;;  %v2355_v62 = vunpack.c.l.bf16 %v2387_v32 }
  0x97   : > { %v3802_v20 = vpop.permute.xlu2 %2500  ;;  %v441_v28 = vrot.slane %v2355_v62, 7  ;;  %v3844_v62 = vsel %vm381_vm0, %v438_v49, %v439_v43 }
  0x98   : > { %2675 = vrot.lane.b32.xlu2 %v3790_v38, %s3144_s27  ;;  %v3818_v38 = vpack.i.bf16 %v3507_v52, %v3484_v61  ;;  %4977 = vst [vmem:[#allocation66_spill] sm:$0xff] %v3844_v62 }
  0x99   : > { %2670 = vrot.lane.b32.xlu1 %v3796_v7, %s3144_s27  ;;  %v3833_v13 = vsel %vm381_vm0, %v439_v43, %v441_v28  ;;  %v3837_v9 = vsel %vm381_vm0, %v441_v28, %v3822_v46  ;;  %v3857_v28 = vpack.i.bf16 %v3844_v62, %v3847_v2 }
  0x9a   : > { %v3820_v7 = vpop.permute.xlu0 %2490  ;;  %4974 = vst [vmem:[#allocation63_spill] sm:$0xff] %v3833_v13 }
  0x9b   : > { %4975 = vst [vmem:[#allocation64_spill] sm:$0xff] %v3837_v9 }
  0x9c   : > { %4980 = vst [vmem:[#allocation69_spill] sm:$0xff] %v3857_v28 }
  0x9d   : > { %2680 = vrot.lane.b32.xlu0 %v3808_v54, %s3144_s27 }
  0x9f   : > { %v3824_v32 = vpop.permute.xlu1 %2470 }
  0xa0   : > { %2690 = vrot.lane.b32.xlu2 %v3812_v35, %s3144_s27  ;;  %v3828_v21 = vpop.permute.xlu2 %2525  ;;  %v3851_v35 = vpack.i.bf16 %v3837_v9, %v3833_v13 }
  0xa1   : > { %2685 = vrot.lane.b32.xlu1 %v3818_v38, %s3144_s27 }
  0xa2   : > { %4979 = vst [vmem:[#allocation68_spill] sm:$0xff] %v3851_v35 }
  0xa5   : > { %2695 = vrot.lane.b32.xlu0 %v3841_v27, %s3144_s27 }
  0xa7   : > { %v3859_v46 = vpop.permute.xlu0 %2505 }
  0xa8   : > { %2705 = vrot.lane.b32.xlu2 %v3851_v35, %s3144_s27  ;;  %v3865_v49 = vpop.permute.xlu1 %2475 }
  0xa9   : > { %2700 = vrot.lane.b32.xlu1 %v3857_v28, %s3144_s27 }
  0xaa   : > { %v3867_v43 = vpop.permute.xlu2 %2540 }
  0xad   : > { %2710 = vrot.lane.b32.xlu0 %v3330_v60, %s3145_s28 }
  0xaf   : > { %v2511_v9 = vpop.permute.xlu0 %2510 }
  0xb0   : > { %2720 = vrot.lane.b32.xlu2 %v3320_v48, %s3145_s28  ;;  %v2513_v13 = vunpack.i.h.bf16 %v2511_v9  ;;  %v2512_v62 = vunpack.i.l.bf16 %v2511_v9 }
  0xb1   : > { %2715 = vrot.lane.b32.xlu1 %v3373_v36, %s3145_s28  ;;  %v2292_v36 = vld [vmem:[#allocation2 + $0x40] sm:$0xff] }
  0xb2   : > { %v1426_v35 = vsel %vm1422_vm4, %v3376_v47, %v2513_v13  ;;  %v1425_v28 = vsel %vm1422_vm4, %v3348_v12, %v2512_v62  ;;  %v2556_v2 = vpop.permute.xlu2 %2555  ;;  %1905 = vmatpush.bf16.msra.mxu1 %v2292_v36  ;;  %2398 = vmatpush.bf16.msra.mxu3 %v2292_v36  ;;  %v2483_v12 = vunpack.i.h.bf16 %v3758_v8  ;;  %v2482_v47 = vunpack.i.l.bf16 %v3758_v8 }
  0xb3   : > { %v2558_v27 = vunpack.i.h.bf16 %v2556_v2  ;;  %v2557_v60 = vunpack.i.l.bf16 %v2556_v2  ;;  %v2496_v17 = vpop.permute.xlu1 %2495  ;;  %v1654_v13 = vpack.c.bf16 %v3567_v51, %v3564_v34 }
  0xb4   : > { %v1431_v8 = vsel %vm1422_vm4, %v3281_v25, %v2482_v47  ;;  %v2498_v36 = vunpack.i.h.bf16 %v2496_v17 }
  0xb5   : > { %v3880_v6 = vsel %vm1455_vm5, %v1426_v35, %v2558_v27  ;;  %v3883_v9 = vsel %vm1455_vm5, %v1425_v28, %v2557_v60  ;;  %2725 = vrot.lane.b32.xlu0 %v3368_v40, %s3145_s28  ;;  %2261 = vmatmul.msk.bf16.vlgmr.msra.gmra.mxu1 %vm1422_vm4, %v1654_v13  ;;  %v1432_v28 = vsel %vm1422_vm4, %v3287_v29, %v2483_v12  ;;  %v2497_v13 = vunpack.i.l.bf16 %v2496_v17 }
  0xb7   : > { %v3887_v18 = vpop.permute.xlu0 %2515 }
  0xb8   : > { %2735 = vrot.lane.b32.xlu2 %v3433_v53, %s3145_s28 }
  0xb9   : > { %2730 = vrot.lane.b32.xlu1 %v3303_v39, %s3145_s28 }
  0xba   : > { %v2571_v35 = vpop.permute.xlu2 %2570 }
  0xbb   : > { %v2573_v27 = vunpack.i.h.bf16 %v2571_v35  ;;  %v2572_v62 = vunpack.i.l.bf16 %v2571_v35  ;;  %v2521_v2 = vpop.permute.xlu1 %2520  ;;  %v1438_v35 = vsel %vm1422_vm4, %v3408_v26, %v2498_v36  ;;  %v2507_v26 = vunpack.i.l.bf16 %v3859_v46  ;;  %v4984_v36 = vld [vmem:[#allocation20_spill] sm:$0xff] }
  0xbd   : > { %v3903_v60 = vsel %vm1455_vm5, %v1431_v8, %v2572_v62  ;;  %v3906_v34 = vsel %vm1455_vm5, %v1432_v28, %v2573_v27  ;;  %2740 = vrot.lane.b32.xlu0 %v3417_v33, %s3145_s28  ;;  %v1437_v27 = vsel %vm1422_vm4, %v3275_v23, %v2497_v13  ;;  %v4983_v28 = vld [vmem:[#allocation13_spill] sm:$0xff]  ;;  %v2508_v8 = vunpack.i.h.bf16 %v3859_v46 }
  0xbe   : > { %v1656_v23 = vpack.c.bf16 %v3590_v11, %v3587_v14  ;;  %v2473_v13 = vunpack.i.h.bf16 %v3824_v32 }
  0xbf   : > { %v3910_v51 = vpop.permute.xlu0 %2530 }
  0xc0   : > { %2750 = vrot.lane.b32.xlu2 %v3472_v44, %s3145_s28 }
  0xc1   : > { %2745 = vrot.lane.b32.xlu1 %v3441_v58, %s3145_s28  ;;  %v2522_v58 = vunpack.i.l.bf16 %v2521_v2 }
  0xc2   : > { %v2586_v25 = vpop.permute.xlu2 %2585 }
  0xc3   : > { %v2588_v29 = vunpack.i.h.bf16 %v2586_v25  ;;  %v2587_v12 = vunpack.i.l.bf16 %v2586_v25  ;;  %v2536_v47 = vpop.permute.xlu1 %2535  ;;  %v2523_v25 = vunpack.i.h.bf16 %v2521_v2  ;;  %v1443_v46 = vsel %vm1422_vm4, %v3459_v5, %v2522_v58 }
  0xc4   : > { %v2478_v58 = vunpack.i.h.bf16 %v3865_v49 }
  0xc5   : > { %v3921_v62 = vsel %vm1455_vm5, %v1437_v27, %v2587_v12  ;;  %v3924_v17 = vsel %vm1455_vm5, %v1438_v35, %v2588_v29  ;;  %2755 = vrot.lane.b32.xlu0 %v4983_v28, %s3145_s28  ;;  %v2472_v29 = vunpack.i.l.bf16 %v3824_v32  ;;  %2262 = vmatmul.msk.bf16.gmra.mxu1 %vm1422_vm4, %v1656_v23  ;;  %v4985_v35 = vld [vmem:[#allocation8_spill] sm:$0xff]  ;;  %v1444_v14 = vsel %vm1422_vm4, %v3456_v4, %v2523_v25 }
  0xc6   : > { %4981 = vst [vmem:[#allocation70_spill] sm:$0xff] %v3921_v62  ;;  %v1424_v2 = vsel %vm1422_vm4, %v4985_v35, %v2508_v8  ;;  %v4987_v8 = vld [vmem:[#allocation22_spill] sm:$0xff]  ;;  %v2537_v25 = vunpack.i.l.bf16 %v2536_v47 }
  0xc7   : > { %4982 = vst [vmem:[#allocation71_spill] sm:$0xff] %v3924_v17  ;;  %v3929_v44 = vpop.permute.xlu0 %2545  ;;  %v4986_v17 = vld [vmem:[#allocation9_spill] sm:$0xff]  ;;  %v1427_v35 = vsel %vm1422_vm4, %v3310_v42, %v2472_v29 }
  0xc8   : > { %2765 = vrot.lane.b32.xlu2 %v3530_v16, %s3145_s28  ;;  %v1423_v32 = vsel %vm1422_vm4, %v4986_v17, %v2507_v26  ;;  %v1428_v26 = vsel %vm1422_vm4, %v3307_v41, %v2473_v13  ;;  %v1430_v41 = vsel %vm1422_vm4, %v3356_v19, %v2478_v58  ;;  %v2493_v58 = vunpack.i.h.bf16 %v3820_v7 }
  0xc9   : > { %2760 = vrot.lane.b32.xlu1 %v4984_v36, %s3145_s28 }
  0xca   : > { %v2601_v12 = vpop.permute.xlu2 %2600 }
  0xcb   : > { %v2603_v27 = vunpack.i.h.bf16 %v2601_v12  ;;  %v2602_v28 = vunpack.i.l.bf16 %v2601_v12  ;;  %v2551_v33 = vpop.permute.xlu1 %2550 }
  0xcc   : > { %v2553_v11 = vunpack.i.h.bf16 %v2551_v33  ;;  %v2552_v53 = vunpack.i.l.bf16 %v2551_v33  ;;  %v2538_v33 = vunpack.i.h.bf16 %v2536_v47  ;;  %v2487_v47 = vunpack.i.l.bf16 %v3778_v57 }
  0xcd   : > { %v3950_v62 = vsel %vm1455_vm5, %v1443_v46, %v2602_v28  ;;  %v3953_v23 = vsel %vm1455_vm5, %v1444_v14, %v2603_v27  ;;  %2770 = vrot.lane.b32.xlu0 %v4987_v8, %s3145_s28  ;;  %v1449_v46 = vsel %vm1422_vm4, %v3484_v61, %v2537_v25 }
  0xce   : > { %v1457_v12 = vsel %vm1455_vm5, %v1424_v2, %v2553_v11  ;;  %v1456_v4 = vsel %vm1455_vm5, %v1423_v32, %v2552_v53  ;;  %v2477_v2 = vunpack.i.l.bf16 %v3865_v49  ;;  %v2488_v53 = vunpack.i.h.bf16 %v3778_v57 }
  0xcf   : > { %v2561_v5 = vpop.permute.xlu0 %2560  ;;  %v1450_v29 = vsel %vm1422_vm4, %v3507_v52, %v2538_v33  ;;  %v4988_v33 = vld [vmem:[#allocation23_spill] sm:$0xff] }
  0xd0   : > { %2780 = vrot.lane.b32.xlu2 %v3662_v37, %s3146_s29  ;;  %v2563_v17 = vunpack.i.h.bf16 %v2561_v5  ;;  %v2562_v28 = vunpack.i.l.bf16 %v2561_v5  ;;  %v1429_v32 = vsel %vm1422_vm4, %v3314_v45, %v2477_v2  ;;  %v2492_v2 = vunpack.i.l.bf16 %v3820_v7 }
  0xd1   : > { %2775 = vrot.lane.b32.xlu1 %v3543_v1, %s3145_s28 }
  0xd2   : > { %v2616_v27 = vpop.permute.xlu2 %2615  ;;  %v3972_v37 = vsel %vm1455_vm5, %v1427_v35, %v2562_v28  ;;  %v3975_v14 = vsel %vm1455_vm5, %v1428_v26, %v2563_v17  ;;  %v4989_v28 = vld [vmem:[#allocation29_spill] sm:$0xff]  ;;  %v1434_v35 = vsel %vm1422_vm4, %v3342_v10, %v2488_v53  ;;  %v2503_v10 = vunpack.i.h.bf16 %v3802_v20 }
  0xd3   : > { %v2618_v42 = vunpack.i.h.bf16 %v2616_v27  ;;  %v2617_v13 = vunpack.i.l.bf16 %v2616_v27  ;;  %v2566_v49 = vpop.permute.xlu1 %2565  ;;  %v1658_v26 = vpack.c.bf16 %v4989_v28, %v3610_v15 }
  0xd4   : > { %v2568_v57 = vunpack.i.h.bf16 %v2566_v49  ;;  %v2567_v11 = vunpack.i.l.bf16 %v2566_v49  ;;  %v1435_v49 = vsel %vm1422_vm4, %v3278_v24, %v2492_v2 }
  0xd5   : > { %v3986_v5 = vsel %vm1455_vm5, %v1449_v46, %v2617_v13  ;;  %v3989_v17 = vsel %vm1455_vm5, %v1450_v29, %v2618_v42  ;;  %2785 = vrot.lane.b32.xlu0 %v3808_v54, %s3147_s30  ;;  %v1433_v54 = vsel %vm1422_vm4, %v3291_v30, %v2487_v47  ;;  %2263 = vmatmul.msk.bf16.gmra.mxu1 %vm1422_vm4, %v1658_v26  ;;  %v2502_v30 = vunpack.i.l.bf16 %v3802_v20 }
  0xd6   : > { %v1462_v19 = vsel %vm1455_vm5, %v1429_v32, %v2567_v11  ;;  %v1463_v52 = vsel %vm1455_vm5, %v1430_v41, %v2568_v57 }
  0xd7   : > { %v2576_v61 = vpop.permute.xlu0 %2575 }
  0xd8   : > { %2795 = vrot.lane.b32.xlu2 %v4988_v33, %s3146_s29  ;;  %v2578_v45 = vunpack.i.h.bf16 %v2576_v61  ;;  %v2577_v25 = vunpack.i.l.bf16 %v2576_v61 }
  0xd9   : > { %2790 = vrot.lane.b32.xlu1 %v4984_v36, %s3148_s4  ;;  %v1436_v36 = vsel %vm1422_vm4, %v3271_v22, %v2493_v58  ;;  %v2518_v22 = vunpack.i.h.bf16 %v3887_v18 }
  0xda   : > { %v2631_v27 = vpop.permute.xlu2 %2630  ;;  %v4008_v41 = vsel %vm1455_vm5, %v1434_v35, %v2578_v45  ;;  %v4011_v42 = vsel %vm1455_vm5, %v1433_v54, %v2577_v25  ;;  %v2527_v45 = vunpack.i.l.bf16 %v3828_v21 }
  0xdb   : > { %v2633_v15 = vunpack.i.h.bf16 %v2631_v27  ;;  %v2632_v7 = vunpack.i.l.bf16 %v2631_v27  ;;  %v2581_v53 = vpop.permute.xlu1 %2580 }
  0xdc   : > { %v2583_v47 = vunpack.i.h.bf16 %v2581_v53  ;;  %v2582_v13 = vunpack.i.l.bf16 %v2581_v53  ;;  %v2532_v53 = vunpack.i.l.bf16 %v3910_v51 }
  0xdd   : > { %v4021_v29 = vsel %vm1488_vm6, %v1456_v4, %v2632_v7  ;;  %v4024_v46 = vsel %vm1488_vm6, %v1457_v12, %v2633_v15  ;;  %2800 = vrot.lane.b32.xlu0 %v3756_v50, %s3147_s30  ;;  %v1440_v4 = vsel %vm1422_vm4, %v3393_v63, %v2503_v10  ;;  %v1439_v12 = vsel %vm1422_vm4, %v3396_v0, %v2502_v30  ;;  %v4990_v10 = vld [vmem:[#allocation25_spill] sm:$0xff]  ;;  %v4992_v15 = vld [vmem:[#allocation27_spill] sm:$0xff] }
  0xde   : > { %v1469_v20 = vsel %vm1455_vm5, %v1436_v36, %v2583_v47  ;;  %v1468_v57 = vsel %vm1455_vm5, %v1435_v49, %v2582_v13  ;;  %v2517_v50 = vunpack.i.l.bf16 %v3887_v18  ;;  %v1442_v0 = vsel %vm1422_vm4, %v3414_v31, %v2518_v22 }
  0xdf   : > { %v2591_v11 = vpop.permute.xlu0 %2590  ;;  %v2533_v31 = vunpack.i.h.bf16 %v3910_v51  ;;  %v2543_v49 = vunpack.i.h.bf16 %v3867_v43  ;;  %v4993_v51 = vld [vmem:[#allocation16_spill] sm:$0xff] }
  0xe0   : > { %2810 = vrot.lane.b32.xlu2 %v3693_v55, %s3146_s29  ;;  %v2593_v24 = vunpack.i.h.bf16 %v2591_v11  ;;  %v2592_v32 = vunpack.i.l.bf16 %v2591_v11  ;;  %v2528_v55 = vunpack.i.h.bf16 %v3828_v21 }
  0xe1   : > { %2805 = vrot.lane.b32.xlu1 %v3320_v48, %s3148_s4  ;;  %v1441_v48 = vsel %vm1422_vm4, %v3399_v3, %v2517_v50 }
  0xe2   : > { %v2646_v61 = vpop.permute.xlu2 %2645  ;;  %v4041_v58 = vsel %vm1455_vm5, %v1440_v4, %v2593_v24  ;;  %v4044_v33 = vsel %vm1455_vm5, %v1439_v12, %v2592_v32  ;;  %v1448_v24 = vsel %vm1422_vm4, %v4993_v51, %v2533_v31  ;;  %v4994_v4 = vld [vmem:[#allocation15_spill] sm:$0xff]  ;;  %v5002_v51 = vld [vmem:[#allocation24_spill] sm:$0xff] }
  0xe3   : > { %v2648_v63 = vunpack.i.h.bf16 %v2646_v61  ;;  %v2647_v25 = vunpack.i.l.bf16 %v2646_v61  ;;  %v2596_v28 = vpop.permute.xlu1 %2595  ;;  %v1447_v12 = vsel %vm1422_vm4, %v4994_v4, %v2532_v53  ;;  %v5004_v4 = vld [vmem:[#allocation33_spill] sm:$0xff] }
  0xe4   : > { %v2598_v18 = vunpack.i.h.bf16 %v2596_v28  ;;  %v2597_v26 = vunpack.i.l.bf16 %v2596_v28  ;;  %v4996_v28 = vld [vmem:[#allocation47_spill] sm:$0xff] }
  0xe5   : > { %v4053_v35 = vsel %vm1488_vm6, %v1462_v19, %v2647_v25  ;;  %v4056_v54 = vsel %vm1488_vm6, %v1463_v52, %v2648_v63  ;;  %2815 = vrot.lane.b32.xlu0 %v3818_v38, %s3147_s30  ;;  %v4991_v19 = vld [vmem:[#allocation26_spill] sm:$0xff]  ;;  %v1446_v52 = vsel %vm1422_vm4, %v3444_v59, %v2528_v55  ;;  %v1445_v38 = vsel %vm1422_vm4, %v3438_v56, %v2527_v45 }
  0xe6   : > { %v1475_v21 = vsel %vm1455_vm5, %v1442_v0, %v2598_v18  ;;  %v1474_v2 = vsel %vm1455_vm5, %v1441_v48, %v2597_v26  ;;  %v1660_v7 = vpack.c.bf16 %v4992_v15, %v4991_v19  ;;  %v2542_v59 = vunpack.i.l.bf16 %v3867_v43  ;;  %v4995_v55 = vld [vmem:[#allocation54_spill] sm:$0xff] }
  0xe7   : > { %v2606_v27 = vpop.permute.xlu0 %2605  ;;  %v2548_v25 = vunpack.i.h.bf16 %v3929_v44 }
  0xe8   : > { %2825 = vrot.lane.b32.xlu2 %v4990_v10, %s3146_s29  ;;  %v2608_v3 = vunpack.i.h.bf16 %v2606_v27  ;;  %v2607_v30 = vunpack.i.l.bf16 %v2606_v27  ;;  %2264 = vmatmul.msk.bf16.gmra.mxu1 %vm1422_vm4, %v1660_v7  ;;  %v2547_v27 = vunpack.i.l.bf16 %v3929_v44  ;;  %v4999_v7 = vld [vmem:[#allocation21_spill] sm:$0xff] }
  0xe9   : > { %2820 = vrot.lane.b32.xlu1 %v3530_v16, %s3148_s4 }
  0xea   : > { %v2661_v36 = vpop.permute.xlu2 %2660  ;;  %v4075_v47 = vsel %vm1455_vm5, %v1446_v52, %v2608_v3  ;;  %v4078_v13 = vsel %vm1455_vm5, %v1445_v38, %v2607_v30  ;;  %v1454_v52 = vsel %vm1422_vm4, %v4999_v7, %v2548_v25 }
  0xeb   : > { %v2663_v11 = vunpack.i.h.bf16 %v2661_v36  ;;  %v2662_v56 = vunpack.i.l.bf16 %v2661_v36  ;;  %v2611_v22 = vpop.permute.xlu1 %2610  ;;  %v5000_v36 = vld [vmem:[#allocation19_spill] sm:$0xff] }
  0xec   : > { %v2613_v16 = vunpack.i.h.bf16 %v2611_v22  ;;  %v2612_v32 = vunpack.i.l.bf16 %v2611_v22  ;;  %v1453_v44 = vsel %vm1422_vm4, %v5000_v36, %v2547_v27  ;;  %v5010_v36 = vld [vmem:[#allocation28_spill] sm:$0xff] }
  0xed   : > { %v4088_v50 = vsel %vm1488_vm6, %v1468_v57, %v2662_v56  ;;  %v4091_v61 = vsel %vm1488_vm6, %v1469_v20, %v2663_v11  ;;  %2830 = vrot.lane.b32.xlu0 %v4995_v55, %s3147_s30  ;;  %v4997_v57 = vld [vmem:[#allocation18_spill] sm:$0xff]  ;;  %v4998_v20 = vld [vmem:[#allocation17_spill] sm:$0xff] }
  0xee   : > { %v1481_v43 = vsel %vm1455_vm5, %v1448_v24, %v2613_v16  ;;  %v1480_v45 = vsel %vm1455_vm5, %v1447_v12, %v2612_v32  ;;  %v1452_v26 = vsel %vm1422_vm4, %v4997_v57, %v2543_v49  ;;  %v1451_v48 = vsel %vm1422_vm4, %v4998_v20, %v2542_v59  ;;  %v5001_v59 = vld [vmem:[#allocation61_spill] sm:$0xff]  ;;  %v5003_v32 = vld [vmem:[#allocation32_spill] sm:$0xff] }
  0xef   : > { %v2621_v63 = vpop.permute.xlu0 %2620 }
  0xf0   : > { %2840 = vrot.lane.b32.xlu2 %v4996_v28, %s3146_s29  ;;  %v2623_v0 = vunpack.i.h.bf16 %v2621_v63  ;;  %v2622_v18 = vunpack.i.l.bf16 %v2621_v63 }
  0xf1   : > { %2835 = vrot.lane.b32.xlu1 %v3368_v40, %s3148_s4 }
  0xf2   : > { %v2676_v31 = vpop.permute.xlu2 %2675  ;;  %v4108_v10 = vsel %vm1455_vm5, %v1452_v26, %v2623_v0  ;;  %v4111_v3 = vsel %vm1455_vm5, %v1451_v48, %v2622_v18  ;;  %v5006_v48 = vld [vmem:[#allocation46_spill] sm:$0xff] }
  0xf3   : > { %v2678_v30 = vunpack.i.h.bf16 %v2676_v31  ;;  %v2677_v19 = vunpack.i.l.bf16 %v2676_v31  ;;  %v2626_v15 = vpop.permute.xlu1 %2625 }
  0xf4   : > { %v2628_v38 = vunpack.i.h.bf16 %v2626_v15  ;;  %v2627_v53 = vunpack.i.l.bf16 %v2626_v15 }
  0xf5   : > { %v4118_v40 = vsel %vm1488_vm6, %v1474_v2, %v2677_v19  ;;  %v4121_v49 = vsel %vm1488_vm6, %v1475_v21, %v2678_v30  ;;  %2845 = vrot.lane.b32.xlu0 %v5001_v59, %s3147_s30  ;;  %v1662_v2 = vpack.c.bf16 %v5004_v4, %v5003_v32 }
  0xf6   : > { %v1487_v11 = vsel %vm1455_vm5, %v1454_v52, %v2628_v38  ;;  %v1486_v56 = vsel %vm1455_vm5, %v1453_v44, %v2627_v53 }
  0xf7   : > { %v2636_v22 = vpop.permute.xlu0 %2635 }
  0xf8   : > { %2855 = vrot.lane.b32.xlu2 %v5002_v51, %s3146_s29  ;;  %v2638_v24 = vunpack.i.h.bf16 %v2636_v22  ;;  %v2637_v16 = vunpack.i.l.bf16 %v2636_v22  ;;  %2265 = vmatmul.msk.bf16.gmra.mxu1 %vm1422_vm4, %v1662_v2  ;;  %v5012_v22 = vld [vmem:[#allocation38_spill] sm:$0xff] }
  0xf9   : > { %2850 = vrot.lane.b32.xlu1 %v4987_v8, %s3148_s4 }
  0xfa   : > { %v2691_v21 = vpop.permute.xlu2 %2690  ;;  %v4135_v12 = vsel %vm1488_vm6, %v3880_v6, %v2638_v24  ;;  %v4139_v55 = vsel %vm1488_vm6, %v3883_v9, %v2637_v16  ;;  %v5005_v6 = vld [vmem:[#allocation55_spill] sm:$0xff]  ;;  %v5013_v24 = vld [vmem:[#allocation70_spill] sm:$0xff] }
  0xfb   : > { %v2693_v63 = vunpack.i.h.bf16 %v2691_v21  ;;  %v2692_v25 = vunpack.i.l.bf16 %v2691_v21  ;;  %v2641_v28 = vpop.permute.xlu1 %2640  ;;  %v5014_v16 = vld [vmem:[#allocation71_spill] sm:$0xff] }
  0xfc   : > { %v2643_v0 = vunpack.i.h.bf16 %v2641_v28  ;;  %v2642_v18 = vunpack.i.l.bf16 %v2641_v28 }
  0xfd   : > { %v4143_v57 = vsel %vm1488_vm6, %v1480_v45, %v2692_v25  ;;  %v4146_v8 = vsel %vm1488_vm6, %v1481_v43, %v2693_v63  ;;  %2860 = vrot.lane.b32.xlu0 %v5005_v6, %s3147_s30  ;;  %v5015_v63 = vld [vmem:[#allocation57_spill] sm:$0xff]  ;;  %v5016_v25 = vld [vmem:[#allocation67_spill] sm:$0xff] }
  0xfe   : > { %v1493_v9 = vsel %vm1488_vm6, %v3972_v37, %v2642_v18  ;;  %v1494_v26 = vsel %vm1488_vm6, %v3975_v14, %v2643_v0  ;;  %v968_v28 = vrot.slane %v5016_v25, 1  ;;  %v5017_v0 = vld [vmem:[#allocation66_spill] sm:$0xff]  ;;  %v5018_v6 = vld [vmem:[#allocation63_spill] sm:$0xff] }
  0xff   : > { %v2651_v20 = vpop.permute.xlu0 %2650  ;;  %v969_v18 = vrot.slane %v5017_v0, 1 }
 0x100   : > { %2870 = vrot.lane.b32.xlu2 %v5006_v48, %s3146_s29  ;;  %v2653_v27 = vunpack.i.h.bf16 %v2651_v20  ;;  %v2652_v31 = vunpack.i.l.bf16 %v2651_v20  ;;  %v971_v20 = vrot.slane %v5018_v6, 1 }
 0x101   : > { %2865 = vrot.lane.b32.xlu1 %v3303_v39, %s3148_s4  ;;  %v5009_v39 = vld [vmem:[#allocation65_spill] sm:$0xff] }
 0x102   : > { %v2706_v43 = vpop.permute.xlu2 %2705  ;;  %v4160_v45 = vsel %vm1488_vm6, %v3906_v34, %v2653_v27  ;;  %v4164_v37 = vsel %vm1488_vm6, %v3903_v60, %v2652_v31  ;;  %v5019_v27 = vld [vmem:[#allocation50_spill] sm:$0xff] }
 0x103   : > { %v2708_v30 = vunpack.i.h.bf16 %v2706_v43  ;;  %v2707_v14 = vunpack.i.l.bf16 %v2706_v43  ;;  %v2656_v19 = vpop.permute.xlu1 %2655  ;;  %v5020_v43 = vld [vmem:[#allocation11_spill] sm:$0xff] }
 0x104   : > { %v2658_v15 = vunpack.i.h.bf16 %v2656_v19  ;;  %v2657_v7 = vunpack.i.l.bf16 %v2656_v19 }
 0x105   : > { %v4167_v52 = vsel %vm1488_vm6, %v1486_v56, %v2707_v14  ;;  %v4170_v38 = vsel %vm1488_vm6, %v1487_v11, %v2708_v30  ;;  %2875 = vrot.lane.b32.xlu0 %v5009_v39, %s3147_s30  ;;  %v5011_v56 = vld [vmem:[#allocation37_spill] sm:$0xff] }
 0x106   : > { %5007 = vst [vmem:[#allocation20_spill] sm:$0xff] %v4167_v52  ;;  %v1500_v34 = vsel %vm1488_vm6, %v4008_v41, %v2658_v15  ;;  %v1499_v60 = vsel %vm1488_vm6, %v4011_v42, %v2657_v7  ;;  %v1664_v11 = vpack.c.bf16 %v5012_v22, %v5011_v56  ;;  %v970_v15 = vsel %vm532_vm1, %v968_v28, %v969_v18  ;;  %v5021_v56 = vld [vmem:[#allocation69_spill] sm:$0xff]  ;;  %v5023_v28 = vld [vmem:[#allocation34_spill] sm:$0xff] }
 0x107   : > { %5008 = vst [vmem:[#allocation8_spill] sm:$0xff] %v4170_v38  ;;  %v2666_v53 = vpop.permute.xlu0 %2665  ;;  %v972_v7 = vsel %vm532_vm1, %v969_v18, %v971_v20  ;;  %v5024_v18 = vld [vmem:[#allocation35_spill] sm:$0xff] }
 0x108   : > { %2885 = vrot.lane.b32.xlu2 %v5010_v36, %s3146_s29  ;;  %v2668_v44 = vunpack.i.h.bf16 %v2666_v53  ;;  %v2667_v59 = vunpack.i.l.bf16 %v2666_v53  ;;  %2266 = vmatmul.msk.bf16.gmra.mxu1 %vm1422_vm4, %v1664_v11  ;;  %v4231_v22 = vpack.i.bf16 %v972_v7, %v970_v15  ;;  %v2290_v11 = vld [vmem:[#allocation2 + $0x30] sm:$0xff]  ;;  %v2366_v15 = vld [vmem:[%s4247_s7] sm:$0xff]  }
 0x109   : > { %2880 = vrot.lane.b32.xlu1 %v3543_v1, %s3148_s4  ;;  %v2288_v7 = vld [vmem:[#allocation2 + $0x20] sm:$0xff] }
 0x10a   : > { %v2721_v51 = vpop.permute.xlu2 %2720  ;;  %v4186_v41 = vsel %vm1488_vm6, %v5013_v24, %v2667_v59  ;;  %v4190_v42 = vsel %vm1488_vm6, %v5014_v16, %v2668_v44 }
 0x10b   : > { %v2723_v32 = vunpack.i.h.bf16 %v2721_v51  ;;  %v2722_v4 = vunpack.i.l.bf16 %v2721_v51  ;;  %v4193_v2 = vpop.permute.xlu1 %2670 }
 0x10d   : > { %v4197_v21 = vsel %vm1521_vm7, %v1493_v9, %v2722_v4  ;;  %v4200_v1 = vsel %vm1521_vm7, %v1494_v26, %v2723_v32  ;;  %2890 = vrot.lane.b32.xlu0 %v5015_v63, %s3147_s30  ;;  %v2291_v26 = vld [vmem:[#allocation2 + $0x38] sm:$0xff] }
 0x10e   : > { %2390 = vmatpush.bf16.msra.mxu2 %v2291_v26  ;;  %1809 = vmatpush.bf16.msra.mxu0 %v2291_v26 }
 0x10f   : > { %v2681_v48 = vpop.permute.xlu0 %2680 }
 0x110   : > { %2900 = vrot.lane.b32.xlu2 %v5019_v27, %s3146_s29  ;;  %v2683_v31 = vunpack.i.h.bf16 %v2681_v48  ;;  %v2682_v9 = vunpack.i.l.bf16 %v2681_v48  ;;  %v1666_v48 = vpack.c.bf16 %v5024_v18, %v5023_v28  ;;  %v4296_v28 = vld [vmem:[%s4247_s7 + $0x8] sm:$0xff]  }
 0x111   : > { %2895 = vrot.lane.b32.xlu1 %v5020_v43, %s3148_s4 }
 0x112   : > { %v2736_v30 = vpop.permute.xlu2 %2735  ;;  %v4213_v14 = vsel %vm1488_vm6, %v3950_v62, %v2682_v9  ;;  %v4217_v19 = vsel %vm1488_vm6, %v3953_v23, %v2683_v31  ;;  %2391 = vmatpush.bf16.msra.mxu2 %v2290_v11  ;;  %1810 = vmatpush.bf16.msra.mxu0 %v2290_v11  ;;  %v5025_v31 = vld [vmem:[#allocation62_spill] sm:$0xff]  ;;  %v2367_v11 = vunpack.c.l.bf16 %v2366_v15 }
 0x113   : > { %v2738_v39 = vunpack.i.h.bf16 %v2736_v30  ;;  %v2737_v53 = vunpack.i.l.bf16 %v2736_v30  ;;  %v2686_v36 = vpop.permute.xlu1 %2685  ;;  %v4263_v9 = vsel %vm381_vm0, %v5025_v31, 0.0 }
 0x114   : > { %v2688_v44 = vunpack.i.h.bf16 %v2686_v36  ;;  %v2687_v62 = vunpack.i.l.bf16 %v2686_v36  ;;  %v975_v36 = vrot.slane %v4263_v9, 1 }
 0x115   : > { %v4224_v59 = vsel %vm1521_vm7, %v1499_v60, %v2737_v53  ;;  %v4227_v23 = vsel %vm1521_vm7, %v1500_v34, %v2738_v39  ;;  %2905 = vrot.lane.b32.xlu0 %v5021_v56, %s3147_s30  ;;  %v5022_v34 = vld [vmem:[#allocation31_spill] sm:$0xff]  ;;  %v5028_v56 = vld [vmem:[#allocation53_spill] sm:$0xff] }
 0x116   : > { %v4235_v51 = vsel %vm1488_vm6, %v4075_v47, %v2688_v44  ;;  %v4239_v24 = vsel %vm1488_vm6, %v4078_v13, %v2687_v62  ;;  %v2289_v47 = vld [vmem:[#allocation2 + $0x28] sm:$0xff]  ;;  %v335_v44 = vstv %s334_s12 }
 0x117   : > { %v2696_v60 = vpop.permute.xlu0 %2695  ;;  %2392 = vmatpush.bf16.msra.mxu2 %v2289_v47  ;;  %1811 = vmatpush.bf16.msra.mxu0 %v2289_v47  ;;  %vm4285_vm8 = vcmp.eq.s32.totalorder %v335_v44, 1 }
 0x118   : > { %2915 = vrot.lane.b32.xlu2 %v5022_v34, %s3146_s29  ;;  %v2698_v16 = vunpack.i.h.bf16 %v2696_v60  ;;  %v2697_v32 = vunpack.i.l.bf16 %v2696_v60  ;;  %2267 = vmatmul.msk.bf16.gmra.mxu1 %vm1422_vm4, %v1666_v48  ;;  %v5029_v60 = vld [vmem:[#allocation10_spill] sm:$0xff]  ;;  %v337_v48 = vsel %vm4285_vm8, %v2367_v11, 0.0  ;;  %v5035_v11 = vld [vmem:[#allocation41_spill] sm:$0xff] }
 0x119   : > { %2910 = vrot.lane.b32.xlu1 %v4231_v22, %s3148_s4 }
 0x11a   : > { %v4249_v4 = vpop.permute.xlu2 %2750  ;;  %v4253_v13 = vsel %vm1488_vm6, %v3986_v5, %v2697_v32  ;;  %v4257_v63 = vsel %vm1488_vm6, %v3989_v17, %v2698_v16  ;;  %v5026_v5 = vld [vmem:[#allocation56_spill] sm:$0xff] }
 0x11b   : > { %v2701_v27 = vpop.permute.xlu1 %2700  ;;  %v5027_v17 = vld [vmem:[#allocation64_spill] sm:$0xff]  ;;  %2393 = vmatpush.bf16.msra.mxu2 %v2288_v7  ;;  %1812 = vmatpush.bf16.msra.mxu0 %v2288_v7 }
 0x11c   : > { %v2703_v43 = vunpack.i.h.bf16 %v2701_v27  ;;  %v2702_v26 = vunpack.i.l.bf16 %v2701_v27  ;;  %v973_v30 = vrot.slane %v5027_v17, 1  ;;  %v5032_v27 = vld [vmem:[#allocation68_spill] sm:$0xff]  ;;  %v1078_v34 = vrot.slane %v5027_v17, 2 }
 0x11d   : > { %2920 = vrot.lane.b32.xlu0 %v5026_v5, %s3147_s30  ;;  %v5049_v17 = vrot.slane %v5018_v6, 2 }
 0x11e   : > { %v4272_v39 = vsel %vm1488_vm6, %v4108_v10, %v2703_v43  ;;  %v4276_v53 = vsel %vm1488_vm6, %v4111_v3, %v2702_v26  ;;  %v2368_v10 = vunpack.c.h.bf16 %v2366_v15  ;;  %v2287_v3 = vld [vmem:[#allocation2 + $0x18] sm:$0xff]  ;;  %v974_v32 = vsel %vm532_vm1, %v971_v20, %v973_v30  ;;  %v2286_v26 = vld [vmem:[#allocation2 + $0x10] sm:$0xff] }
 0x11f   : > { %v4279_v62 = vpop.permute.xlu0 %2710  ;;  %v976_v47 = vsel %vm532_vm1, %v973_v30, %v975_v36  ;;  %2394 = vmatpush.bf16.msra.mxu2 %v2287_v3  ;;  %1813 = vmatpush.bf16.msra.mxu0 %v2287_v3  ;;  %v2371_v43 = vunpack.c.l.bf16 %v4296_v28  ;;  %v445_v30 = vrot.slane %v337_v48, 7  ;;  %v5033_v15 = vld [vmem:[#allocation30_spill] sm:$0xff]  ;;  %v1073_v3 = vrot.slane %v5016_v25, 2 }
 0x120   : > { %2930 = vrot.lane.b32.xlu2 %v5028_v56, %s3146_s29  ;;  %v4304_v31 = vpack.i.bf16 %v976_v47, %v974_v32  ;;  %v338_v20 = vsel %vm4285_vm8, %v2368_v10, 0.0  ;;  %v5034_v56 = vld [vmem:[#allocation40_spill] sm:$0xff]  ;;  %v1074_v10 = vrot.slane %v5017_v0, 2 }
 0x121   : > { %2925 = vrot.lane.b32.xlu1 %v5029_v60, %s3148_s4  ;;  %v446_v44 = vrot.slane %v338_v20, 7  ;;  %v1668_v60 = vpack.c.bf16 %v5035_v11, %v5034_v56  ;;  %v2285_v32 = vld [vmem:[#allocation2 + $0x8] sm:$0xff]  ;;  %v339_v47 = vsel %vm4285_vm8, %v2371_v43, 0.0  ;;  %v4331_v0 = vsel %vm381_vm0, 0.0, %v445_v30  ;;  %v2284_v11 = vld [vmem:[#allocation2] sm:$0xff] }
 0x122   : > { %v4289_v16 = vpop.permute.xlu2 %2765 }
 0x123   : > { %v4298_v18 = vpop.permute.xlu1 %2715  ;;  %2395 = vmatpush.bf16.msra.mxu2 %v2286_v26  ;;  %1814 = vmatpush.bf16.msra.mxu0 %v2286_v26  ;;  %v4915_v26 = vrot.slane %v5018_v6, 2  ;;  %v4334_v56 = vsel %vm381_vm0, %v445_v30, %v446_v44 }
 0x125   : > { %2935 = vrot.lane.b32.xlu0 %v5032_v27, %s3147_s30 }
 0x127   : > { %v2726_v5 = vpop.permute.xlu0 %2725  ;;  %2396 = vmatpush.bf16.msra.mxu2 %v2285_v32  ;;  %1815 = vmatpush.bf16.msra.mxu0 %v2285_v32 }
 0x128   : > { %2945 = vrot.lane.b32.xlu2 %v5033_v15, %s3146_s29  ;;  %v2728_v7 = vunpack.i.h.bf16 %v2726_v5  ;;  %v2727_v36 = vunpack.i.l.bf16 %v2726_v5  ;;  %v448_v5 = vrot.slane %v339_v47, 7  ;;  %2268 = vmatmul.msk.bf16.gmra.mxu1 %vm1422_vm4, %v1668_v60  ;;  %v4359_v60 = vsel %vm701_vm3, %v1074_v10, %v4915_v26 }
 0x129   : > { %2940 = vrot.lane.b32.xlu1 %v4304_v31, %s3148_s4 }
 0x12a   : > { %v4319_v48 = vpop.permute.xlu2 %2780  ;;  %v4323_v27 = vsel %vm1521_vm7, %v4053_v35, %v2727_v36  ;;  %v4327_v20 = vsel %vm1521_vm7, %v4056_v54, %v2728_v7  ;;  %v4338_v35 = vsel %vm381_vm0, %v446_v44, %v448_v5  ;;  %v5036_v54 = vld [vmem:[#allocation58_spill] sm:$0xff]  ;;  %v1276_v7 = vrot.slane %v4331_v0, 1 }
 0x12b   : > { %v2731_v25 = vpop.permute.xlu1 %2730  ;;  %v1277_v36 = vrot.slane %v4334_v56, 1  ;;  %v4916_v32 = vrot.slane %v4338_v35, 1  ;;  %v4354_v44 = vsel %vm701_vm3, %v1073_v3, %v1074_v10  ;;  %2397 = vmatpush.bf16.msra.mxu2 %v2284_v11  ;;  %1816 = vmatpush.bf16.msra.mxu0 %v2284_v11 }
 0x12c   : > { %v2733_v43 = vunpack.i.h.bf16 %v2731_v25  ;;  %v2732_v15 = vunpack.i.l.bf16 %v2731_v25 }
 0x12d   : > { %2950 = vrot.lane.b32.xlu0 %v5036_v54, %s3147_s30  ;;  %v5037_v54 = vld [vmem:[#allocation12_spill] sm:$0xff]  ;;  %v1278_v3 = vsel %vm532_vm1, %v1276_v7, %v1277_v36  ;;  %v1280_v10 = vsel %vm532_vm1, %v1277_v36, %v4916_v32  ;;  %v2969_v36 = vpack.i.bf16 %v4334_v56, %v4331_v0 }
 0x12e   : > { %v4347_v47 = vsel %vm1521_vm7, %v4160_v45, %v2733_v43  ;;  %v4351_v30 = vsel %vm1521_vm7, %v4164_v37, %v2732_v15  ;;  %v2964_v37 = vpack.i.bf16 %v4359_v60, %v4354_v44  ;;  %v2974_v7 = vpack.i.bf16 %v1280_v10, %v1278_v3 }
 0x12f   : > { %v2741_v25 = vpop.permute.xlu0 %2740 }
 0x130   : > { %2960 = vrot.lane.b32.xlu2 %v4231_v22, %s3145_s28  ;;  %v2743_v45 = vunpack.i.h.bf16 %v2741_v25  ;;  %v2742_v43 = vunpack.i.l.bf16 %v2741_v25 }
 0x131   : > { %2955 = vrot.lane.b32.xlu1 %v5037_v54, %s3148_s4  ;;  %v2372_v54 = vunpack.c.h.bf16 %v4296_v28 }
 0x132   : > { %v4371_v15 = vpop.permute.xlu2 %2795  ;;  %v4375_v11 = vsel %vm1521_vm7, %v4088_v50, %v2742_v43  ;;  %v4379_v22 = vsel %vm1521_vm7, %v4091_v61, %v2743_v45  ;;  %v4397_v45 = vpop.f32.mrf.mxu1  ;;  %v5043_v43 = vld [vmem:[#allocation44_spill] sm:$0xff] }
 0x133   : > { %5038 = vst [vmem:[#allocation9_spill] sm:$0xff] %v4375_v11  ;;  %v2746_v25 = vpop.permute.xlu1 %2745  ;;  %v340_v28 = vsel %vm4285_vm8, %v2372_v54, 0.0 }
 0x134   : > { %5039 = vst [vmem:[#allocation22_spill] sm:$0xff] %v4379_v22  ;;  %v2748_v26 = vunpack.i.h.bf16 %v2746_v25  ;;  %v2747_v38 = vunpack.i.l.bf16 %v2746_v25 }
 0x135   : > { %2965 = vrot.lane.b32.xlu0 %v2964_v37, %s3146_s29  ;;  %5042 = vst [vmem:[#allocation25_spill] sm:$0xff] %v4397_v45  ;;  %v5044_v37 = vld [vmem:[#allocation45_spill] sm:$0xff] }
 0x136   : > { %v4387_v32 = vsel %vm1521_vm7, %v4186_v41, %v2747_v38  ;;  %v4391_v50 = vsel %vm1521_vm7, %v4190_v42, %v2748_v26  ;;  %v1670_v3 = vpack.c.bf16 %v5044_v37, %v5043_v43  ;;  %v450_v41 = vrot.slane %v340_v28, 7  ;;  %v5045_v42 = vld [vmem:[#allocation36_spill] sm:$0xff]  ;;  %v5047_v37 = vld [vmem:[#allocation14_spill] sm:$0xff] }
 0x137   : > { %5040 = vst [vmem:[#allocation23_spill] sm:$0xff] %v4387_v32  ;;  %v4393_v61 = vpop.permute.xlu0 %2755  ;;  %v1080_v26 = vrot.slane %v4263_v9, 2  ;;  %v4427_v9 = vsel %vm701_vm3, %v5049_v17, %v1078_v34  ;;  %v5051_v17 = vld [vmem:[#allocation43_spill] sm:$0xff] }
 0x138   : > { %5041 = vst [vmem:[#allocation29_spill] sm:$0xff] %v4391_v50  ;;  %2975 = vrot.lane.b32.xlu2 %v2974_v7, %s3148_s4  ;;  %2269 = vmatmul.msk.bf16.gmra.mxu1 %vm1422_vm4, %v1670_v3  ;;  %v4413_v25 = vsel %vm381_vm0, %v448_v5, %v450_v41  ;;  %v4416_v7 = vsel %vm381_vm0, %v450_v41, 0.0  ;;  %v5048_v3 = vld [vmem:[#allocation60_spill] sm:$0xff]  ;;  %v2753_v50 = vunpack.i.h.bf16 %v4249_v4 }
 0x139   : > { %2970 = vrot.lane.b32.xlu1 %v2969_v36, %s3147_s30  ;;  %v4430_v5 = vsel %vm701_vm3, %v1078_v34, %v1080_v26  ;;  %v1281_v41 = vrot.slane %v4413_v25, 1  ;;  %v1283_v6 = vrot.slane %v4416_v7, 1  ;;  %v2673_v34 = vunpack.i.h.bf16 %v4193_v2 }
 0x13a   : > { %v4403_v38 = vpop.permute.xlu2 %2810  ;;  %v4418_v36 = vpop.f32.mrf.mxu1  ;;  %v2672_v26 = vunpack.i.l.bf16 %v4193_v2  ;;  %v2999_v2 = vpack.i.bf16 %v4430_v5, %v4427_v9 }
 0x13b   : > { %v4405_v10 = vpop.permute.xlu1 %2760  ;;  %5046 = vst [vmem:[#allocation26_spill] sm:$0xff] %v4418_v36 }
 0x13d   : > { %2980 = vrot.lane.b32.xlu0 %v5045_v42, %s3146_s29 }
 0x13f   : > { %v2771_v54 = vpop.permute.xlu0 %2770 }
 0x140   : > { %v2773_v28 = vunpack.i.h.bf16 %v2771_v54  ;;  %v2772_v43 = vunpack.i.l.bf16 %v2771_v54  ;;  %2990 = vrot.lane.b32.xlu2 %v5047_v37, %s3148_s4 }
 0x141   : > { %2985 = vrot.lane.b32.xlu1 %v5048_v3, %s3147_s30  ;;  %v5050_v3 = vld [vmem:[#allocation42_spill] sm:$0xff] }
 0x142   : > { %v4433_v42 = vpop.permute.xlu2 %2825  ;;  %v4437_v54 = vsel %vm1521_vm7, %v4143_v57, %v2772_v43  ;;  %v4441_v37 = vsel %vm1521_vm7, %v4146_v8, %v2773_v28  ;;  %v1672_v36 = vpack.c.bf16 %v5051_v17, %v5050_v3  ;;  %v3004_v57 = vpack.i.bf16 %v4413_v25, %v4338_v35  ;;  %v4473_v22 = vpop.f32.mrf.mxu1 }
 0x143   : > { %v2776_v45 = vpop.permute.xlu1 %2775  ;;  %v2752_v8 = vunpack.i.l.bf16 %v4249_v4  ;;  %v2783_v28 = vunpack.i.h.bf16 %v4319_v48  ;;  %v2782_v43 = vunpack.i.l.bf16 %v4319_v48  ;;  %v5052_v4 = vrot.slane %v4338_v35, 1 }
 0x144   : > { %v2778_v32 = vunpack.i.h.bf16 %v2776_v45  ;;  %v2777_v52 = vunpack.i.l.bf16 %v2776_v45  ;;  %2270 = vmatmul.msk.bf16.vlgmr.msra.gmra.mxu3 %vm1422_vm4, %v1672_v36  ;;  %v1284_v48 = vsel %vm532_vm1, %v1281_v41, %v1283_v6 }
 0x145   : > { %2995 = vrot.lane.b32.xlu0 %v4304_v31, %s3145_s28  ;;  %v1282_v36 = vsel %vm532_vm1, %v5052_v4, %v1281_v41  ;;  %v1506_v31 = vsel %vm1488_vm6, %v4041_v58, %v2673_v34 }
 0x146   : > { %v4461_v45 = vsel %vm1521_vm7, %v4253_v13, %v2777_v52  ;;  %v4465_v3 = vsel %vm1521_vm7, %v4257_v63, %v2778_v32  ;;  %v1505_v52 = vsel %vm1488_vm6, %v4044_v33, %v2672_v26  ;;  %v1539_v32 = vsel %vm1521_vm7, %v1506_v31, %v2753_v50 }
 0x147   : > { %v2786_v17 = vpop.permute.xlu0 %2785  ;;  %v1538_v63 = vsel %vm1521_vm7, %v1505_v52, %v2752_v8  ;;  %v3009_v41 = vpack.i.bf16 %v1284_v48, %v1282_v36  ;;  %v1572_v6 = vsel %vm1554_vm9, %v1539_v32, %v2783_v28  ;;  %v2713_v8 = vunpack.i.h.bf16 %v4279_v62 }
 0x148   : > { %v2788_v13 = vunpack.i.h.bf16 %v2786_v17  ;;  %v2787_v11 = vunpack.i.l.bf16 %v2786_v17  ;;  %3005 = vrot.lane.b32.xlu2 %v3004_v57, %s3147_s30  ;;  %v1571_v58 = vsel %vm1554_vm9, %v1538_v63, %v2782_v43  ;;  %v2712_v50 = vunpack.i.l.bf16 %v4279_v62 }
 0x149   : > { %3000 = vrot.lane.b32.xlu1 %v2999_v2, %s3146_s29  ;;  %v2798_v43 = vunpack.i.h.bf16 %v4371_v15  ;;  %v2797_v28 = vunpack.i.l.bf16 %v4371_v15  ;;  %v1523_v32 = vsel %vm1521_vm7, %v4024_v46, %v2713_v8  ;;  %v5054_v15 = vld [vmem:[#allocation39_spill] sm:$0xff] }
 0x14a   : > { %v1604_v4 = vsel %vm1587_vm10, %v1571_v58, %v2787_v11  ;;  %v1605_v33 = vsel %vm1587_vm10, %v1572_v6, %v2788_v13  ;;  %v4485_v26 = vpop.permute.xlu2 %2840  ;;  %v5053_v13 = vld [vmem:[#allocation59_spill] sm:$0xff]  ;;  %v4496_v63 = vpop.f32.mrf.mxu1  ;;  %v1522_v62 = vsel %vm1521_vm7, %v4021_v29, %v2712_v50  ;;  %v5055_v6 = vld [vmem:[#allocation48_spill] sm:$0xff] }
 0x14b   : > { %v2791_v34 = vpop.permute.xlu1 %2790  ;;  %v1556_v58 = vsel %vm1554_vm9, %v1523_v32, %v2798_v43  ;;  %v2813_v43 = vunpack.i.h.bf16 %v4403_v38 }
 0x14c   : > { %v2793_v57 = vunpack.i.h.bf16 %v2791_v34  ;;  %v2792_v17 = vunpack.i.l.bf16 %v2791_v34  ;;  %v5056_v34 = vld [vmem:[#allocation49_spill] sm:$0xff] }
 0x14d   : > { %3010 = vrot.lane.b32.xlu0 %v3009_v41, %s3148_s4  ;;  %v1555_v41 = vsel %vm1554_vm9, %v1522_v62, %v2797_v28  ;;  %v5057_v28 = vld [vmem:[#allocation13_spill] sm:$0xff] }
 0x14e   : > { %v1637_v2 = vsel %vm1620_vm11, %v1604_v4, %v2792_v17  ;;  %v1638_v11 = vsel %vm1620_vm11, %v1605_v33, %v2793_v57  ;;  %v1674_v4 = vpack.c.bf16 %v5056_v34, %v5055_v6  ;;  %v2758_v33 = vunpack.i.h.bf16 %v4393_v61 }
 0x14f   : > { %v1669_v36 = vpack.c.bf16 %v1638_v11, %v1637_v2  ;;  %v2801_v48 = vpop.permute.xlu0 %2800  ;;  %v2757_v57 = vunpack.i.l.bf16 %v4393_v61  ;;  %v2812_v2 = vunpack.i.l.bf16 %v4403_v38 }
 0x150   : > { %v2803_v31 = vunpack.i.h.bf16 %v2801_v48  ;;  %v2802_v52 = vunpack.i.l.bf16 %v2801_v48  ;;  %3020 = vrot.lane.b32.xlu2 %v5053_v13, %s3147_s30 }
 0x151   : > { %3015 = vrot.lane.b32.xlu1 %v5054_v15, %s3146_s29  ;;  %1857 = vmatmul.bf16.vlgmr.msra.gmra.mxu2 %v1669_v36  ;;  %v1540_v48 = vsel %vm1521_vm7, %v4118_v40, %v2757_v57  ;;  %v2828_v57 = vunpack.i.h.bf16 %v4433_v42 }
 0x152   : > { %v1588_v29 = vsel %vm1587_vm10, %v1555_v41, %v2802_v52  ;;  %v1589_v46 = vsel %vm1587_vm10, %v1556_v58, %v2803_v31  ;;  %v4517_v11 = vpop.permute.xlu2 %2855  ;;  %v1541_v31 = vsel %vm1521_vm7, %v4121_v49, %v2758_v33  ;;  %v1573_v15 = vsel %vm1554_vm9, %v1540_v48, %v2812_v2  ;;  %v4527_v41 = vpop.f32.mrf.mxu1  ;;  %v5058_v48 = vld [vmem:[#allocation51_spill] sm:$0xff] }
 0x153   : > { %v2806_v17 = vpop.permute.xlu1 %2805  ;;  %v1574_v38 = vsel %vm1554_vm9, %v1541_v31, %v2813_v43  ;;  %v2718_v49 = vunpack.i.h.bf16 %v4298_v18  ;;  %v2717_v33 = vunpack.i.l.bf16 %v4298_v18  ;;  %v5059_v31 = vld [vmem:[#allocation52_spill] sm:$0xff] }
 0x154   : > { %v2808_v8 = vunpack.i.h.bf16 %v2806_v17  ;;  %v2807_v50 = vunpack.i.l.bf16 %v2806_v17  ;;  %2271 = vmatmul.msk.bf16.gmra.mxu3 %vm1422_vm4, %v1674_v4  ;;  %v2827_v17 = vunpack.i.l.bf16 %v4433_v42 }
 0x155   : > { %3025 = vrot.lane.b32.xlu0 %v5057_v28, %s3148_s4  ;;  %v1524_v18 = vsel %vm1521_vm7, %v4139_v55, %v2717_v33  ;;  %v2762_v55 = vunpack.i.l.bf16 %v4405_v10 }
 0x156   : > { %v1621_v61 = vsel %vm1620_vm11, %v1588_v29, %v2807_v50  ;;  %v1622_v36 = vsel %vm1620_vm11, %v1589_v46, %v2808_v8 }
 0x157   : > { %v1653_v52 = vpack.c.bf16 %v1622_v36, %v1621_v61  ;;  %v2816_v13 = vpop.permute.xlu0 %2815  ;;  %v1525_v61 = vsel %vm1521_vm7, %v4135_v12, %v2718_v49  ;;  %v1557_v36 = vsel %vm1554_vm9, %v1524_v18, %v2827_v17  ;;  %v2763_v12 = vunpack.i.h.bf16 %v4405_v10 }
 0x158   : > { %v2818_v62 = vunpack.i.h.bf16 %v2816_v13  ;;  %v2817_v32 = vunpack.i.l.bf16 %v2816_v13  ;;  %v1558_v42 = vsel %vm1554_vm9, %v1525_v61, %v2828_v57 }
 0x159   : > { %1817 = vmatmul.bf16.vlgmr.msra.gmra.mxu0 %v1653_v52  ;;  %v1676_v52 = vpack.c.bf16 %v5059_v31, %v5058_v48 }
 0x15a   : > { %v1606_v6 = vsel %vm1587_vm10, %v1573_v15, %v2817_v32  ;;  %v1607_v34 = vsel %vm1587_vm10, %v1574_v38, %v2818_v62  ;;  %v4537_v28 = vpop.permute.xlu2 %2870 }
 0x15b   : > { %v2821_v58 = vpop.permute.xlu1 %2820 }
 0x15c   : > { %v2823_v40 = vunpack.i.h.bf16 %v2821_v58  ;;  %v2822_v4 = vunpack.i.l.bf16 %v2821_v58  ;;  %v4549_v58 = vpop.f32.mrf.mxu1 }
 0x15e   : > { %v1639_v29 = vsel %vm1620_vm11, %v1606_v6, %v2822_v4  ;;  %v1640_v46 = vsel %vm1620_vm11, %v1607_v34, %v2823_v40  ;;  %v2843_v6 = vunpack.i.h.bf16 %v4485_v26  ;;  %v2842_v34 = vunpack.i.l.bf16 %v4485_v26 }
 0x15f   : > { %v1671_v8 = vpack.c.bf16 %v1640_v46, %v1639_v29  ;;  %v2831_v50 = vpop.permute.xlu0 %2830  ;;  %v1542_v29 = vsel %vm1521_vm7, %v4213_v14, %v2762_v55  ;;  %v1543_v46 = vsel %vm1521_vm7, %v4217_v19, %v2763_v12  ;;  %v2857_v14 = vunpack.i.l.bf16 %v4517_v11 }
 0x160   : > { %v2833_v43 = vunpack.i.h.bf16 %v2831_v50  ;;  %v2832_v2 = vunpack.i.l.bf16 %v2831_v50  ;;  %v1575_v10 = vsel %vm1554_vm9, %v1542_v29, %v2842_v34 }
 0x161   : > { %1862 = vmatmul.bf16.gmra.mxu2 %v1671_v8  ;;  %v1576_v8 = vsel %vm1554_vm9, %v1543_v46, %v2843_v6 }
 0x162   : > { %v1590_v62 = vsel %vm1587_vm10, %v1557_v36, %v2832_v2  ;;  %v1591_v32 = vsel %vm1587_vm10, %v1558_v42, %v2833_v43  ;;  %v2886_v26 = vpop.permute.xlu2 %2885  ;;  %v2858_v36 = vunpack.i.h.bf16 %v4517_v11  ;;  %v1678_v11 = vpack.c.bf16 %v4359_v60, %v4354_v44 }
 0x163   : > { %v2836_v13 = vpop.permute.xlu1 %2835 }
 0x164   : > { %v2838_v15 = vunpack.i.h.bf16 %v2836_v13  ;;  %v2837_v38 = vunpack.i.l.bf16 %v2836_v13  ;;  %2272 = vmatmul.msk.bf16.gmra.mxu3 %vm1422_vm4, %v1676_v52 }
 0x165   : > { %v4570_v48 = vpop.f32.mrf.mxu1 }
 0x166   : > { %v1623_v40 = vsel %vm1620_vm11, %v1590_v62, %v2837_v38  ;;  %v1624_v4 = vsel %vm1620_vm11, %v1591_v32, %v2838_v15  ;;  %v1559_v32 = vsel %vm1554_vm9, %v4197_v21, %v2857_v14  ;;  %v1560_v15 = vsel %vm1554_vm9, %v4200_v1, %v2858_v36 }
 0x167   : > { %v1655_v49 = vpack.c.bf16 %v1624_v4, %v1623_v40  ;;  %v2846_v33 = vpop.permute.xlu0 %2845  ;;  %v2768_v4 = vunpack.i.h.bf16 %v4289_v16  ;;  %v2767_v21 = vunpack.i.l.bf16 %v4289_v16  ;;  %v2872_v1 = vunpack.i.l.bf16 %v4537_v28 }
 0x168   : > { %v2848_v57 = vunpack.i.h.bf16 %v2846_v33  ;;  %v2847_v17 = vunpack.i.l.bf16 %v2846_v33  ;;  %v2888_v36 = vunpack.i.h.bf16 %v2886_v26  ;;  %v2887_v14 = vunpack.i.l.bf16 %v2886_v26 }
 0x169   : > { %1822 = vmatmul.bf16.gmra.mxu0 %v1655_v49  ;;  %v2873_v49 = vunpack.i.h.bf16 %v4537_v28  ;;  %v1545_v16 = vsel %vm1521_vm7, %v4235_v51, %v2768_v4  ;;  %v1680_v26 = vpack.c.bf16 %v4430_v5, %v4427_v9 }
 0x16a   : > { %v1608_v43 = vsel %vm1587_vm10, %v1575_v10, %v2847_v17  ;;  %v1609_v2 = vsel %vm1587_vm10, %v1576_v8, %v2848_v57  ;;  %v2901_v6 = vpop.permute.xlu2 %2900  ;;  %v1544_v10 = vsel %vm1521_vm7, %v4239_v24, %v2767_v21 }
 0x16b   : > { %v2851_v50 = vpop.permute.xlu1 %2850  ;;  %v1577_v8 = vsel %vm1554_vm9, %v1544_v10, %v2872_v1  ;;  %v1578_v28 = vsel %vm1554_vm9, %v1545_v16, %v2873_v49  ;;  %v2902_v4 = vunpack.i.l.bf16 %v2901_v6  ;;  %v1381_v16 = vrot.slane %v4331_v0, 2 }
 0x16c   : > { %v2853_v61 = vunpack.i.h.bf16 %v2851_v50  ;;  %v2852_v18 = vunpack.i.l.bf16 %v2851_v50 }
 0x16d   : > { %v4587_v46 = vpop.f32.mrf.mxu1  ;;  %v1579_v5 = vsel %vm1554_vm9, %v4437_v54, %v2902_v4 }
 0x16e   : > { %v1641_v42 = vsel %vm1620_vm11, %v1608_v43, %v2852_v18  ;;  %v1642_v19 = vsel %vm1620_vm11, %v1609_v2, %v2853_v61 }
 0x16f   : > { %v1673_v31 = vpack.c.bf16 %v1642_v19, %v1641_v42  ;;  %v2861_v52 = vpop.permute.xlu0 %2860 }
 0x170   : > { %v2863_v13 = vunpack.i.h.bf16 %v2861_v52  ;;  %v2862_v62 = vunpack.i.l.bf16 %v2861_v52 }
 0x171   : > { %1867 = vmatmul.bf16.gmra.mxu2 %v1673_v31 }
 0x172   : > { %v1592_v12 = vsel %vm1587_vm10, %v1559_v32, %v2862_v62  ;;  %v1593_v55 = vsel %vm1587_vm10, %v1560_v15, %v2863_v13  ;;  %v2916_v42 = vpop.permute.xlu2 %2915  ;;  %v1561_v62 = vsel %vm1554_vm9, %v4323_v27, %v2887_v14  ;;  %v1562_v32 = vsel %vm1554_vm9, %v4327_v20, %v2888_v36 }
 0x173   : > { %v2866_v38 = vpop.permute.xlu1 %2865  ;;  %v1384_v36 = vrot.slane %v4338_v35, 2 }
 0x174   : > { %v2868_v34 = vunpack.i.h.bf16 %v2866_v38  ;;  %v2867_v40 = vunpack.i.l.bf16 %v2866_v38  ;;  %2273 = vmatmul.msk.bf16.gmra.mxu3 %vm1422_vm4, %v1678_v11 }
 0x175   : > { %v4603_v15 = vpop.f32.mrf.mxu1 }
 0x176   : > { %v1625_v44 = vsel %vm1620_vm11, %v1592_v12, %v2867_v40  ;;  %v1626_v60 = vsel %vm1620_vm11, %v1593_v55, %v2868_v34  ;;  %v2903_v40 = vunpack.i.h.bf16 %v2901_v6 }
 0x177   : > { %v1657_v33 = vpack.c.bf16 %v1626_v60, %v1625_v44  ;;  %v2876_v57 = vpop.permute.xlu0 %2875 }
 0x178   : > { %v2878_v17 = vunpack.i.h.bf16 %v2876_v57  ;;  %v2877_v29 = vunpack.i.l.bf16 %v2876_v57  ;;  %v1580_v60 = vsel %vm1554_vm9, %v4441_v37, %v2903_v40 }
 0x179   : > { %1827 = vmatmul.bf16.gmra.mxu0 %v1657_v33 }
 0x17a   : > { %v1610_v43 = vsel %vm1587_vm10, %v1577_v8, %v2877_v29  ;;  %v1611_v2 = vsel %vm1587_vm10, %v1578_v28, %v2878_v17  ;;  %v2931_v1 = vpop.permute.xlu2 %2930  ;;  %v1382_v8 = vrot.slane %v4334_v56, 2  ;;  %v2918_v28 = vunpack.i.h.bf16 %v2916_v42 }
 0x17b   : > { %v2881_v50 = vpop.permute.xlu1 %2880 }
 0x17c   : > { %v2883_v61 = vunpack.i.h.bf16 %v2881_v50  ;;  %v2882_v18 = vunpack.i.l.bf16 %v2881_v50  ;;  %v2917_v50 = vunpack.i.l.bf16 %v2916_v42  ;;  %v1564_v0 = vsel %vm1554_vm9, %v4347_v47, %v2918_v28 }
 0x17d   : > { %v4618_v10 = vpop.f32.mrf.mxu1  ;;  %v1383_v42 = vsel %vm701_vm3, %v1381_v16, %v1382_v8 }
 0x17e   : > { %v1643_v24 = vsel %vm1620_vm11, %v1610_v43, %v2882_v18  ;;  %v1644_v19 = vsel %vm1620_vm11, %v1611_v2, %v2883_v61  ;;  %v1563_v14 = vsel %vm1554_vm9, %v4351_v30, %v2917_v50  ;;  %v2932_v30 = vunpack.i.l.bf16 %v2931_v1 }
 0x17f   : > { %v1675_v51 = vpack.c.bf16 %v1644_v19, %v1643_v24  ;;  %v2891_v31 = vpop.permute.xlu0 %2890  ;;  %v1385_v24 = vsel %vm701_vm3, %v1382_v8, %v1384_v36 }
 0x180   : > { %v2893_v52 = vunpack.i.h.bf16 %v2891_v31  ;;  %v2892_v13 = vunpack.i.l.bf16 %v2891_v31 }
 0x181   : > { %1872 = vmatmul.bf16.gmra.mxu2 %v1675_v51 }
 0x182   : > { %v1594_v38 = vsel %vm1587_vm10, %v1561_v62, %v2892_v13  ;;  %v1595_v12 = vsel %vm1587_vm10, %v1562_v32, %v2893_v52  ;;  %v2946_v56 = vpop.permute.xlu2 %2945  ;;  %v1682_v52 = vpack.c.bf16 %v1385_v24, %v1383_v42  ;;  %v2933_v62 = vunpack.i.h.bf16 %v2931_v1 }
 0x183   : > { %v2896_v11 = vpop.permute.xlu1 %2895 }
 0x184   : > { %v2898_v55 = vunpack.i.h.bf16 %v2896_v11  ;;  %v2897_v34 = vunpack.i.l.bf16 %v2896_v11  ;;  %2274 = vmatmul.msk.bf16.gmra.mxu3 %vm1422_vm4, %v1680_v26  ;;  %v1582_v40 = vsel %vm1554_vm9, %v4465_v3, %v2933_v62  ;;  %v1386_v3 = vrot.slane %v4413_v25, 2 }
 0x185   : > { %v4636_v26 = vpop.f32.mrf.mxu1 }
 0x186   : > { %v1627_v27 = vsel %vm1620_vm11, %v1594_v38, %v2897_v34  ;;  %v1628_v20 = vsel %vm1620_vm11, %v1595_v12, %v2898_v55  ;;  %v1581_v34 = vsel %vm1554_vm9, %v4461_v45, %v2932_v30  ;;  %v1387_v28 = vsel %vm701_vm3, %v1384_v36, %v1386_v3 }
 0x187   : > { %v1659_v21 = vpack.c.bf16 %v1628_v20, %v1627_v27  ;;  %v2906_v49 = vpop.permute.xlu0 %2905 }
 0x188   : > { %v2908_v44 = vunpack.i.h.bf16 %v2906_v49  ;;  %v2907_v9 = vunpack.i.l.bf16 %v2906_v49 }
 0x189   : > { %1832 = vmatmul.bf16.gmra.mxu0 %v1659_v21 }
 0x18a   : > { %v1612_v57 = vsel %vm1587_vm10, %v1579_v5, %v2907_v9  ;;  %v1613_v6 = vsel %vm1587_vm10, %v1580_v60, %v2908_v44  ;;  %v2961_v21 = vpop.permute.xlu2 %2960  ;;  %v2948_v44 = vunpack.i.h.bf16 %v2946_v56  ;;  %v2947_v9 = vunpack.i.l.bf16 %v2946_v56 }
 0x18b   : > { %v2911_v33 = vpop.permute.xlu1 %2910 }
 0x18c   : > { %v2913_v17 = vunpack.i.h.bf16 %v2911_v33  ;;  %v2912_v29 = vunpack.i.l.bf16 %v2911_v33  ;;  %v1565_v16 = vsel %vm1554_vm9, %v4224_v59, %v2947_v9  ;;  %v1566_v8 = vsel %vm1554_vm9, %v4227_v23, %v2948_v44 }
 0x18d   : > { %v2962_v59 = vunpack.i.l.bf16 %v2961_v21 }
 0x18e   : > { %v1645_v54 = vsel %vm1620_vm11, %v1612_v57, %v2912_v29  ;;  %v1646_v43 = vsel %vm1620_vm11, %v1613_v6, %v2913_v17  ;;  %v4646_v17 = vpop.f32.mrf.mxu1  ;;  %v1388_v29 = vrot.slane %v4416_v7, 2 }
 0x18f   : > { %v1677_v37 = vpack.c.bf16 %v1646_v43, %v1645_v54  ;;  %v2921_v2 = vpop.permute.xlu0 %2920  ;;  %v1550_v24 = vsel %vm1521_vm7, %v4276_v53, %v2962_v59 }
 0x190   : > { %v2923_v61 = vunpack.i.h.bf16 %v2921_v2  ;;  %v2922_v18 = vunpack.i.l.bf16 %v2921_v2  ;;  %v1389_v50 = vsel %vm701_vm3, %v1386_v3, %v1388_v29 }
 0x191   : > { %1877 = vmatmul.bf16.gmra.mxu2 %v1677_v37  ;;  %v1684_v2 = vpack.c.bf16 %v1389_v50, %v1387_v28  ;;  %v5062_v50 = vld [vmem:[#allocation20_spill] sm:$0xff] }
 0x192   : > { %v1596_v51 = vsel %vm1587_vm10, %v1563_v14, %v2922_v18  ;;  %v1597_v31 = vsel %vm1587_vm10, %v1564_v0, %v2923_v61  ;;  %v2976_v7 = vpop.permute.xlu2 %2975  ;;  %v2963_v18 = vunpack.i.h.bf16 %v2961_v21 }
 0x193   : > { %v2926_v19 = vpop.permute.xlu1 %2925  ;;  %v2977_v62 = vunpack.i.l.bf16 %v2976_v7 }
 0x194   : > { %v2928_v13 = vunpack.i.h.bf16 %v2926_v19  ;;  %v2927_v35 = vunpack.i.l.bf16 %v2926_v19  ;;  %2275 = vmatmul.msk.bf16.gmra.mxu3 %vm1422_vm4, %v1682_v52  ;;  %v1551_v19 = vsel %vm1521_vm7, %v4272_v39, %v2963_v18 }
 0x196   : > { %v1629_v32 = vsel %vm1620_vm11, %v1596_v51, %v2927_v35  ;;  %v1630_v47 = vsel %vm1620_vm11, %v1597_v31, %v2928_v13  ;;  %v4665_v51 = vpop.f32.mrf.mxu1  ;;  %v2978_v35 = vunpack.i.h.bf16 %v2976_v7 }
 0x197   : > { %v1661_v11 = vpack.c.bf16 %v1630_v47, %v1629_v32  ;;  %v2936_v38 = vpop.permute.xlu0 %2935 }
 0x198   : > { %v2938_v12 = vunpack.i.h.bf16 %v2936_v38  ;;  %v2937_v55 = vunpack.i.l.bf16 %v2936_v38 }
 0x199   : > { %1837 = vmatmul.bf16.gmra.mxu0 %v1661_v11 }
 0x19a   : > { %v1614_v27 = vsel %vm1587_vm10, %v1581_v34, %v2937_v55  ;;  %v1615_v20 = vsel %vm1587_vm10, %v1582_v40, %v2938_v12  ;;  %v2991_v38 = vpop.permute.xlu2 %2990 }
 0x19b   : > { %v2941_v4 = vpop.permute.xlu1 %2940  ;;  %v2992_v44 = vunpack.i.l.bf16 %v2991_v38 }
 0x19c   : > { %v2943_v49 = vunpack.i.h.bf16 %v2941_v4  ;;  %v2942_v1 = vunpack.i.l.bf16 %v2941_v4  ;;  %v5060_v4 = vld [vmem:[#allocation9_spill] sm:$0xff] }
 0x19e   : > { %v1647_v5 = vsel %vm1620_vm11, %v1614_v27, %v2942_v1  ;;  %v1648_v60 = vsel %vm1620_vm11, %v1615_v20, %v2943_v49  ;;  %v5061_v20 = vld [vmem:[#allocation22_spill] sm:$0xff]  ;;  %v2993_v1 = vunpack.i.h.bf16 %v2991_v38 }
 0x19f   : > { %v1679_v33 = vpack.c.bf16 %v1648_v60, %v1647_v5  ;;  %v2951_v57 = vpop.permute.xlu0 %2950  ;;  %v4677_v60 = vpop.f32.mrf.mxu1 }
 0x1a0   : > { %v2953_v45 = vunpack.i.h.bf16 %v2951_v57  ;;  %v2952_v6 = vunpack.i.l.bf16 %v2951_v57 }
 0x1a1   : > { %1882 = vmatmul.bf16.gmra.mxu2 %v1679_v33 }
 0x1a2   : > { %v1598_v43 = vsel %vm1587_vm10, %v1565_v16, %v2952_v6  ;;  %v1599_v37 = vsel %vm1587_vm10, %v1566_v8, %v2953_v45  ;;  %v3006_v28 = vpop.permute.xlu2 %3005 }
 0x1a3   : > { %v2956_v54 = vpop.permute.xlu1 %2955  ;;  %v3008_v7 = vunpack.i.h.bf16 %v3006_v28  ;;  %v3007_v18 = vunpack.i.l.bf16 %v3006_v28 }
 0x1a4   : > { %v2958_v25 = vunpack.i.h.bf16 %v2956_v54  ;;  %v2957_v61 = vunpack.i.l.bf16 %v2956_v54  ;;  %2276 = vmatmul.msk.bf16.gmra.mxu3 %vm1422_vm4, %v1684_v2 }
 0x1a6   : > { %v1631_v14 = vsel %vm1620_vm11, %v1598_v43, %v2957_v61  ;;  %v1632_v23 = vsel %vm1620_vm11, %v1599_v37, %v2958_v25  ;;  %v5063_v43 = vld [vmem:[#allocation8_spill] sm:$0xff] }
 0x1a7   : > { %v1663_v36 = vpack.c.bf16 %v1632_v23, %v1631_v14  ;;  %v2966_v0 = vpop.permute.xlu0 %2965  ;;  %v4689_v23 = vpop.f32.mrf.mxu1 }
 0x1a8   : > { %v2968_v56 = vunpack.i.h.bf16 %v2966_v0  ;;  %v2967_v42 = vunpack.i.l.bf16 %v2966_v0 }
 0x1a9   : > { %1842 = vmatmul.bf16.gmra.mxu0 %v1663_v36 }
 0x1aa   : > { %v1583_v31 = vsel %vm1554_vm9, %v1550_v24, %v2967_v42  ;;  %v1584_v52 = vsel %vm1554_vm9, %v1551_v19, %v2968_v56  ;;  %v3021_v19 = vpop.permute.xlu2 %3020 }
 0x1ab   : > { %v2971_v13 = vpop.permute.xlu1 %2970 }
 0x1ac   : > { %v2973_v30 = vunpack.i.h.bf16 %v2971_v13  ;;  %v2972_v32 = vunpack.i.l.bf16 %v2971_v13 }
 0x1ae   : > { %v1616_v47 = vsel %vm1587_vm10, %v1583_v31, %v2972_v32  ;;  %v1617_v11 = vsel %vm1587_vm10, %v1584_v52, %v2973_v30  ;;  %v3023_v32 = vunpack.i.h.bf16 %v3021_v19 }
 0x1af   : > { %v2981_v53 = vpop.permute.xlu0 %2980  ;;  %v1649_v12 = vsel %vm1620_vm11, %v1616_v47, %v2977_v62  ;;  %v1650_v39 = vsel %vm1620_vm11, %v1617_v11, %v2978_v35  ;;  %v3022_v47 = vunpack.i.l.bf16 %v3021_v19  ;;  %v5064_v11 = vld [vmem:[#allocation23_spill] sm:$0xff] }
 0x1b0   : > { %v2983_v55 = vunpack.i.h.bf16 %v2981_v53  ;;  %v2982_v34 = vunpack.i.l.bf16 %v2981_v53  ;;  %v1681_v40 = vpack.c.bf16 %v1650_v39, %v1649_v12  ;;  %v5065_v53 = vld [vmem:[#allocation29_spill] sm:$0xff] }
 0x1b2   : > { %1887 = vmatmul.bf16.gmra.mxu2 %v1681_v40  ;;  %v1567_v27 = vsel %vm1554_vm9, %v5060_v4, %v2982_v34  ;;  %v1568_v21 = vsel %vm1554_vm9, %v5061_v20, %v2983_v55  ;;  %v4699_v40 = vpop.f32.mrf.mxu1 }
 0x1b3   : > { %v2986_v49 = vpop.permute.xlu1 %2985 }
 0x1b4   : > { %v2988_v9 = vunpack.i.h.bf16 %v2986_v49  ;;  %v2987_v5 = vunpack.i.l.bf16 %v2986_v49 }
 0x1b6   : > { %v1600_v33 = vsel %vm1587_vm10, %v1567_v27, %v2987_v5  ;;  %v1601_v57 = vsel %vm1587_vm10, %v1568_v21, %v2988_v9 }
 0x1b7   : > { %v2996_v45 = vpop.permute.xlu0 %2995  ;;  %v1633_v6 = vsel %vm1620_vm11, %v1600_v33, %v2992_v44  ;;  %v1634_v3 = vsel %vm1620_vm11, %v1601_v57, %v2993_v1  ;;  %v4708_v44 = vld [vmem:[#allocation4] ss:$0 sm:$0xff] }
 0x1b8   : > { %v2998_v29 = vunpack.i.h.bf16 %v2996_v45  ;;  %v2997_v16 = vunpack.i.l.bf16 %v2996_v45  ;;  %v1665_v8 = vpack.c.bf16 %v1634_v3, %v1633_v6  ;;  %v5066_v3 = vld [vmem:[#allocation25_spill] sm:$0xff] }
 0x1ba   : > { %1847 = vmatmul.bf16.gmra.mxu0 %v1665_v8  ;;  %v1552_v54 = vsel %vm1521_vm7, %v5062_v50, %v2997_v16  ;;  %v1553_v37 = vsel %vm1521_vm7, %v5063_v43, %v2998_v29  ;;  %v1947_v9 = vpop.f32.mrf.mxu1 }
 0x1bb   : > { %v3001_v2 = vpop.permute.xlu1 %3000 }
 0x1bc   : > { %v3003_v25 = vunpack.i.h.bf16 %v3001_v2  ;;  %v3002_v61 = vunpack.i.l.bf16 %v3001_v2 }
 0x1be   : > { %v1585_v59 = vsel %vm1554_vm9, %v1552_v54, %v3002_v61  ;;  %v1586_v14 = vsel %vm1554_vm9, %v1553_v37, %v3003_v25 }
 0x1bf   : > { %v3011_v36 = vpop.permute.xlu0 %3010  ;;  %v1618_v42 = vsel %vm1587_vm10, %v1585_v59, %v3007_v18  ;;  %v1619_v24 = vsel %vm1587_vm10, %v1586_v14, %v3008_v7  ;;  %v5067_v18 = vld [vmem:[#allocation26_spill] sm:$0xff] }
 0x1c0   : > { %v3013_v0 = vunpack.i.h.bf16 %v3011_v36  ;;  %v3012_v56 = vunpack.i.l.bf16 %v3011_v36 }
 0x1c2   : > { %v1651_v31 = vsel %vm1620_vm11, %v1618_v42, %v3012_v56  ;;  %v1652_v52 = vsel %vm1620_vm11, %v1619_v24, %v3013_v0  ;;  %v1949_v43 = vpop.f32.mrf.mxu1 }
 0x1c3   : > { %v3016_v13 = vpop.permute.xlu1 %3015  ;;  %v1683_v35 = vpack.c.bf16 %v1652_v52, %v1651_v31 }
 0x1c4   : > { %v3018_v62 = vunpack.i.h.bf16 %v3016_v13  ;;  %v3017_v30 = vunpack.i.l.bf16 %v3016_v13 }
 0x1c5   : > { %1892 = vmatmul.bf16.gmra.mxu2 %v1683_v35 }
 0x1c6   : > { %v1569_v38 = vsel %vm1554_vm9, %v5064_v11, %v3017_v30  ;;  %v1570_v12 = vsel %vm1554_vm9, %v5065_v53, %v3018_v62 }
 0x1c7   : > { %v3026_v39 = vpop.permute.xlu0 %3025  ;;  %v1602_v4 = vsel %vm1587_vm10, %v1569_v38, %v3022_v47  ;;  %v1603_v27 = vsel %vm1587_vm10, %v1570_v12, %v3023_v32  ;;  %v1952_v1 = vpop.f32.mrf.mxu3 }
 0x1c8   : > { %v3028_v55 = vunpack.i.h.bf16 %v3026_v39  ;;  %v3027_v34 = vunpack.i.l.bf16 %v3026_v39 }
 0x1ca   : > { %v1635_v20 = vsel %vm1620_vm11, %v1602_v4, %v3027_v34  ;;  %v1636_v21 = vsel %vm1620_vm11, %v1603_v27, %v3028_v55 }
 0x1cb   : > { %v1667_v49 = vpack.c.bf16 %v1636_v21, %v1635_v20 }
 0x1cd   : > { %1852 = vmatmul.bf16.gmra.mxu0 %v1667_v49 }
 0x1cf   : > { %v1954_v8 = vpop.f32.mrf.mxu3 }
 0x1d4   : > { %v1858_v5 = vpop.f32.mrf.mxu2 }
 0x1d5   : > { %v1859_v33 = vadd.f32 %v4708_v44, %v1858_v5 }
 0x1d6   : > { %v1818_v57 = vpop.f32.mrf.mxu0 }
 0x1d7   : > { %v1819_v45 = vadd.f32 %v4708_v44, %v1818_v57  ;;  %v1948_v6 = vadd.f32 %v1947_v9, %v1859_v33  ;;  %v1957_v56 = vpop.f32.mrf.mxu3 }
 0x1d9   : > { %v1908_v29 = vadd.f32 %v5066_v3, %v1819_v45  ;;  %v2003_v16 = vmax.f32 %v1948_v6, 0.0 }
 0x1db   : > { %v1987_v28 = vmax.f32 %v1908_v29, 0.0  ;;  %v2035_v50 = vpack.c.bf16 %v2003_v16, %v2003_v16 }
 0x1dc   : > { %v1860_v54 = vpop.f32.mrf.mxu2 }
 0x1dd   : > { %v2019_v37 = vpack.c.bf16 %v1987_v28, %v1987_v28  ;;  %2068 = vst.msk [vmem:[%s4716_s13 + $0x40] sm:$0xf] %vm2051_vm12, %v2035_v50  ;;  %v1861_v2 = vadd.f32 %v4708_v44, %v1860_v54 }
 0x1de   : > { %v1820_v25 = vpop.f32.mrf.mxu0 }
 0x1df   : > { %2052 = vst.msk [vmem:[%s4716_s13] sm:$0xf] %vm2051_vm12, %v2019_v37  ;;  %v1821_v61 = vadd.f32 %v4708_v44, %v1820_v25  ;;  %v1950_v7 = vadd.f32 %v1949_v43, %v1861_v2  ;;  %v1959_v53 = vpop.f32.mrf.mxu3 }
 0x1e1   : > { %v1910_v59 = vadd.f32 %v5067_v18, %v1821_v61  ;;  %v2004_v14 = vmax.f32 %v1950_v7, 0.0 }
 0x1e3   : > { %v1988_v36 = vmax.f32 %v1910_v59, 0.0  ;;  %v2036_v0 = vpack.c.bf16 %v2004_v14, %v2004_v14 }
 0x1e4   : > { %v1863_v42 = vpop.f32.mrf.mxu2 }
 0x1e5   : > { %v2020_v24 = vpack.c.bf16 %v1988_v36, %v1988_v36  ;;  %2069 = vst.msk [vmem:[%s4716_s13 + $0x44] sm:$0xf] %vm2051_vm12, %v2036_v0  ;;  %v1864_v19 = vadd.f32 %v4708_v44, %v1863_v42 }
 0x1e6   : > { %v1823_v31 = vpop.f32.mrf.mxu0 }
 0x1e7   : > { %2053 = vst.msk [vmem:[%s4716_s13 + $0x4] sm:$0xf] %vm2051_vm12, %v2020_v24  ;;  %v1824_v52 = vadd.f32 %v4708_v44, %v1823_v31  ;;  %v1953_v13 = vadd.f32 %v1952_v1, %v1864_v19  ;;  %v1962_v33 = vpop.f32.mrf.mxu3 }
 0x1e9   : > { %v1913_v35 = vadd.f32 %v4473_v22, %v1824_v52  ;;  %v2005_v62 = vmax.f32 %v1953_v13, 0.0 }
 0x1eb   : > { %v1989_v30 = vmax.f32 %v1913_v35, 0.0  ;;  %v2037_v32 = vpack.c.bf16 %v2005_v62, %v2005_v62 }
 0x1ec   : > { %v1865_v47 = vpop.f32.mrf.mxu2 }
 0x1ed   : > { %v2021_v11 = vpack.c.bf16 %v1989_v30, %v1989_v30  ;;  %2070 = vst.msk [vmem:[%s4716_s13 + $0x48] sm:$0xf] %vm2051_vm12, %v2037_v32  ;;  %v1866_v38 = vadd.f32 %v4708_v44, %v1865_v47 }
 0x1ee   : > { %v1825_v12 = vpop.f32.mrf.mxu0 }
 0x1ef   : > { %2054 = vst.msk [vmem:[%s4716_s13 + $0x8] sm:$0xf] %vm2051_vm12, %v2021_v11  ;;  %v1826_v39 = vadd.f32 %v4708_v44, %v1825_v12  ;;  %v1955_v55 = vadd.f32 %v1954_v8, %v1866_v38  ;;  %v1964_v43 = vpop.f32.mrf.mxu3 }
 0x1f1   : > { %v1915_v22 = vadd.f32 %v4496_v63, %v1826_v39  ;;  %v2006_v34 = vmax.f32 %v1955_v55, 0.0 }
 0x1f3   : > { %v1990_v4 = vmax.f32 %v1915_v22, 0.0  ;;  %v2038_v27 = vpack.c.bf16 %v2006_v34, %v2006_v34 }
 0x1f4   : > { %v1868_v20 = vpop.f32.mrf.mxu2 }
 0x1f5   : > { %v2022_v21 = vpack.c.bf16 %v1990_v4, %v1990_v4  ;;  %2071 = vst.msk [vmem:[%s4716_s13 + $0x4c] sm:$0xf] %vm2051_vm12, %v2038_v27  ;;  %v1869_v49 = vadd.f32 %v4708_v44, %v1868_v20 }
 0x1f6   : > { %v1828_v1 = vpop.f32.mrf.mxu0 }
 0x1f7   : > { %2055 = vst.msk [vmem:[%s4716_s13 + $0xc] sm:$0xf] %vm2051_vm12, %v2022_v21  ;;  %v1829_v9 = vadd.f32 %v4708_v44, %v1828_v1  ;;  %v1958_v5 = vadd.f32 %v1957_v56, %v1869_v49  ;;  %v1967_v42 = vpop.f32.mrf.mxu3 }
 0x1f9   : > { %v1918_v63 = vadd.f32 %v4527_v41, %v1829_v9  ;;  %v2007_v57 = vmax.f32 %v1958_v5, 0.0 }
 0x1fb   : > { %v1991_v45 = vmax.f32 %v1918_v63, 0.0  ;;  %v2039_v6 = vpack.c.bf16 %v2007_v57, %v2007_v57 }
 0x1fc   : > { %v1870_v3 = vpop.f32.mrf.mxu2 }
 0x1fd   : > { %v2023_v29 = vpack.c.bf16 %v1991_v45, %v1991_v45  ;;  %2072 = vst.msk [vmem:[%s4716_s13 + $0x50] sm:$0xf] %vm2051_vm12, %v2039_v6  ;;  %v1871_v16 = vadd.f32 %v4708_v44, %v1870_v3 }
 0x1fe   : > { %v1830_v8 = vpop.f32.mrf.mxu0 }
 0x1ff   : > { %2056 = vst.msk [vmem:[%s4716_s13 + $0x10] sm:$0xf] %vm2051_vm12, %v2023_v29  ;;  %v1831_v28 = vadd.f32 %v4708_v44, %v1830_v8  ;;  %v1960_v50 = vadd.f32 %v1959_v53, %v1871_v16  ;;  %v1969_v53 = vpop.f32.mrf.mxu3 }
 0x201   : > { %v1920_v54 = vadd.f32 %v4549_v58, %v1831_v28  ;;  %v2008_v41 = vmax.f32 %v1960_v50, 0.0 }
 0x203   : > { %v1992_v37 = vmax.f32 %v1920_v54, 0.0  ;;  %v2040_v2 = vpack.c.bf16 %v2008_v41, %v2008_v41 }
 0x204   : > { %v1873_v25 = vpop.f32.mrf.mxu2 }
 0x205   : > { %v2024_v61 = vpack.c.bf16 %v1992_v37, %v1992_v37  ;;  %2073 = vst.msk [vmem:[%s4716_s13 + $0x54] sm:$0xf] %vm2051_vm12, %v2040_v2  ;;  %v1874_v7 = vadd.f32 %v4708_v44, %v1873_v25 }
 0x206   : > { %v1833_v18 = vpop.f32.mrf.mxu0 }
 0x207   : > { %2057 = vst.msk [vmem:[%s4716_s13 + $0x14] sm:$0xf] %vm2051_vm12, %v2024_v61  ;;  %v1834_v59 = vadd.f32 %v4708_v44, %v1833_v18  ;;  %v1963_v14 = vadd.f32 %v1962_v33, %v1874_v7  ;;  %v1972_v5 = vpop.f32.mrf.mxu3 }
 0x209   : > { %v1923_v58 = vadd.f32 %v4570_v48, %v1834_v59  ;;  %v2009_v36 = vmax.f32 %v1963_v14, 0.0 }
 0x20b   : > { %v1993_v0 = vmax.f32 %v1923_v58, 0.0  ;;  %v2041_v56 = vpack.c.bf16 %v2009_v36, %v2009_v36 }
 0x20c   : > { %v1875_v24 = vpop.f32.mrf.mxu2 }
 0x20d   : > { %v2025_v19 = vpack.c.bf16 %v1993_v0, %v1993_v0  ;;  %2074 = vst.msk [vmem:[%s4716_s13 + $0x58] sm:$0xf] %vm2051_vm12, %v2041_v56  ;;  %v1876_v31 = vadd.f32 %v4708_v44, %v1875_v24 }
 0x20e   : > { %v1835_v52 = vpop.f32.mrf.mxu0 }
 0x20f   : > { %2058 = vst.msk [vmem:[%s4716_s13 + $0x18] sm:$0xf] %vm2051_vm12, %v2025_v19  ;;  %v1836_v13 = vadd.f32 %v4708_v44, %v1835_v52  ;;  %v1965_v35 = vadd.f32 %v1964_v43, %v1876_v31  ;;  %v1974_v50 = vpop.f32.mrf.mxu3 }
 0x211   : > { %v1925_v48 = vadd.f32 %v4587_v46, %v1836_v13  ;;  %v2010_v62 = vmax.f32 %v1965_v35, 0.0 }
 0x213   : > { %v1994_v30 = vmax.f32 %v1925_v48, 0.0  ;;  %v2042_v32 = vpack.c.bf16 %v2010_v62, %v2010_v62 }
 0x214   : > { %v1878_v47 = vpop.f32.mrf.mxu2 }
 0x215   : > { %v2026_v11 = vpack.c.bf16 %v1994_v30, %v1994_v30  ;;  %2075 = vst.msk [vmem:[%s4716_s13 + $0x5c] sm:$0xf] %vm2051_vm12, %v2042_v32  ;;  %v1879_v38 = vadd.f32 %v4708_v44, %v1878_v47 }
 0x216   : > { %v1838_v12 = vpop.f32.mrf.mxu0 }
 0x217   : > { %2059 = vst.msk [vmem:[%s4716_s13 + $0x1c] sm:$0xf] %vm2051_vm12, %v2026_v11  ;;  %v1839_v39 = vadd.f32 %v4708_v44, %v1838_v12  ;;  %v1968_v55 = vadd.f32 %v1967_v42, %v1879_v38  ;;  %v1977_v58 = vpop.f32.mrf.mxu3 }
 0x219   : > { %v1928_v46 = vadd.f32 %v4603_v15, %v1839_v39  ;;  %v2011_v22 = vmax.f32 %v1968_v55, 0.0 }
 0x21b   : > { %v1995_v34 = vmax.f32 %v1928_v46, 0.0  ;;  %v2043_v4 = vpack.c.bf16 %v2011_v22, %v2011_v22 }
 0x21c   : > { %v1880_v27 = vpop.f32.mrf.mxu2 }
 0x21d   : > { %v2027_v20 = vpack.c.bf16 %v1995_v34, %v1995_v34  ;;  %2076 = vst.msk [vmem:[%s4716_s13 + $0x60] sm:$0xf] %vm2051_vm12, %v2043_v4  ;;  %v1881_v21 = vadd.f32 %v4708_v44, %v1880_v27 }
 0x21e   : > { %v1840_v49 = vpop.f32.mrf.mxu0 }
 0x21f   : > { %2060 = vst.msk [vmem:[%s4716_s13 + $0x20] sm:$0xf] %vm2051_vm12, %v2027_v20  ;;  %v1841_v1 = vadd.f32 %v4708_v44, %v1840_v49  ;;  %v1970_v9 = vadd.f32 %v1969_v53, %v1881_v21  ;;  %v1979_v48 = vpop.f32.mrf.mxu3 }
 0x221   : > { %v1930_v15 = vadd.f32 %v4618_v10, %v1841_v1  ;;  %v2012_v33 = vmax.f32 %v1970_v9, 0.0 }
 0x223   : > { %v1996_v63 = vmax.f32 %v1930_v15, 0.0  ;;  %v2044_v57 = vpack.c.bf16 %v2012_v33, %v2012_v33 }
 0x224   : > { %v1883_v45 = vpop.f32.mrf.mxu2 }
 0x225   : > { %v2028_v6 = vpack.c.bf16 %v1996_v63, %v1996_v63  ;;  %2077 = vst.msk [vmem:[%s4716_s13 + $0x64] sm:$0xf] %vm2051_vm12, %v2044_v57  ;;  %v1884_v3 = vadd.f32 %v4708_v44, %v1883_v45 }
 0x226   : > { %v1843_v29 = vpop.f32.mrf.mxu0 }
 0x227   : > { %2061 = vst.msk [vmem:[%s4716_s13 + $0x24] sm:$0xf] %vm2051_vm12, %v2028_v6  ;;  %v1844_v16 = vadd.f32 %v4708_v44, %v1843_v29  ;;  %v1973_v8 = vadd.f32 %v1972_v5, %v1884_v3  ;;  %v1982_v55 = vpop.f32.mrf.mxu3 }
 0x229   : > { %v1933_v28 = vadd.f32 %v4636_v26, %v1844_v16  ;;  %v2013_v10 = vmax.f32 %v1973_v8, 0.0 }
 0x22b   : > { %v1997_v54 = vmax.f32 %v1933_v28, 0.0  ;;  %v2045_v41 = vpack.c.bf16 %v2013_v10, %v2013_v10 }
 0x22c   : > { %v1885_v43 = vpop.f32.mrf.mxu2 }
 0x22d   : > { %v2029_v37 = vpack.c.bf16 %v1997_v54, %v1997_v54  ;;  %2078 = vst.msk [vmem:[%s4716_s13 + $0x68] sm:$0xf] %vm2051_vm12, %v2045_v41  ;;  %v1886_v2 = vadd.f32 %v4708_v44, %v1885_v43 }
 0x22e   : > { %v1845_v25 = vpop.f32.mrf.mxu0 }
 0x22f   : > { %2062 = vst.msk [vmem:[%s4716_s13 + $0x28] sm:$0xf] %vm2051_vm12, %v2029_v37  ;;  %v1846_v61 = vadd.f32 %v4708_v44, %v1845_v25  ;;  %v1975_v7 = vadd.f32 %v1974_v50, %v1886_v2  ;;  %v1984_v15 = vpop.f32.mrf.mxu3 }
 0x231   : > { %v1935_v26 = vadd.f32 %v4646_v17, %v1846_v61  ;;  %v2014_v18 = vmax.f32 %v1975_v7, 0.0 }
 0x233   : > { %v1998_v59 = vmax.f32 %v1935_v26, 0.0  ;;  %v2046_v14 = vpack.c.bf16 %v2014_v18, %v2014_v18 }
 0x235   : > { %v2030_v36 = vpack.c.bf16 %v1998_v59, %v1998_v59  ;;  %2079 = vst.msk [vmem:[%s4716_s13 + $0x6c] sm:$0xf] %vm2051_vm12, %v2046_v14  ;;  %v1888_v0 = vpop.f32.mrf.mxu2 }
 0x236   : > { %v1889_v56 = vadd.f32 %v4708_v44, %v1888_v0 }
 0x237   : > { %2063 = vst.msk [vmem:[%s4716_s13 + $0x2c] sm:$0xf] %vm2051_vm12, %v2030_v36  ;;  %v1848_v42 = vpop.f32.mrf.mxu0 }
 0x238   : > { %v1849_v24 = vadd.f32 %v4708_v44, %v1848_v42  ;;  %v1978_v19 = vadd.f32 %v1977_v58, %v1889_v56 }
 0x23a   : > { %v1938_v17 = vadd.f32 %v4665_v51, %v1849_v24  ;;  %v2015_v31 = vmax.f32 %v1978_v19, 0.0 }
 0x23c   : > { %v1999_v52 = vmax.f32 %v1938_v17, 0.0  ;;  %v2047_v13 = vpack.c.bf16 %v2015_v31, %v2015_v31 }
 0x23d   : > { %v1890_v35 = vpop.f32.mrf.mxu2 }
 0x23e   : > { %v2031_v62 = vpack.c.bf16 %v1999_v52, %v1999_v52  ;;  %2080 = vst.msk [vmem:[%s4716_s13 + $0x70] sm:$0xf] %vm2051_vm12, %v2047_v13  ;;  %v1891_v30 = vadd.f32 %v4708_v44, %v1890_v35 }
 0x23f   : > { %v1850_v32 = vpop.f32.mrf.mxu0 }
 0x240   : > { %2064 = vst.msk [vmem:[%s4716_s13 + $0x30] sm:$0xf] %vm2051_vm12, %v2031_v62  ;;  %v1851_v47 = vadd.f32 %v4708_v44, %v1850_v32  ;;  %v1980_v11 = vadd.f32 %v1979_v48, %v1891_v30 }
 0x242   : > { %v1940_v51 = vadd.f32 %v4677_v60, %v1851_v47  ;;  %v2016_v38 = vmax.f32 %v1980_v11, 0.0 }
 0x244   : > { %v2000_v53 = vmax.f32 %v1940_v51, 0.0  ;;  %v2048_v12 = vpack.c.bf16 %v2016_v38, %v2016_v38 }
 0x246   : > { %v2032_v39 = vpack.c.bf16 %v2000_v53, %v2000_v53  ;;  %2081 = vst.msk [vmem:[%s4716_s13 + $0x74] sm:$0xf] %vm2051_vm12, %v2048_v12 }
 0x248   : > { %2065 = vst.msk [vmem:[%s4716_s13 + $0x34] sm:$0xf] %vm2051_vm12, %v2032_v39  ;;  %v1893_v46 = vpop.f32.mrf.mxu2 }
 0x249   : > { %v1894_v22 = vadd.f32 %v4708_v44, %v1893_v46 }
 0x24a   : > { %v1853_v34 = vpop.f32.mrf.mxu0 }
 0x24b   : > { %v1983_v4 = vadd.f32 %v1982_v55, %v1894_v22  ;;  %v1854_v27 = vadd.f32 %v4708_v44, %v1853_v34 }
 0x24d   : > { %v2017_v20 = vmax.f32 %v1983_v4, 0.0  ;;  %v1943_v60 = vadd.f32 %v4689_v23, %v1854_v27 }
 0x24f   : > { %v2049_v21 = vpack.c.bf16 %v2017_v20, %v2017_v20  ;;  %v2001_v49 = vmax.f32 %v1943_v60, 0.0 }
 0x250   : > { %v1895_v1 = vpop.f32.mrf.mxu2 }
 0x251   : > { %2082 = vst.msk [vmem:[%s4716_s13 + $0x78] sm:$0xf] %vm2051_vm12, %v2049_v21  ;;  %v2033_v9 = vpack.c.bf16 %v2001_v49, %v2001_v49  ;;  %v1896_v5 = vadd.f32 %v4708_v44, %v1895_v1 }
 0x252   : > { %v1855_v33 = vpop.f32.mrf.mxu0 }
 0x253   : > { %2066 = vst.msk [vmem:[%s4716_s13 + $0x38] sm:$0xf] %vm2051_vm12, %v2033_v9  ;;  %v1985_v63 = vadd.f32 %v1984_v15, %v1896_v5  ;;  %v1856_v57 = vadd.f32 %v4708_v44, %v1855_v33 }
 0x255   : > { %v2018_v45 = vmax.f32 %v1985_v63, 0.0  ;;  %v1945_v23 = vadd.f32 %v4699_v40, %v1856_v57 }
 0x257   : > { %v2050_v6 = vpack.c.bf16 %v2018_v45, %v2018_v45  ;;  %v2002_v3 = vmax.f32 %v1945_v23, 0.0 }
 0x259   : > { %2083 = vst.msk [vmem:[%s4716_s13 + $0x7c] sm:$0xf] %vm2051_vm12, %v2050_v6  ;;  %v2034_v29 = vpack.c.bf16 %v2002_v3, %v2002_v3 }
 0x25b   : > { %2067 = vst.msk [vmem:[%s4716_s13 + $0x3c] sm:$0xf] %vm2051_vm12, %v2034_v29 }
 0x25c PF: > { %s15_s16 = sadd.s32 1, %s3136_s16   ;;  %s5068_s12 = smov %s3128_s14 }
 0x25d   : > { %p12_p0 = scmp.ge.s32.totalorder %s15_s16, 10   ;;  %s5069_s13 = smov %s3132_s15 }
 0x25e   : > { %s5070_s14 = smov %s5073_s18  ;;  %s5071_s15 = smov %s5077_s19 }
 0x25f   :  { %14 = sbr.rel (!%p12_p0) target bundleno = 4 (0x4), region = 74 }
 0x264   :  { %2116 = vsyncpa [#allocation3], 1 }
 0x265   :  { %2118 = vsyncpa [#allocation3 + $0x1], 1 }
 0x266   :  { %2119 = vsyncpa [#allocation5], 1 }

</bundles_post_ra>
